<compile_context>
chip_gen: v7x
topology: tpu7x:2x2x1
jax: 0.10.0
libtpu: 0.0.40
codegen_flags: <defaults>
</compile_context>

<pallas_src>
import math
import functools

import jax
import jax.numpy as jnp
from jax.experimental import pallas as pl
from jax.experimental.pallas import tpu as pltpu


def _layernorm(v, gamma, beta, eps=1e-5):
    # v: (N, C) f32 ; gamma/beta: (1, C) f32.  (v - mu) hoisted: computed once.
    mu = jnp.mean(v, axis=-1, keepdims=True)
    d = v - mu
    var = jnp.mean(d * d, axis=-1, keepdims=True)
    return d * jax.lax.rsqrt(var + eps) * gamma + beta


def _new_gelu(x):
    # 0.5 * x * (1 + tanh(sqrt(2/pi) * (x + 0.044715 * x^3)))
    c = math.sqrt(2.0 / math.pi)
    return 0.5 * x * (1.0 + jnp.tanh(c * (x + 0.044715 * x * x * x)))


def _block_kernel(
    # inputs
    x_ref,
    ln1_g_ref, ln1_b_ref,
    wq_ref, wk_ref, wv_ref,          # (H, C, D) bf16  (wq pre-scaled by 1/sqrt(D))
    bq_ref, bk_ref, bv_ref,          # (H, 1, D) f32   (bq pre-scaled)
    wo_ref, bo_ref,                  # (H, D, C) bf16 ; (1, C) f32
    ln2_g_ref, ln2_b_ref,
    w1_ref, b1_ref,                  # (C, 4C) bf16 ; (1, 4C) f32
    w2_ref, b2_ref,                  # (4C, C) bf16 ; (1, C) f32
    # output
    o_ref,
    *, n_head,
):
    bb, T, C = x_ref.shape           # one grid step == `bb` batch elements
    H = n_head
    D = C // H
    N = bb * T                       # rows fed to every row-wise matmul
    f32 = jnp.float32
    bf16 = jnp.bfloat16

    x = x_ref[...].reshape(N, C)     # (N, C) f32

    # ---------------- attention branch ----------------
    h = _layernorm(x, ln1_g_ref[...], ln1_b_ref[...])            # f32
    hb = h.astype(bf16)

    # Per-head projections stacked on the LEADING axis: static leading-axis
    # stacks/reshapes never cross lane tiles (no XLU relayout copies).
    q_heads, k_heads, v_heads = [], [], []
    for hd in range(H):
        q_heads.append(jnp.dot(hb, wq_ref[hd], preferred_element_type=f32) + bq_ref[hd])
        k_heads.append(jnp.dot(hb, wk_ref[hd], preferred_element_type=f32) + bk_ref[hd])
        v_heads.append(jnp.dot(hb, wv_ref[hd], preferred_element_type=f32) + bv_ref[hd])
    qb = jnp.stack(q_heads, axis=0).reshape(H * bb, T, D).astype(bf16)   # (H*bb, T, D)
    kb = jnp.stack(k_heads, axis=0).reshape(H * bb, T, D).astype(bf16)
    vb = jnp.stack(v_heads, axis=0).reshape(H * bb, T, D).astype(bf16)

    # scores stay f32 (the -1e30 additive mask would saturate in bf16)
    scores = jnp.einsum('bqd,bkd->bqk', qb, kb,
                        preferred_element_type=f32)               # (H*bb, T, T)
    row = jax.lax.broadcasted_iota(jnp.int32, (T, T), 0)
    col = jax.lax.broadcasted_iota(jnp.int32, (T, T), 1)
    add_mask = jnp.where(col <= row, 0.0, -1e30).astype(f32)      # additive causal mask
    scores = scores + add_mask                                    # one add, not a select
    m = jnp.max(scores, axis=-1, keepdims=True)
    p = jnp.exp(scores - m)
    denom = jnp.sum(p, axis=-1, keepdims=True)                    # >= 1 (diag unmasked)
    p = p * pl.reciprocal(denom, approx=True)                     # EUP, not VPU divide
    ctx = jnp.einsum('bqk,bkd->bqd', p.astype(bf16), vb,
                     preferred_element_type=f32)                  # (H*bb, T, D)

    # Output projection: f32 accumulation of per-head dots (leading-axis
    # slices only; no lane-axis concatenate).
    attn = jnp.zeros((N, C), f32)
    for hd in range(H):
        ctx_h = ctx[hd * bb:(hd + 1) * bb].reshape(N, D).astype(bf16)
        attn = attn + jnp.dot(ctx_h, wo_ref[hd], preferred_element_type=f32)
    attn = attn + bo_ref[...]
    x1 = x + attn                                                 # residual 1 (f32)

    # ---------------- FFN branch ----------------
    h2 = _layernorm(x1, ln2_g_ref[...], ln2_b_ref[...])
    f = jnp.dot(h2.astype(bf16), w1_ref[...], preferred_element_type=f32) + b1_ref[...]
    f = _new_gelu(f)                                              # f32 elementwise
    f = jnp.dot(f.astype(bf16), w2_ref[...], preferred_element_type=f32) + b2_ref[...]
    x2 = x1 + f                                                   # residual 2 (f32)

    o_ref[...] = x2.reshape(bb, T, C).astype(o_ref.dtype)


def _pick_batch_block(B, T, n_head, target_rows=256,
                      score_budget_bytes=16 * 1024 * 1024):
    """Pick a divisor bb of B: keep >= 2 grid steps when B >= 2 (megacore /
    DMA overlap), bound the f32 score tile, then grow bb toward target rows."""
    divisors = [d for d in range(1, B + 1) if B % d == 0]
    cand = [d for d in divisors if B // d >= 2] or divisors
    # ~3 live f32 copies of the (H*bb, T, T) score tile (scores / exp / probs)
    score_bytes = lambda d: 3 * 4 * n_head * d * T * T
    fit = [d for d in cand if score_bytes(d) <= score_budget_bytes]
    if not fit:
        fit = [cand[0]]   # TODO(synk): flash-style KV tiling once even bb=1 blows the budget
    for d in fit:
        if d * T >= target_rows:
            return d
    return fit[-1]


def gpt_block(x, params, n_head):
    """x: (B, T, C) float32. params: dict of f32 weights (see init_params)."""
    B, T, C = x.shape
    H = n_head
    assert C % H == 0
    D = C // H

    try:
        vmem_cap = int(pltpu.get_tpu_info().vmem_capacity_bytes)
    except Exception:
        vmem_cap = 64 * 1024 * 1024          # conservative (v7x per-TC)
    headroom = 8 * 1024 * 1024

    bb = _pick_batch_block(B, T, H, score_budget_bytes=vmem_cap // 4)
    n_blocks = B // bb
    rows = bb * T

    bf16 = jnp.bfloat16
    f32 = jnp.float32
    scale = 1.0 / math.sqrt(D)

    # Trace-time weight prep: split + head-major reshape of QKV / out-proj,
    # fold the softmax scale into the Q projection, cast weights to bf16.
    wqkv, bqkv = params["wqkv"], params["bqkv"]
    wq = (wqkv[:, 0 * C:1 * C] * scale).reshape(C, H, D).transpose(1, 0, 2).astype(bf16)
    wk = wqkv[:, 1 * C:2 * C].reshape(C, H, D).transpose(1, 0, 2).astype(bf16)
    wv = wqkv[:, 2 * C:3 * C].reshape(C, H, D).transpose(1, 0, 2).astype(bf16)
    bq = (bqkv[:, 0 * C:1 * C] * scale).reshape(1, H, D).transpose(1, 0, 2).astype(f32)
    bk = bqkv[:, 1 * C:2 * C].reshape(1, H, D).transpose(1, 0, 2).astype(f32)
    bv = bqkv[:, 2 * C:3 * C].reshape(1, H, D).transpose(1, 0, 2).astype(f32)
    wo = params["wo"].reshape(H, D, C).astype(bf16)
    w1 = params["w1"].astype(bf16)
    w2 = params["w2"].astype(bf16)

    def _const_index_map(ndim):
        return (lambda b: (0, 0)) if ndim == 2 else (lambda b: (0, 0, 0))

    def make_in_specs(single_buffer_weights):
        def const(shape):
            imap = _const_index_map(len(shape))
            if single_buffer_weights:
                return pl.BlockSpec(shape, imap, pipeline_mode=pl.Buffered(1))
            return pl.BlockSpec(shape, imap)
        return [
            pl.BlockSpec((bb, T, C), lambda b: (b, 0, 0)),        # x (double-buffered)
            const((1, C)), const((1, C)),                         # ln1 gamma/beta
            const((H, C, D)), const((H, C, D)), const((H, C, D)), # wq, wk, wv
            const((H, 1, D)), const((H, 1, D)), const((H, 1, D)), # bq, bk, bv
            const((H, D, C)), const((1, C)),                      # attn out proj
            const((1, C)), const((1, C)),                         # ln2 gamma/beta
            const((C, 4 * C)), const((1, 4 * C)),                 # ffn in
            const((4 * C, C)), const((1, C)),                     # ffn out
        ]

    out_spec = pl.BlockSpec((bb, T, C), lambda b: (b, 0, 0))

    # ---- VMEM estimate (counts FFN hidden, bf16 copies, score temporaries) ----
    wgt_bytes = 2 * (12 * C * C) + 4 * (14 * C)     # bf16 weights + f32 biases/LN
    act_bytes = (4 * rows * C * 14                  # f32 row temps (x/h/q/k/v/ctx/attn/residuals)
                 + 2 * rows * C * 8                 # bf16 copies (h, q, k, v, ctx, attn-in)
                 + 4 * rows * 4 * C * 2             # FFN hidden f32 (pre/post GELU)
                 + 2 * rows * 4 * C                 # FFN hidden bf16 cast
                 + 3 * 4 * H * bb * T * T)          # scores + exp + probs (f32)
    io_bytes = 2 * 2 * rows * C * 4                 # x in + out, double-buffered

    flops = 24 * B * T * C * C + 4 * B * T * T * C
    transcendentals = B * H * T * T + 4 * B * T * C
    bytes_accessed = 2 * B * T * C * 4 + 12 * C * C * 2 + 14 * C * 4

    kernel = functools.partial(_block_kernel, n_head=H)
    args = (x,
            params["ln1_g"], params["ln1_b"],
            wq, wk, wv, bq, bk, bv,
            wo, params["bo"],
            params["ln2_g"], params["ln2_b"],
            w1, params["b1"],
            w2, params["b2"])

    def run(single_buffer_weights):
        w_mult = 1 if single_buffer_weights else 2
        est = w_mult * wgt_bytes + act_bytes + io_bytes
        vmem_limit = int(min(max(est, 32 * 1024 * 1024), vmem_cap - headroom))
        return pl.pallas_call(
            kernel,
            out_shape=jax.ShapeDtypeStruct((B, T, C), jnp.float32),
            grid_spec=pltpu.PrefetchScalarGridSpec(
                num_scalar_prefetch=0,
                grid=(n_blocks,),
                in_specs=make_in_specs(single_buffer_weights),
                out_specs=out_spec,
            ),
            compiler_params=pltpu.CompilerParams(
                dimension_semantics=("parallel",),   # batch blocks are independent
                vmem_limit_bytes=vmem_limit,
            ),
            cost_estimate=pl.CostEstimate(
                flops=int(flops),
                transcendentals=int(transcendentals),
                bytes_accessed=int(bytes_accessed),
            ),
        )(*args)

    # Prefer single-buffered constant weights; fall back to default buffering
    # if this JAX build rejects pipeline_mode / Buffered(1).
    if hasattr(pl, "Buffered"):
        try:
            return run(True)
        except Exception:
            pass
    return run(False)


def init_params(key, C):
    """Deterministic synthetic parameters matching the module's shapes (f32)."""
    ks = jax.random.split(key, 8)
    s = 0.02
    return {
        "ln1_g": jnp.ones((1, C), jnp.float32),
        "ln1_b": jnp.zeros((1, C), jnp.float32),
        "wqkv": s * jax.random.normal(ks[0], (C, 3 * C), jnp.float32),
        "bqkv": s * jax.random.normal(ks[1], (1, 3 * C), jnp.float32),
        "wo":   s * jax.random.normal(ks[2], (C, C), jnp.float32),
        "bo":   s * jax.random.normal(ks[3], (1, C), jnp.float32),
        "ln2_g": jnp.ones((1, C), jnp.float32),
        "ln2_b": jnp.zeros((1, C), jnp.float32),
        "w1":   s * jax.random.normal(ks[4], (C, 4 * C), jnp.float32),
        "b1":   s * jax.random.normal(ks[5], (1, 4 * C), jnp.float32),
        "w2":   s * jax.random.normal(ks[6], (4 * C, C), jnp.float32),
        "b2":   s * jax.random.normal(ks[7], (1, C), jnp.float32),
    }


def gpt_block_reference(x, params, n_head):
    """Pure-JAX f32 reference mirroring the PyTorch Block forward."""
    B, T, C = x.shape
    H = n_head
    D = C // H

    def ln(v, g, b):
        mu = jnp.mean(v, -1, keepdims=True)
        var = jnp.mean((v - mu) ** 2, -1, keepdims=True)
        return (v - mu) * jax.lax.rsqrt(var + 1e-5) * g + b

    h = ln(x, params["ln1_g"], params["ln1_b"])
    qkv = h @ params["wqkv"] + params["bqkv"]
    q, k, v = jnp.split(qkv, 3, axis=-1)
    q = q.reshape(B, T, H, D).transpose(0, 2, 1, 3)
    k = k.reshape(B, T, H, D).transpose(0, 2, 1, 3)
    v = v.reshape(B, T, H, D).transpose(0, 2, 1, 3)
    s = (q @ jnp.swapaxes(k, -1, -2)) / math.sqrt(D)
    mask = jnp.tril(jnp.ones((T, T), bool))
    s = jnp.where(mask, s, -jnp.inf)
    p = jax.nn.softmax(s, axis=-1)
    o = (p @ v).transpose(0, 2, 1, 3).reshape(B, T, C)
    x = x + o @ params["wo"] + params["bo"]
    h2 = ln(x, params["ln2_g"], params["ln2_b"])
    f = h2 @ params["w1"] + params["b1"]
    f = 0.5 * f * (1.0 + jnp.tanh(math.sqrt(2.0 / math.pi) * (f + 0.044715 * f ** 3)))
    return x + f @ params["w2"] + params["b2"]


if __name__ == "__main__":
    # small shapes consistent with the module: batch=2, seq=8, model_dim=32, heads=4
    B, T, C, H = 2, 8, 32, 4
    key = jax.random.PRNGKey(0)
    kx, kp = jax.random.split(key)
    x = jax.random.normal(kx, (B, T, C), jnp.float32)
    params = init_params(kp, C)

    out = gpt_block(x, params, n_head=H)
    jax.block_until_ready(out)
    assert out.shape == (B, T, C)

    # Loose tolerance: kernel uses bf16 matmul operands + approx reciprocal.
    ref = gpt_block_reference(x, params, H)
    max_err = float(jnp.max(jnp.abs(out - ref)))
    assert max_err < 5e-2, f"max abs error {max_err}"
    print("KERNEL_OK")
</pallas_src>

<mosaic_0001>
module attributes {stable_mosaic.version = 11 : i64} {
  func.func @_block_kernel(%arg0: i32, %arg1: memref<1x8x32xf32, #tpu.memory_space<vmem>>, %arg2: memref<1x32xf32, #tpu.memory_space<vmem>>, %arg3: memref<1x32xf32, #tpu.memory_space<vmem>>, %arg4: memref<4x32x8xbf16, #tpu.memory_space<vmem>>, %arg5: memref<4x32x8xbf16, #tpu.memory_space<vmem>>, %arg6: memref<4x32x8xbf16, #tpu.memory_space<vmem>>, %arg7: memref<4x1x8xf32, #tpu.memory_space<vmem>>, %arg8: memref<4x1x8xf32, #tpu.memory_space<vmem>>, %arg9: memref<4x1x8xf32, #tpu.memory_space<vmem>>, %arg10: memref<4x8x32xbf16, #tpu.memory_space<vmem>>, %arg11: memref<1x32xf32, #tpu.memory_space<vmem>>, %arg12: memref<1x32xf32, #tpu.memory_space<vmem>>, %arg13: memref<1x32xf32, #tpu.memory_space<vmem>>, %arg14: memref<32x128xbf16, #tpu.memory_space<vmem>>, %arg15: memref<1x128xf32, #tpu.memory_space<vmem>>, %arg16: memref<128x32xbf16, #tpu.memory_space<vmem>>, %arg17: memref<1x32xf32, #tpu.memory_space<vmem>>, %arg18: memref<1x8x32xf32, #tpu.memory_space<vmem>>) attributes {dimension_semantics = [#tpu.dimension_semantics<parallel>], iteration_bounds = array<i64: 2>, scalar_prefetch = 0 : i64, scratch_operands = 0 : i64, tpu.core_type = #tpu.core_type<tc>, window_params = [{transform_indices = @transform_0, window_bounds = array<i64: 1, 8, 32>}, {pipeline_mode = #tpu.pipeline_mode<synchronous>, transform_indices = @transform_1, window_bounds = array<i64: 1, 32>}, {pipeline_mode = #tpu.pipeline_mode<synchronous>, transform_indices = @transform_2, window_bounds = array<i64: 1, 32>}, {pipeline_mode = #tpu.pipeline_mode<synchronous>, transform_indices = @transform_3, window_bounds = array<i64: 4, 32, 8>}, {pipeline_mode = #tpu.pipeline_mode<synchronous>, transform_indices = @transform_4, window_bounds = array<i64: 4, 32, 8>}, {pipeline_mode = #tpu.pipeline_mode<synchronous>, transform_indices = @transform_5, window_bounds = array<i64: 4, 32, 8>}, {pipeline_mode = #tpu.pipeline_mode<synchronous>, transform_indices = @transform_6, window_bounds = array<i64: 4, 1, 8>}, {pipeline_mode = #tpu.pipeline_mode<synchronous>, transform_indices = @transform_7, window_bounds = array<i64: 4, 1, 8>}, {pipeline_mode = #tpu.pipeline_mode<synchronous>, transform_indices = @transform_8, window_bounds = array<i64: 4, 1, 8>}, {pipeline_mode = #tpu.pipeline_mode<synchronous>, transform_indices = @transform_9, window_bounds = array<i64: 4, 8, 32>}, {pipeline_mode = #tpu.pipeline_mode<synchronous>, transform_indices = @transform_10, window_bounds = array<i64: 1, 32>}, {pipeline_mode = #tpu.pipeline_mode<synchronous>, transform_indices = @transform_11, window_bounds = array<i64: 1, 32>}, {pipeline_mode = #tpu.pipeline_mode<synchronous>, transform_indices = @transform_12, window_bounds = array<i64: 1, 32>}, {pipeline_mode = #tpu.pipeline_mode<synchronous>, transform_indices = @transform_13, window_bounds = array<i64: 32, 128>}, {pipeline_mode = #tpu.pipeline_mode<synchronous>, transform_indices = @transform_14, window_bounds = array<i64: 1, 128>}, {pipeline_mode = #tpu.pipeline_mode<synchronous>, transform_indices = @transform_15, window_bounds = array<i64: 128, 32>}, {pipeline_mode = #tpu.pipeline_mode<synchronous>, transform_indices = @transform_16, window_bounds = array<i64: 1, 32>}, {transform_indices = @transform_17, window_bounds = array<i64: 1, 8, 32>}]} {
    %c0 = arith.constant 0 : index
    %c0_0 = arith.constant 0 : index
    %c0_1 = arith.constant 0 : index
    %0 = vector.load %arg1[%c0, %c0_0, %c0_1] : memref<1x8x32xf32, #tpu.memory_space<vmem>>, vector<1x8x32xf32>
    %1 = vector.shape_cast %0 : vector<1x8x32xf32> to vector<8x32xf32>
    %c0_2 = arith.constant 0 : index
    %c0_3 = arith.constant 0 : index
    %2 = vector.load %arg2[%c0_2, %c0_3] : memref<1x32xf32, #tpu.memory_space<vmem>>, vector<1x32xf32>
    %c0_4 = arith.constant 0 : index
    %c0_5 = arith.constant 0 : index
    %3 = vector.load %arg3[%c0_4, %c0_5] : memref<1x32xf32, #tpu.memory_space<vmem>>, vector<1x32xf32>
    %cst = arith.constant dense<0.000000e+00> : vector<8xf32>
    %4 = vector.multi_reduction <add>, %1, %cst [1] : vector<8x32xf32> to vector<8xf32>
    %5 = vector.shape_cast %4 : vector<8xf32> to vector<8x1xf32>
    %cst_6 = arith.constant 3.200000e+01 : f32
    %6 = vector.broadcast %cst_6 : f32 to vector<8x1xf32>
    %7 = arith.divf %5, %6 : vector<8x1xf32>
    %8 = vector.broadcast %7 : vector<8x1xf32> to vector<8x32xf32>
    %9 = arith.subf %1, %8 : vector<8x32xf32>
    %10 = arith.mulf %9, %9 : vector<8x32xf32>
    %cst_7 = arith.constant dense<0.000000e+00> : vector<8xf32>
    %11 = vector.multi_reduction <add>, %10, %cst_7 [1] : vector<8x32xf32> to vector<8xf32>
    %12 = vector.shape_cast %11 : vector<8xf32> to vector<8x1xf32>
    %cst_8 = arith.constant 3.200000e+01 : f32
    %13 = vector.broadcast %cst_8 : f32 to vector<8x1xf32>
    %14 = arith.divf %12, %13 : vector<8x1xf32>
    %cst_9 = arith.constant 9.99999974E-6 : f32
    %15 = vector.broadcast %cst_9 : f32 to vector<8x1xf32>
    %16 = arith.addf %14, %15 : vector<8x1xf32>
    %17 = math.rsqrt %16 : vector<8x1xf32>
    %18 = vector.broadcast %17 : vector<8x1xf32> to vector<8x32xf32>
    %19 = arith.mulf %9, %18 : vector<8x32xf32>
    %20 = vector.broadcast %2 : vector<1x32xf32> to vector<8x32xf32>
    %21 = arith.mulf %19, %20 : vector<8x32xf32>
    %22 = vector.broadcast %3 : vector<1x32xf32> to vector<8x32xf32>
    %23 = arith.addf %21, %22 : vector<8x32xf32>
    %24 = arith.truncf %23 : vector<8x32xf32> to vector<8x32xbf16>
    %c0_10 = arith.constant 0 : index
    %c0_11 = arith.constant 0 : index
    %c0_12 = arith.constant 0 : index
    %25 = vector.load %arg4[%c0_10, %c0_11, %c0_12] : memref<4x32x8xbf16, #tpu.memory_space<vmem>>, vector<1x32x8xbf16>
    %26 = vector.shape_cast %25 : vector<1x32x8xbf16> to vector<32x8xbf16>
    %cst_13 = arith.constant dense<0.000000e+00> : vector<8x8xf32>
    %27 = tpu.matmul %24, %26, %cst_13 {dimension_numbers = #tpu.dot_dimension_numbers<[1], [0], [0], [1], [0, 0, 1, 1], [], []>} : vector<8x32xbf16>, vector<32x8xbf16>, vector<8x8xf32> -> vector<8x8xf32>
    %c0_14 = arith.constant 0 : index
    %c0_15 = arith.constant 0 : index
    %c0_16 = arith.constant 0 : index
    %28 = vector.load %arg7[%c0_14, %c0_15, %c0_16] : memref<4x1x8xf32, #tpu.memory_space<vmem>>, vector<1x1x8xf32>
    %29 = vector.shape_cast %28 : vector<1x1x8xf32> to vector<1x8xf32>
    %30 = vector.broadcast %29 : vector<1x8xf32> to vector<8x8xf32>
    %31 = arith.addf %27, %30 : vector<8x8xf32>
    %c0_17 = arith.constant 0 : index
    %c0_18 = arith.constant 0 : index
    %c0_19 = arith.constant 0 : index
    %32 = vector.load %arg5[%c0_17, %c0_18, %c0_19] : memref<4x32x8xbf16, #tpu.memory_space<vmem>>, vector<1x32x8xbf16>
    %33 = vector.shape_cast %32 : vector<1x32x8xbf16> to vector<32x8xbf16>
    %cst_20 = arith.constant dense<0.000000e+00> : vector<8x8xf32>
    %34 = tpu.matmul %24, %33, %cst_20 {dimension_numbers = #tpu.dot_dimension_numbers<[1], [0], [0], [1], [0, 0, 1, 1], [], []>} : vector<8x32xbf16>, vector<32x8xbf16>, vector<8x8xf32> -> vector<8x8xf32>
    %c0_21 = arith.constant 0 : index
    %c0_22 = arith.constant 0 : index
    %c0_23 = arith.constant 0 : index
    %35 = vector.load %arg8[%c0_21, %c0_22, %c0_23] : memref<4x1x8xf32, #tpu.memory_space<vmem>>, vector<1x1x8xf32>
    %36 = vector.shape_cast %35 : vector<1x1x8xf32> to vector<1x8xf32>
    %37 = vector.broadcast %36 : vector<1x8xf32> to vector<8x8xf32>
    %38 = arith.addf %34, %37 : vector<8x8xf32>
    %c0_24 = arith.constant 0 : index
    %c0_25 = arith.constant 0 : index
    %c0_26 = arith.constant 0 : index
    %39 = vector.load %arg6[%c0_24, %c0_25, %c0_26] : memref<4x32x8xbf16, #tpu.memory_space<vmem>>, vector<1x32x8xbf16>
    %40 = vector.shape_cast %39 : vector<1x32x8xbf16> to vector<32x8xbf16>
    %cst_27 = arith.constant dense<0.000000e+00> : vector<8x8xf32>
    %41 = tpu.matmul %24, %40, %cst_27 {dimension_numbers = #tpu.dot_dimension_numbers<[1], [0], [0], [1], [0, 0, 1, 1], [], []>} : vector<8x32xbf16>, vector<32x8xbf16>, vector<8x8xf32> -> vector<8x8xf32>
    %c0_28 = arith.constant 0 : index
    %c0_29 = arith.constant 0 : index
    %c0_30 = arith.constant 0 : index
    %42 = vector.load %arg9[%c0_28, %c0_29, %c0_30] : memref<4x1x8xf32, #tpu.memory_space<vmem>>, vector<1x1x8xf32>
    %43 = vector.shape_cast %42 : vector<1x1x8xf32> to vector<1x8xf32>
    %44 = vector.broadcast %43 : vector<1x8xf32> to vector<8x8xf32>
    %45 = arith.addf %41, %44 : vector<8x8xf32>
    %c1 = arith.constant 1 : index
    %c0_31 = arith.constant 0 : index
    %c0_32 = arith.constant 0 : index
    %46 = vector.load %arg4[%c1, %c0_31, %c0_32] : memref<4x32x8xbf16, #tpu.memory_space<vmem>>, vector<1x32x8xbf16>
    %47 = vector.shape_cast %46 : vector<1x32x8xbf16> to vector<32x8xbf16>
    %cst_33 = arith.constant dense<0.000000e+00> : vector<8x8xf32>
    %48 = tpu.matmul %24, %47, %cst_33 {dimension_numbers = #tpu.dot_dimension_numbers<[1], [0], [0], [1], [0, 0, 1, 1], [], []>} : vector<8x32xbf16>, vector<32x8xbf16>, vector<8x8xf32> -> vector<8x8xf32>
    %c1_34 = arith.constant 1 : index
    %c0_35 = arith.constant 0 : index
    %c0_36 = arith.constant 0 : index
    %49 = vector.load %arg7[%c1_34, %c0_35, %c0_36] : memref<4x1x8xf32, #tpu.memory_space<vmem>>, vector<1x1x8xf32>
    %50 = vector.shape_cast %49 : vector<1x1x8xf32> to vector<1x8xf32>
    %51 = vector.broadcast %50 : vector<1x8xf32> to vector<8x8xf32>
    %52 = arith.addf %48, %51 : vector<8x8xf32>
    %c1_37 = arith.constant 1 : index
    %c0_38 = arith.constant 0 : index
    %c0_39 = arith.constant 0 : index
    %53 = vector.load %arg5[%c1_37, %c0_38, %c0_39] : memref<4x32x8xbf16, #tpu.memory_space<vmem>>, vector<1x32x8xbf16>
    %54 = vector.shape_cast %53 : vector<1x32x8xbf16> to vector<32x8xbf16>
    %cst_40 = arith.constant dense<0.000000e+00> : vector<8x8xf32>
    %55 = tpu.matmul %24, %54, %cst_40 {dimension_numbers = #tpu.dot_dimension_numbers<[1], [0], [0], [1], [0, 0, 1, 1], [], []>} : vector<8x32xbf16>, vector<32x8xbf16>, vector<8x8xf32> -> vector<8x8xf32>
    %c1_41 = arith.constant 1 : index
    %c0_42 = arith.constant 0 : index
    %c0_43 = arith.constant 0 : index
    %56 = vector.load %arg8[%c1_41, %c0_42, %c0_43] : memref<4x1x8xf32, #tpu.memory_space<vmem>>, vector<1x1x8xf32>
    %57 = vector.shape_cast %56 : vector<1x1x8xf32> to vector<1x8xf32>
    %58 = vector.broadcast %57 : vector<1x8xf32> to vector<8x8xf32>
    %59 = arith.addf %55, %58 : vector<8x8xf32>
    %c1_44 = arith.constant 1 : index
    %c0_45 = arith.constant 0 : index
    %c0_46 = arith.constant 0 : index
    %60 = vector.load %arg6[%c1_44, %c0_45, %c0_46] : memref<4x32x8xbf16, #tpu.memory_space<vmem>>, vector<1x32x8xbf16>
    %61 = vector.shape_cast %60 : vector<1x32x8xbf16> to vector<32x8xbf16>
    %cst_47 = arith.constant dense<0.000000e+00> : vector<8x8xf32>
    %62 = tpu.matmul %24, %61, %cst_47 {dimension_numbers = #tpu.dot_dimension_numbers<[1], [0], [0], [1], [0, 0, 1, 1], [], []>} : vector<8x32xbf16>, vector<32x8xbf16>, vector<8x8xf32> -> vector<8x8xf32>
    %c1_48 = arith.constant 1 : index
    %c0_49 = arith.constant 0 : index
    %c0_50 = arith.constant 0 : index
    %63 = vector.load %arg9[%c1_48, %c0_49, %c0_50] : memref<4x1x8xf32, #tpu.memory_space<vmem>>, vector<1x1x8xf32>
    %64 = vector.shape_cast %63 : vector<1x1x8xf32> to vector<1x8xf32>
    %65 = vector.broadcast %64 : vector<1x8xf32> to vector<8x8xf32>
    %66 = arith.addf %62, %65 : vector<8x8xf32>
    %c2 = arith.constant 2 : index
    %c0_51 = arith.constant 0 : index
    %c0_52 = arith.constant 0 : index
    %67 = vector.load %arg4[%c2, %c0_51, %c0_52] : memref<4x32x8xbf16, #tpu.memory_space<vmem>>, vector<1x32x8xbf16>
    %68 = vector.shape_cast %67 : vector<1x32x8xbf16> to vector<32x8xbf16>
    %cst_53 = arith.constant dense<0.000000e+00> : vector<8x8xf32>
    %69 = tpu.matmul %24, %68, %cst_53 {dimension_numbers = #tpu.dot_dimension_numbers<[1], [0], [0], [1], [0, 0, 1, 1], [], []>} : vector<8x32xbf16>, vector<32x8xbf16>, vector<8x8xf32> -> vector<8x8xf32>
    %c2_54 = arith.constant 2 : index
    %c0_55 = arith.constant 0 : index
    %c0_56 = arith.constant 0 : index
    %70 = vector.load %arg7[%c2_54, %c0_55, %c0_56] : memref<4x1x8xf32, #tpu.memory_space<vmem>>, vector<1x1x8xf32>
    %71 = vector.shape_cast %70 : vector<1x1x8xf32> to vector<1x8xf32>
    %72 = vector.broadcast %71 : vector<1x8xf32> to vector<8x8xf32>
    %73 = arith.addf %69, %72 : vector<8x8xf32>
    %c2_57 = arith.constant 2 : index
    %c0_58 = arith.constant 0 : index
    %c0_59 = arith.constant 0 : index
    %74 = vector.load %arg5[%c2_57, %c0_58, %c0_59] : memref<4x32x8xbf16, #tpu.memory_space<vmem>>, vector<1x32x8xbf16>
    %75 = vector.shape_cast %74 : vector<1x32x8xbf16> to vector<32x8xbf16>
    %cst_60 = arith.constant dense<0.000000e+00> : vector<8x8xf32>
    %76 = tpu.matmul %24, %75, %cst_60 {dimension_numbers = #tpu.dot_dimension_numbers<[1], [0], [0], [1], [0, 0, 1, 1], [], []>} : vector<8x32xbf16>, vector<32x8xbf16>, vector<8x8xf32> -> vector<8x8xf32>
    %c2_61 = arith.constant 2 : index
    %c0_62 = arith.constant 0 : index
    %c0_63 = arith.constant 0 : index
    %77 = vector.load %arg8[%c2_61, %c0_62, %c0_63] : memref<4x1x8xf32, #tpu.memory_space<vmem>>, vector<1x1x8xf32>
    %78 = vector.shape_cast %77 : vector<1x1x8xf32> to vector<1x8xf32>
    %79 = vector.broadcast %78 : vector<1x8xf32> to vector<8x8xf32>
    %80 = arith.addf %76, %79 : vector<8x8xf32>
    %c2_64 = arith.constant 2 : index
    %c0_65 = arith.constant 0 : index
    %c0_66 = arith.constant 0 : index
    %81 = vector.load %arg6[%c2_64, %c0_65, %c0_66] : memref<4x32x8xbf16, #tpu.memory_space<vmem>>, vector<1x32x8xbf16>
    %82 = vector.shape_cast %81 : vector<1x32x8xbf16> to vector<32x8xbf16>
    %cst_67 = arith.constant dense<0.000000e+00> : vector<8x8xf32>
    %83 = tpu.matmul %24, %82, %cst_67 {dimension_numbers = #tpu.dot_dimension_numbers<[1], [0], [0], [1], [0, 0, 1, 1], [], []>} : vector<8x32xbf16>, vector<32x8xbf16>, vector<8x8xf32> -> vector<8x8xf32>
    %c2_68 = arith.constant 2 : index
    %c0_69 = arith.constant 0 : index
    %c0_70 = arith.constant 0 : index
    %84 = vector.load %arg9[%c2_68, %c0_69, %c0_70] : memref<4x1x8xf32, #tpu.memory_space<vmem>>, vector<1x1x8xf32>
    %85 = vector.shape_cast %84 : vector<1x1x8xf32> to vector<1x8xf32>
    %86 = vector.broadcast %85 : vector<1x8xf32> to vector<8x8xf32>
    %87 = arith.addf %83, %86 : vector<8x8xf32>
    %c3 = arith.constant 3 : index
    %c0_71 = arith.constant 0 : index
    %c0_72 = arith.constant 0 : index
    %88 = vector.load %arg4[%c3, %c0_71, %c0_72] : memref<4x32x8xbf16, #tpu.memory_space<vmem>>, vector<1x32x8xbf16>
    %89 = vector.shape_cast %88 : vector<1x32x8xbf16> to vector<32x8xbf16>
    %cst_73 = arith.constant dense<0.000000e+00> : vector<8x8xf32>
    %90 = tpu.matmul %24, %89, %cst_73 {dimension_numbers = #tpu.dot_dimension_numbers<[1], [0], [0], [1], [0, 0, 1, 1], [], []>} : vector<8x32xbf16>, vector<32x8xbf16>, vector<8x8xf32> -> vector<8x8xf32>
    %c3_74 = arith.constant 3 : index
    %c0_75 = arith.constant 0 : index
    %c0_76 = arith.constant 0 : index
    %91 = vector.load %arg7[%c3_74, %c0_75, %c0_76] : memref<4x1x8xf32, #tpu.memory_space<vmem>>, vector<1x1x8xf32>
    %92 = vector.shape_cast %91 : vector<1x1x8xf32> to vector<1x8xf32>
    %93 = vector.broadcast %92 : vector<1x8xf32> to vector<8x8xf32>
    %94 = arith.addf %90, %93 : vector<8x8xf32>
    %c3_77 = arith.constant 3 : index
    %c0_78 = arith.constant 0 : index
    %c0_79 = arith.constant 0 : index
    %95 = vector.load %arg5[%c3_77, %c0_78, %c0_79] : memref<4x32x8xbf16, #tpu.memory_space<vmem>>, vector<1x32x8xbf16>
    %96 = vector.shape_cast %95 : vector<1x32x8xbf16> to vector<32x8xbf16>
    %cst_80 = arith.constant dense<0.000000e+00> : vector<8x8xf32>
    %97 = tpu.matmul %24, %96, %cst_80 {dimension_numbers = #tpu.dot_dimension_numbers<[1], [0], [0], [1], [0, 0, 1, 1], [], []>} : vector<8x32xbf16>, vector<32x8xbf16>, vector<8x8xf32> -> vector<8x8xf32>
    %c3_81 = arith.constant 3 : index
    %c0_82 = arith.constant 0 : index
    %c0_83 = arith.constant 0 : index
    %98 = vector.load %arg8[%c3_81, %c0_82, %c0_83] : memref<4x1x8xf32, #tpu.memory_space<vmem>>, vector<1x1x8xf32>
    %99 = vector.shape_cast %98 : vector<1x1x8xf32> to vector<1x8xf32>
    %100 = vector.broadcast %99 : vector<1x8xf32> to vector<8x8xf32>
    %101 = arith.addf %97, %100 : vector<8x8xf32>
    %c3_84 = arith.constant 3 : index
    %c0_85 = arith.constant 0 : index
    %c0_86 = arith.constant 0 : index
    %102 = vector.load %arg6[%c3_84, %c0_85, %c0_86] : memref<4x32x8xbf16, #tpu.memory_space<vmem>>, vector<1x32x8xbf16>
    %103 = vector.shape_cast %102 : vector<1x32x8xbf16> to vector<32x8xbf16>
    %cst_87 = arith.constant dense<0.000000e+00> : vector<8x8xf32>
    %104 = tpu.matmul %24, %103, %cst_87 {dimension_numbers = #tpu.dot_dimension_numbers<[1], [0], [0], [1], [0, 0, 1, 1], [], []>} : vector<8x32xbf16>, vector<32x8xbf16>, vector<8x8xf32> -> vector<8x8xf32>
    %c3_88 = arith.constant 3 : index
    %c0_89 = arith.constant 0 : index
    %c0_90 = arith.constant 0 : index
    %105 = vector.load %arg9[%c3_88, %c0_89, %c0_90] : memref<4x1x8xf32, #tpu.memory_space<vmem>>, vector<1x1x8xf32>
    %106 = vector.shape_cast %105 : vector<1x1x8xf32> to vector<1x8xf32>
    %107 = vector.broadcast %106 : vector<1x8xf32> to vector<8x8xf32>
    %108 = arith.addf %104, %107 : vector<8x8xf32>
    %109 = vector.shape_cast %31 : vector<8x8xf32> to vector<1x8x8xf32>
    %110 = vector.shape_cast %52 : vector<8x8xf32> to vector<1x8x8xf32>
    %111 = vector.shape_cast %73 : vector<8x8xf32> to vector<1x8x8xf32>
    %112 = vector.shape_cast %94 : vector<8x8xf32> to vector<1x8x8xf32>
    %113 = tpu.concatenate %109, %110, %111, %112 in 0 : vector<1x8x8xf32>, vector<1x8x8xf32>, vector<1x8x8xf32>, vector<1x8x8xf32> -> vector<4x8x8xf32>
    %114 = arith.truncf %113 : vector<4x8x8xf32> to vector<4x8x8xbf16>
    %115 = vector.shape_cast %38 : vector<8x8xf32> to vector<1x8x8xf32>
    %116 = vector.shape_cast %59 : vector<8x8xf32> to vector<1x8x8xf32>
    %117 = vector.shape_cast %80 : vector<8x8xf32> to vector<1x8x8xf32>
    %118 = vector.shape_cast %101 : vector<8x8xf32> to vector<1x8x8xf32>
    %119 = tpu.concatenate %115, %116, %117, %118 in 0 : vector<1x8x8xf32>, vector<1x8x8xf32>, vector<1x8x8xf32>, vector<1x8x8xf32> -> vector<4x8x8xf32>
    %120 = arith.truncf %119 : vector<4x8x8xf32> to vector<4x8x8xbf16>
    %121 = vector.shape_cast %45 : vector<8x8xf32> to vector<1x8x8xf32>
    %122 = vector.shape_cast %66 : vector<8x8xf32> to vector<1x8x8xf32>
    %123 = vector.shape_cast %87 : vector<8x8xf32> to vector<1x8x8xf32>
    %124 = vector.shape_cast %108 : vector<8x8xf32> to vector<1x8x8xf32>
    %125 = tpu.concatenate %121, %122, %123, %124 in 0 : vector<1x8x8xf32>, vector<1x8x8xf32>, vector<1x8x8xf32>, vector<1x8x8xf32> -> vector<4x8x8xf32>
    %126 = arith.truncf %125 : vector<4x8x8xf32> to vector<4x8x8xbf16>
    "tpu.trace_start"() <{level = 10 : i32, message = "bqd,bkd->bqk"}> : () -> ()
    %cst_91 = arith.constant dense<0.000000e+00> : vector<4x8x8xf32>
    %127 = tpu.matmul %114, %120, %cst_91 {dimension_numbers = #tpu.dot_dimension_numbers<[2], [2], [1], [1], [0, 0, 0, 1, 1, 1], [0], [0]>} : vector<4x8x8xbf16>, vector<4x8x8xbf16>, vector<4x8x8xf32> -> vector<4x8x8xf32>
    "tpu.trace_stop"() : () -> ()
    %128 = tpu.iota {dimensions = array<i32: 0>} : vector<8x8xi32>
    %129 = tpu.iota {dimensions = array<i32: 1>} : vector<8x8xi32>
    %130 = arith.cmpi sle, %129, %128 : vector<8x8xi32>
    %cst_92 = arith.constant 0.000000e+00 : f32
    %cst_93 = arith.constant -1.000000e+30 : f32
    %131 = vector.broadcast %cst_92 : f32 to vector<8x8xf32>
    %132 = vector.broadcast %cst_93 : f32 to vector<8x8xf32>
    %133 = arith.select %130, %131, %132 : vector<8x8xi1>, vector<8x8xf32>
    %134 = vector.shape_cast %133 : vector<8x8xf32> to vector<1x8x8xf32>
    %135 = vector.broadcast %134 : vector<1x8x8xf32> to vector<4x8x8xf32>
    %136 = arith.addf %127, %135 : vector<4x8x8xf32>
    %cst_94 = arith.constant dense<0xFF800000> : vector<4x8xf32>
    %137 = vector.multi_reduction <maximumf>, %136, %cst_94 [2] : vector<4x8x8xf32> to vector<4x8xf32>
    %138 = vector.shape_cast %137 : vector<4x8xf32> to vector<4x8x1xf32>
    %139 = vector.broadcast %138 : vector<4x8x1xf32> to vector<4x8x8xf32>
    %140 = arith.subf %136, %139 : vector<4x8x8xf32>
    %141 = math.exp %140 : vector<4x8x8xf32>
    %cst_95 = arith.constant dense<0.000000e+00> : vector<4x8xf32>
    %142 = vector.multi_reduction <add>, %141, %cst_95 [2] : vector<4x8x8xf32> to vector<4x8xf32>
    %143 = vector.shape_cast %142 : vector<4x8xf32> to vector<4x8x1xf32>
    %144 = tpu.reciprocal %143 {approx = true} : vector<4x8x1xf32> -> vector<4x8x1xf32>
    %145 = vector.broadcast %144 : vector<4x8x1xf32> to vector<4x8x8xf32>
    %146 = arith.mulf %141, %145 : vector<4x8x8xf32>
    %147 = arith.truncf %146 : vector<4x8x8xf32> to vector<4x8x8xbf16>
    "tpu.trace_start"() <{level = 10 : i32, message = "bqk,bkd->bqd"}> : () -> ()
    %cst_96 = arith.constant dense<0.000000e+00> : vector<4x8x8xf32>
    %148 = tpu.matmul %147, %126, %cst_96 {dimension_numbers = #tpu.dot_dimension_numbers<[2], [1], [1], [2], [0, 0, 0, 1, 1, 2], [0], [0]>} : vector<4x8x8xbf16>, vector<4x8x8xbf16>, vector<4x8x8xf32> -> vector<4x8x8xf32>
    %cst_97 = arith.constant 0.000000e+00 : f32
    "tpu.trace_stop"() : () -> ()
    %149 = vector.broadcast %cst_97 : f32 to vector<8x32xf32>
    %150 = vector.extract_strided_slice %148 {offsets = [0, 0, 0], sizes = [1, 8, 8], strides = [1, 1, 1]} : vector<4x8x8xf32> to vector<1x8x8xf32>
    %151 = vector.shape_cast %150 : vector<1x8x8xf32> to vector<8x8xf32>
    %152 = arith.truncf %151 : vector<8x8xf32> to vector<8x8xbf16>
    %c0_98 = arith.constant 0 : index
    %c0_99 = arith.constant 0 : index
    %c0_100 = arith.constant 0 : index
    %153 = vector.load %arg10[%c0_98, %c0_99, %c0_100] : memref<4x8x32xbf16, #tpu.memory_space<vmem>>, vector<1x8x32xbf16>
    %154 = vector.shape_cast %153 : vector<1x8x32xbf16> to vector<8x32xbf16>
    %cst_101 = arith.constant dense<0.000000e+00> : vector<8x32xf32>
    %155 = tpu.matmul %152, %154, %cst_101 {dimension_numbers = #tpu.dot_dimension_numbers<[1], [0], [0], [1], [0, 0, 1, 1], [], []>} : vector<8x8xbf16>, vector<8x32xbf16>, vector<8x32xf32> -> vector<8x32xf32>
    %156 = arith.addf %149, %155 : vector<8x32xf32>
    %157 = vector.extract_strided_slice %148 {offsets = [1, 0, 0], sizes = [1, 8, 8], strides = [1, 1, 1]} : vector<4x8x8xf32> to vector<1x8x8xf32>
    %158 = vector.shape_cast %157 : vector<1x8x8xf32> to vector<8x8xf32>
    %159 = arith.truncf %158 : vector<8x8xf32> to vector<8x8xbf16>
    %c1_102 = arith.constant 1 : index
    %c0_103 = arith.constant 0 : index
    %c0_104 = arith.constant 0 : index
    %160 = vector.load %arg10[%c1_102, %c0_103, %c0_104] : memref<4x8x32xbf16, #tpu.memory_space<vmem>>, vector<1x8x32xbf16>
    %161 = vector.shape_cast %160 : vector<1x8x32xbf16> to vector<8x32xbf16>
    %cst_105 = arith.constant dense<0.000000e+00> : vector<8x32xf32>
    %162 = tpu.matmul %159, %161, %cst_105 {dimension_numbers = #tpu.dot_dimension_numbers<[1], [0], [0], [1], [0, 0, 1, 1], [], []>} : vector<8x8xbf16>, vector<8x32xbf16>, vector<8x32xf32> -> vector<8x32xf32>
    %163 = arith.addf %156, %162 : vector<8x32xf32>
    %164 = vector.extract_strided_slice %148 {offsets = [2, 0, 0], sizes = [1, 8, 8], strides = [1, 1, 1]} : vector<4x8x8xf32> to vector<1x8x8xf32>
    %165 = vector.shape_cast %164 : vector<1x8x8xf32> to vector<8x8xf32>
    %166 = arith.truncf %165 : vector<8x8xf32> to vector<8x8xbf16>
    %c2_106 = arith.constant 2 : index
    %c0_107 = arith.constant 0 : index
    %c0_108 = arith.constant 0 : index
    %167 = vector.load %arg10[%c2_106, %c0_107, %c0_108] : memref<4x8x32xbf16, #tpu.memory_space<vmem>>, vector<1x8x32xbf16>
    %168 = vector.shape_cast %167 : vector<1x8x32xbf16> to vector<8x32xbf16>
    %cst_109 = arith.constant dense<0.000000e+00> : vector<8x32xf32>
    %169 = tpu.matmul %166, %168, %cst_109 {dimension_numbers = #tpu.dot_dimension_numbers<[1], [0], [0], [1], [0, 0, 1, 1], [], []>} : vector<8x8xbf16>, vector<8x32xbf16>, vector<8x32xf32> -> vector<8x32xf32>
    %170 = arith.addf %163, %169 : vector<8x32xf32>
    %171 = vector.extract_strided_slice %148 {offsets = [3, 0, 0], sizes = [1, 8, 8], strides = [1, 1, 1]} : vector<4x8x8xf32> to vector<1x8x8xf32>
    %172 = vector.shape_cast %171 : vector<1x8x8xf32> to vector<8x8xf32>
    %173 = arith.truncf %172 : vector<8x8xf32> to vector<8x8xbf16>
    %c3_110 = arith.constant 3 : index
    %c0_111 = arith.constant 0 : index
    %c0_112 = arith.constant 0 : index
    %174 = vector.load %arg10[%c3_110, %c0_111, %c0_112] : memref<4x8x32xbf16, #tpu.memory_space<vmem>>, vector<1x8x32xbf16>
    %175 = vector.shape_cast %174 : vector<1x8x32xbf16> to vector<8x32xbf16>
    %cst_113 = arith.constant dense<0.000000e+00> : vector<8x32xf32>
    %176 = tpu.matmul %173, %175, %cst_113 {dimension_numbers = #tpu.dot_dimension_numbers<[1], [0], [0], [1], [0, 0, 1, 1], [], []>} : vector<8x8xbf16>, vector<8x32xbf16>, vector<8x32xf32> -> vector<8x32xf32>
    %177 = arith.addf %170, %176 : vector<8x32xf32>
    %c0_114 = arith.constant 0 : index
    %c0_115 = arith.constant 0 : index
    %178 = vector.load %arg11[%c0_114, %c0_115] : memref<1x32xf32, #tpu.memory_space<vmem>>, vector<1x32xf32>
    %179 = vector.broadcast %178 : vector<1x32xf32> to vector<8x32xf32>
    %180 = arith.addf %177, %179 : vector<8x32xf32>
    %181 = arith.addf %1, %180 : vector<8x32xf32>
    %c0_116 = arith.constant 0 : index
    %c0_117 = arith.constant 0 : index
    %182 = vector.load %arg12[%c0_116, %c0_117] : memref<1x32xf32, #tpu.memory_space<vmem>>, vector<1x32xf32>
    %c0_118 = arith.constant 0 : index
    %c0_119 = arith.constant 0 : index
    %183 = vector.load %arg13[%c0_118, %c0_119] : memref<1x32xf32, #tpu.memory_space<vmem>>, vector<1x32xf32>
    %cst_120 = arith.constant dense<0.000000e+00> : vector<8xf32>
    %184 = vector.multi_reduction <add>, %181, %cst_120 [1] : vector<8x32xf32> to vector<8xf32>
    %185 = vector.shape_cast %184 : vector<8xf32> to vector<8x1xf32>
    %cst_121 = arith.constant 3.200000e+01 : f32
    %186 = vector.broadcast %cst_121 : f32 to vector<8x1xf32>
    %187 = arith.divf %185, %186 : vector<8x1xf32>
    %188 = vector.broadcast %187 : vector<8x1xf32> to vector<8x32xf32>
    %189 = arith.subf %181, %188 : vector<8x32xf32>
    %190 = arith.mulf %189, %189 : vector<8x32xf32>
    %cst_122 = arith.constant dense<0.000000e+00> : vector<8xf32>
    %191 = vector.multi_reduction <add>, %190, %cst_122 [1] : vector<8x32xf32> to vector<8xf32>
    %192 = vector.shape_cast %191 : vector<8xf32> to vector<8x1xf32>
    %cst_123 = arith.constant 3.200000e+01 : f32
    %193 = vector.broadcast %cst_123 : f32 to vector<8x1xf32>
    %194 = arith.divf %192, %193 : vector<8x1xf32>
    %cst_124 = arith.constant 9.99999974E-6 : f32
    %195 = vector.broadcast %cst_124 : f32 to vector<8x1xf32>
    %196 = arith.addf %194, %195 : vector<8x1xf32>
    %197 = math.rsqrt %196 : vector<8x1xf32>
    %198 = vector.broadcast %197 : vector<8x1xf32> to vector<8x32xf32>
    %199 = arith.mulf %189, %198 : vector<8x32xf32>
    %200 = vector.broadcast %182 : vector<1x32xf32> to vector<8x32xf32>
    %201 = arith.mulf %199, %200 : vector<8x32xf32>
    %202 = vector.broadcast %183 : vector<1x32xf32> to vector<8x32xf32>
    %203 = arith.addf %201, %202 : vector<8x32xf32>
    %204 = arith.truncf %203 : vector<8x32xf32> to vector<8x32xbf16>
    %c0_125 = arith.constant 0 : index
    %c0_126 = arith.constant 0 : index
    %205 = vector.load %arg14[%c0_125, %c0_126] : memref<32x128xbf16, #tpu.memory_space<vmem>>, vector<32x128xbf16>
    %cst_127 = arith.constant dense<0.000000e+00> : vector<8x128xf32>
    %206 = tpu.matmul %204, %205, %cst_127 {dimension_numbers = #tpu.dot_dimension_numbers<[1], [0], [0], [1], [0, 0, 1, 1], [], []>} : vector<8x32xbf16>, vector<32x128xbf16>, vector<8x128xf32> -> vector<8x128xf32>
    %c0_128 = arith.constant 0 : index
    %c0_129 = arith.constant 0 : index
    %207 = vector.load %arg15[%c0_128, %c0_129] : memref<1x128xf32, #tpu.memory_space<vmem>>, vector<1x128xf32>
    %208 = vector.broadcast %207 : vector<1x128xf32> to vector<8x128xf32>
    %209 = arith.addf %206, %208 : vector<8x128xf32>
    %cst_130 = arith.constant 5.000000e-01 : f32
    %210 = vector.broadcast %cst_130 : f32 to vector<8x128xf32>
    %211 = arith.mulf %210, %209 : vector<8x128xf32>
    %cst_131 = arith.constant 4.471500e-02 : f32
    %212 = vector.broadcast %cst_131 : f32 to vector<8x128xf32>
    %213 = arith.mulf %212, %209 : vector<8x128xf32>
    %214 = arith.mulf %213, %209 : vector<8x128xf32>
    %215 = arith.mulf %214, %209 : vector<8x128xf32>
    %216 = arith.addf %209, %215 : vector<8x128xf32>
    %cst_132 = arith.constant 0.797884583 : f32
    %217 = vector.broadcast %cst_132 : f32 to vector<8x128xf32>
    %218 = arith.mulf %217, %216 : vector<8x128xf32>
    %219 = math.tanh %218 : vector<8x128xf32>
    %cst_133 = arith.constant 1.000000e+00 : f32
    %220 = vector.broadcast %cst_133 : f32 to vector<8x128xf32>
    %221 = arith.addf %220, %219 : vector<8x128xf32>
    %222 = arith.mulf %211, %221 : vector<8x128xf32>
    %223 = arith.truncf %222 : vector<8x128xf32> to vector<8x128xbf16>
    %c0_134 = arith.constant 0 : index
    %c0_135 = arith.constant 0 : index
    %224 = vector.load %arg16[%c0_134, %c0_135] : memref<128x32xbf16, #tpu.memory_space<vmem>>, vector<128x32xbf16>
    %cst_136 = arith.constant dense<0.000000e+00> : vector<8x32xf32>
    %225 = tpu.matmul %223, %224, %cst_136 {dimension_numbers = #tpu.dot_dimension_numbers<[1], [0], [0], [1], [0, 0, 1, 1], [], []>} : vector<8x128xbf16>, vector<128x32xbf16>, vector<8x32xf32> -> vector<8x32xf32>
    %c0_137 = arith.constant 0 : index
    %c0_138 = arith.constant 0 : index
    %226 = vector.load %arg17[%c0_137, %c0_138] : memref<1x32xf32, #tpu.memory_space<vmem>>, vector<1x32xf32>
    %227 = vector.broadcast %226 : vector<1x32xf32> to vector<8x32xf32>
    %228 = arith.addf %225, %227 : vector<8x32xf32>
    %229 = arith.addf %181, %228 : vector<8x32xf32>
    %230 = vector.shape_cast %229 : vector<8x32xf32> to vector<1x8x32xf32>
    %c0_139 = arith.constant 0 : index
    %c0_140 = arith.constant 0 : index
    %c0_141 = arith.constant 0 : index
    %231 = vector.load %arg18[%c0_139, %c0_140, %c0_141] : memref<1x8x32xf32, #tpu.memory_space<vmem>>, vector<1x8x32xf32>
    tpu.vector_store %arg18[%c0_139, %c0_140, %c0_141], %230 {strides = array<i32>} : memref<1x8x32xf32, #tpu.memory_space<vmem>>, vector<1x8x32xf32>,
    return
  }
  func.func @transform_0(%arg0: i32) -> (i32, i32, i32) {
    %c0_i32 = arith.constant 0 : i32
    %c0_i32_0 = arith.constant 0 : i32
    %c0_i32_1 = arith.constant 0 : i32
    return %arg0, %c0_i32, %c0_i32_0 : i32, i32, i32
  }
  func.func @transform_1(%arg0: i32) -> (i32, i32) {
    %c0_i32 = arith.constant 0 : i32
    %c0_i32_0 = arith.constant 0 : i32
    %c0_i32_1 = arith.constant 0 : i32
    return %c0_i32, %c0_i32_0 : i32, i32
  }
  func.func @transform_2(%arg0: i32) -> (i32, i32) {
    %c0_i32 = arith.constant 0 : i32
    %c0_i32_0 = arith.constant 0 : i32
    %c0_i32_1 = arith.constant 0 : i32
    return %c0_i32, %c0_i32_0 : i32, i32
  }
  func.func @transform_3(%arg0: i32) -> (i32, i32, i32) {
    %c0_i32 = arith.constant 0 : i32
    %c0_i32_0 = arith.constant 0 : i32
    %c0_i32_1 = arith.constant 0 : i32
    %c0_i32_2 = arith.constant 0 : i32
    return %c0_i32, %c0_i32_0, %c0_i32_1 : i32, i32, i32
  }
  func.func @transform_4(%arg0: i32) -> (i32, i32, i32) {
    %c0_i32 = arith.constant 0 : i32
    %c0_i32_0 = arith.constant 0 : i32
    %c0_i32_1 = arith.constant 0 : i32
    %c0_i32_2 = arith.constant 0 : i32
    return %c0_i32, %c0_i32_0, %c0_i32_1 : i32, i32, i32
  }
  func.func @transform_5(%arg0: i32) -> (i32, i32, i32) {
    %c0_i32 = arith.constant 0 : i32
    %c0_i32_0 = arith.constant 0 : i32
    %c0_i32_1 = arith.constant 0 : i32
    %c0_i32_2 = arith.constant 0 : i32
    return %c0_i32, %c0_i32_0, %c0_i32_1 : i32, i32, i32
  }
  func.func @transform_6(%arg0: i32) -> (i32, i32, i32) {
    %c0_i32 = arith.constant 0 : i32
    %c0_i32_0 = arith.constant 0 : i32
    %c0_i32_1 = arith.constant 0 : i32
    %c0_i32_2 = arith.constant 0 : i32
    return %c0_i32, %c0_i32_0, %c0_i32_1 : i32, i32, i32
  }
  func.func @transform_7(%arg0: i32) -> (i32, i32, i32) {
    %c0_i32 = arith.constant 0 : i32
    %c0_i32_0 = arith.constant 0 : i32
    %c0_i32_1 = arith.constant 0 : i32
    %c0_i32_2 = arith.constant 0 : i32
    return %c0_i32, %c0_i32_0, %c0_i32_1 : i32, i32, i32
  }
  func.func @transform_8(%arg0: i32) -> (i32, i32, i32) {
    %c0_i32 = arith.constant 0 : i32
    %c0_i32_0 = arith.constant 0 : i32
    %c0_i32_1 = arith.constant 0 : i32
    %c0_i32_2 = arith.constant 0 : i32
    return %c0_i32, %c0_i32_0, %c0_i32_1 : i32, i32, i32
  }
  func.func @transform_9(%arg0: i32) -> (i32, i32, i32) {
    %c0_i32 = arith.constant 0 : i32
    %c0_i32_0 = arith.constant 0 : i32
    %c0_i32_1 = arith.constant 0 : i32
    %c0_i32_2 = arith.constant 0 : i32
    return %c0_i32, %c0_i32_0, %c0_i32_1 : i32, i32, i32
  }
  func.func @transform_10(%arg0: i32) -> (i32, i32) {
    %c0_i32 = arith.constant 0 : i32
    %c0_i32_0 = arith.constant 0 : i32
    %c0_i32_1 = arith.constant 0 : i32
    return %c0_i32, %c0_i32_0 : i32, i32
  }
  func.func @transform_11(%arg0: i32) -> (i32, i32) {
    %c0_i32 = arith.constant 0 : i32
    %c0_i32_0 = arith.constant 0 : i32
    %c0_i32_1 = arith.constant 0 : i32
    return %c0_i32, %c0_i32_0 : i32, i32
  }
  func.func @transform_12(%arg0: i32) -> (i32, i32) {
    %c0_i32 = arith.constant 0 : i32
    %c0_i32_0 = arith.constant 0 : i32
    %c0_i32_1 = arith.constant 0 : i32
    return %c0_i32, %c0_i32_0 : i32, i32
  }
  func.func @transform_13(%arg0: i32) -> (i32, i32) {
    %c0_i32 = arith.constant 0 : i32
    %c0_i32_0 = arith.constant 0 : i32
    %c0_i32_1 = arith.constant 0 : i32
    return %c0_i32, %c0_i32_0 : i32, i32
  }
  func.func @transform_14(%arg0: i32) -> (i32, i32) {
    %c0_i32 = arith.constant 0 : i32
    %c0_i32_0 = arith.constant 0 : i32
    %c0_i32_1 = arith.constant 0 : i32
    return %c0_i32, %c0_i32_0 : i32, i32
  }
  func.func @transform_15(%arg0: i32) -> (i32, i32) {
    %c0_i32 = arith.constant 0 : i32
    %c0_i32_0 = arith.constant 0 : i32
    %c0_i32_1 = arith.constant 0 : i32
    return %c0_i32, %c0_i32_0 : i32, i32
  }
  func.func @transform_16(%arg0: i32) -> (i32, i32) {
    %c0_i32 = arith.constant 0 : i32
    %c0_i32_0 = arith.constant 0 : i32
    %c0_i32_1 = arith.constant 0 : i32
    return %c0_i32, %c0_i32_0 : i32, i32
  }
  func.func @transform_17(%arg0: i32) -> (i32, i32, i32) {
    %c0_i32 = arith.constant 0 : i32
    %c0_i32_0 = arith.constant 0 : i32
    %c0_i32_1 = arith.constant 0 : i32
    return %arg0, %c0_i32, %c0_i32_0 : i32, i32, i32
  }
}

module attributes {stable_mosaic.version = 11 : i64} {
  func.func @_block_kernel(%arg0: i32, %arg1: memref<1x8x32xf32, #tpu.memory_space<vmem>>, %arg2: memref<1x32xf32, #tpu.memory_space<vmem>>, %arg3: memref<1x32xf32, #tpu.memory_space<vmem>>, %arg4: memref<4x32x8xbf16, #tpu.memory_space<vmem>>, %arg5: memref<4x32x8xbf16, #tpu.memory_space<vmem>>, %arg6: memref<4x32x8xbf16, #tpu.memory_space<vmem>>, %arg7: memref<4x1x8xf32, #tpu.memory_space<vmem>>, %arg8: memref<4x1x8xf32, #tpu.memory_space<vmem>>, %arg9: memref<4x1x8xf32, #tpu.memory_space<vmem>>, %arg10: memref<4x8x32xbf16, #tpu.memory_space<vmem>>, %arg11: memref<1x32xf32, #tpu.memory_space<vmem>>, %arg12: memref<1x32xf32, #tpu.memory_space<vmem>>, %arg13: memref<1x32xf32, #tpu.memory_space<vmem>>, %arg14: memref<32x128xbf16, #tpu.memory_space<vmem>>, %arg15: memref<1x128xf32, #tpu.memory_space<vmem>>, %arg16: memref<128x32xbf16, #tpu.memory_space<vmem>>, %arg17: memref<1x32xf32, #tpu.memory_space<vmem>>, %arg18: memref<1x8x32xf32, #tpu.memory_space<vmem>>) attributes {dimension_semantics = [#tpu.dimension_semantics<parallel>], iteration_bounds = array<i64: 2>, scalar_prefetch = 0 : i64, scratch_operands = 0 : i64, tpu.core_type = #tpu.core_type<tc>, window_params = [{transform_indices = @transform_0, window_bounds = array<i64: 1, 8, 32>}, {pipeline_mode = #tpu.pipeline_mode<synchronous>, transform_indices = @transform_1, window_bounds = array<i64: 1, 32>}, {pipeline_mode = #tpu.pipeline_mode<synchronous>, transform_indices = @transform_2, window_bounds = array<i64: 1, 32>}, {pipeline_mode = #tpu.pipeline_mode<synchronous>, transform_indices = @transform_3, window_bounds = array<i64: 4, 32, 8>}, {pipeline_mode = #tpu.pipeline_mode<synchronous>, transform_indices = @transform_4, window_bounds = array<i64: 4, 32, 8>}, {pipeline_mode = #tpu.pipeline_mode<synchronous>, transform_indices = @transform_5, window_bounds = array<i64: 4, 32, 8>}, {pipeline_mode = #tpu.pipeline_mode<synchronous>, transform_indices = @transform_6, window_bounds = array<i64: 4, 1, 8>}, {pipeline_mode = #tpu.pipeline_mode<synchronous>, transform_indices = @transform_7, window_bounds = array<i64: 4, 1, 8>}, {pipeline_mode = #tpu.pipeline_mode<synchronous>, transform_indices = @transform_8, window_bounds = array<i64: 4, 1, 8>}, {pipeline_mode = #tpu.pipeline_mode<synchronous>, transform_indices = @transform_9, window_bounds = array<i64: 4, 8, 32>}, {pipeline_mode = #tpu.pipeline_mode<synchronous>, transform_indices = @transform_10, window_bounds = array<i64: 1, 32>}, {pipeline_mode = #tpu.pipeline_mode<synchronous>, transform_indices = @transform_11, window_bounds = array<i64: 1, 32>}, {pipeline_mode = #tpu.pipeline_mode<synchronous>, transform_indices = @transform_12, window_bounds = array<i64: 1, 32>}, {pipeline_mode = #tpu.pipeline_mode<synchronous>, transform_indices = @transform_13, window_bounds = array<i64: 32, 128>}, {pipeline_mode = #tpu.pipeline_mode<synchronous>, transform_indices = @transform_14, window_bounds = array<i64: 1, 128>}, {pipeline_mode = #tpu.pipeline_mode<synchronous>, transform_indices = @transform_15, window_bounds = array<i64: 128, 32>}, {pipeline_mode = #tpu.pipeline_mode<synchronous>, transform_indices = @transform_16, window_bounds = array<i64: 1, 32>}, {transform_indices = @transform_17, window_bounds = array<i64: 1, 8, 32>}]} {
    %c0 = arith.constant 0 : index
    %c0_0 = arith.constant 0 : index
    %c0_1 = arith.constant 0 : index
    %0 = vector.load %arg1[%c0, %c0_0, %c0_1] : memref<1x8x32xf32, #tpu.memory_space<vmem>>, vector<1x8x32xf32>
    %1 = vector.shape_cast %0 : vector<1x8x32xf32> to vector<8x32xf32>
    %c0_2 = arith.constant 0 : index
    %c0_3 = arith.constant 0 : index
    %2 = vector.load %arg2[%c0_2, %c0_3] : memref<1x32xf32, #tpu.memory_space<vmem>>, vector<1x32xf32>
    %c0_4 = arith.constant 0 : index
    %c0_5 = arith.constant 0 : index
    %3 = vector.load %arg3[%c0_4, %c0_5] : memref<1x32xf32, #tpu.memory_space<vmem>>, vector<1x32xf32>
    %cst = arith.constant dense<0.000000e+00> : vector<8xf32>
    %4 = vector.multi_reduction <add>, %1, %cst [1] : vector<8x32xf32> to vector<8xf32>
    %5 = vector.shape_cast %4 : vector<8xf32> to vector<8x1xf32>
    %cst_6 = arith.constant 3.200000e+01 : f32
    %6 = vector.broadcast %cst_6 : f32 to vector<8x1xf32>
    %7 = arith.divf %5, %6 : vector<8x1xf32>
    %8 = vector.broadcast %7 : vector<8x1xf32> to vector<8x32xf32>
    %9 = arith.subf %1, %8 : vector<8x32xf32>
    %10 = arith.mulf %9, %9 : vector<8x32xf32>
    %cst_7 = arith.constant dense<0.000000e+00> : vector<8xf32>
    %11 = vector.multi_reduction <add>, %10, %cst_7 [1] : vector<8x32xf32> to vector<8xf32>
    %12 = vector.shape_cast %11 : vector<8xf32> to vector<8x1xf32>
    %cst_8 = arith.constant 3.200000e+01 : f32
    %13 = vector.broadcast %cst_8 : f32 to vector<8x1xf32>
    %14 = arith.divf %12, %13 : vector<8x1xf32>
    %cst_9 = arith.constant 9.99999974E-6 : f32
    %15 = vector.broadcast %cst_9 : f32 to vector<8x1xf32>
    %16 = arith.addf %14, %15 : vector<8x1xf32>
    %17 = math.rsqrt %16 : vector<8x1xf32>
    %18 = vector.broadcast %17 : vector<8x1xf32> to vector<8x32xf32>
    %19 = arith.mulf %9, %18 : vector<8x32xf32>
    %20 = vector.broadcast %2 : vector<1x32xf32> to vector<8x32xf32>
    %21 = arith.mulf %19, %20 : vector<8x32xf32>
    %22 = vector.broadcast %3 : vector<1x32xf32> to vector<8x32xf32>
    %23 = arith.addf %21, %22 : vector<8x32xf32>
    %24 = arith.truncf %23 : vector<8x32xf32> to vector<8x32xbf16>
    %c0_10 = arith.constant 0 : index
    %c0_11 = arith.constant 0 : index
    %c0_12 = arith.constant 0 : index
    %25 = vector.load %arg4[%c0_10, %c0_11, %c0_12] : memref<4x32x8xbf16, #tpu.memory_space<vmem>>, vector<1x32x8xbf16>
    %26 = vector.shape_cast %25 : vector<1x32x8xbf16> to vector<32x8xbf16>
    %cst_13 = arith.constant dense<0.000000e+00> : vector<8x8xf32>
    %27 = tpu.matmul %24, %26, %cst_13 {dimension_numbers = #tpu.dot_dimension_numbers<[1], [0], [0], [1], [0, 0, 1, 1], [], []>} : vector<8x32xbf16>, vector<32x8xbf16>, vector<8x8xf32> -> vector<8x8xf32>
    %c0_14 = arith.constant 0 : index
    %c0_15 = arith.constant 0 : index
    %c0_16 = arith.constant 0 : index
    %28 = vector.load %arg7[%c0_14, %c0_15, %c0_16] : memref<4x1x8xf32, #tpu.memory_space<vmem>>, vector<1x1x8xf32>
    %29 = vector.shape_cast %28 : vector<1x1x8xf32> to vector<1x8xf32>
    %30 = vector.broadcast %29 : vector<1x8xf32> to vector<8x8xf32>
    %31 = arith.addf %27, %30 : vector<8x8xf32>
    %c0_17 = arith.constant 0 : index
    %c0_18 = arith.constant 0 : index
    %c0_19 = arith.constant 0 : index
    %32 = vector.load %arg5[%c0_17, %c0_18, %c0_19] : memref<4x32x8xbf16, #tpu.memory_space<vmem>>, vector<1x32x8xbf16>
    %33 = vector.shape_cast %32 : vector<1x32x8xbf16> to vector<32x8xbf16>
    %cst_20 = arith.constant dense<0.000000e+00> : vector<8x8xf32>
    %34 = tpu.matmul %24, %33, %cst_20 {dimension_numbers = #tpu.dot_dimension_numbers<[1], [0], [0], [1], [0, 0, 1, 1], [], []>} : vector<8x32xbf16>, vector<32x8xbf16>, vector<8x8xf32> -> vector<8x8xf32>
    %c0_21 = arith.constant 0 : index
    %c0_22 = arith.constant 0 : index
    %c0_23 = arith.constant 0 : index
    %35 = vector.load %arg8[%c0_21, %c0_22, %c0_23] : memref<4x1x8xf32, #tpu.memory_space<vmem>>, vector<1x1x8xf32>
    %36 = vector.shape_cast %35 : vector<1x1x8xf32> to vector<1x8xf32>
    %37 = vector.broadcast %36 : vector<1x8xf32> to vector<8x8xf32>
    %38 = arith.addf %34, %37 : vector<8x8xf32>
    %c0_24 = arith.constant 0 : index
    %c0_25 = arith.constant 0 : index
    %c0_26 = arith.constant 0 : index
    %39 = vector.load %arg6[%c0_24, %c0_25, %c0_26] : memref<4x32x8xbf16, #tpu.memory_space<vmem>>, vector<1x32x8xbf16>
    %40 = vector.shape_cast %39 : vector<1x32x8xbf16> to vector<32x8xbf16>
    %cst_27 = arith.constant dense<0.000000e+00> : vector<8x8xf32>
    %41 = tpu.matmul %24, %40, %cst_27 {dimension_numbers = #tpu.dot_dimension_numbers<[1], [0], [0], [1], [0, 0, 1, 1], [], []>} : vector<8x32xbf16>, vector<32x8xbf16>, vector<8x8xf32> -> vector<8x8xf32>
    %c0_28 = arith.constant 0 : index
    %c0_29 = arith.constant 0 : index
    %c0_30 = arith.constant 0 : index
    %42 = vector.load %arg9[%c0_28, %c0_29, %c0_30] : memref<4x1x8xf32, #tpu.memory_space<vmem>>, vector<1x1x8xf32>
    %43 = vector.shape_cast %42 : vector<1x1x8xf32> to vector<1x8xf32>
    %44 = vector.broadcast %43 : vector<1x8xf32> to vector<8x8xf32>
    %45 = arith.addf %41, %44 : vector<8x8xf32>
    %c1 = arith.constant 1 : index
    %c0_31 = arith.constant 0 : index
    %c0_32 = arith.constant 0 : index
    %46 = vector.load %arg4[%c1, %c0_31, %c0_32] : memref<4x32x8xbf16, #tpu.memory_space<vmem>>, vector<1x32x8xbf16>
    %47 = vector.shape_cast %46 : vector<1x32x8xbf16> to vector<32x8xbf16>
    %cst_33 = arith.constant dense<0.000000e+00> : vector<8x8xf32>
    %48 = tpu.matmul %24, %47, %cst_33 {dimension_numbers = #tpu.dot_dimension_numbers<[1], [0], [0], [1], [0, 0, 1, 1], [], []>} : vector<8x32xbf16>, vector<32x8xbf16>, vector<8x8xf32> -> vector<8x8xf32>
    %c1_34 = arith.constant 1 : index
    %c0_35 = arith.constant 0 : index
    %c0_36 = arith.constant 0 : index
    %49 = vector.load %arg7[%c1_34, %c0_35, %c0_36] : memref<4x1x8xf32, #tpu.memory_space<vmem>>, vector<1x1x8xf32>
    %50 = vector.shape_cast %49 : vector<1x1x8xf32> to vector<1x8xf32>
    %51 = vector.broadcast %50 : vector<1x8xf32> to vector<8x8xf32>
    %52 = arith.addf %48, %51 : vector<8x8xf32>
    %c1_37 = arith.constant 1 : index
    %c0_38 = arith.constant 0 : index
    %c0_39 = arith.constant 0 : index
    %53 = vector.load %arg5[%c1_37, %c0_38, %c0_39] : memref<4x32x8xbf16, #tpu.memory_space<vmem>>, vector<1x32x8xbf16>
    %54 = vector.shape_cast %53 : vector<1x32x8xbf16> to vector<32x8xbf16>
    %cst_40 = arith.constant dense<0.000000e+00> : vector<8x8xf32>
    %55 = tpu.matmul %24, %54, %cst_40 {dimension_numbers = #tpu.dot_dimension_numbers<[1], [0], [0], [1], [0, 0, 1, 1], [], []>} : vector<8x32xbf16>, vector<32x8xbf16>, vector<8x8xf32> -> vector<8x8xf32>
    %c1_41 = arith.constant 1 : index
    %c0_42 = arith.constant 0 : index
    %c0_43 = arith.constant 0 : index
    %56 = vector.load %arg8[%c1_41, %c0_42, %c0_43] : memref<4x1x8xf32, #tpu.memory_space<vmem>>, vector<1x1x8xf32>
    %57 = vector.shape_cast %56 : vector<1x1x8xf32> to vector<1x8xf32>
    %58 = vector.broadcast %57 : vector<1x8xf32> to vector<8x8xf32>
    %59 = arith.addf %55, %58 : vector<8x8xf32>
    %c1_44 = arith.constant 1 : index
    %c0_45 = arith.constant 0 : index
    %c0_46 = arith.constant 0 : index
    %60 = vector.load %arg6[%c1_44, %c0_45, %c0_46] : memref<4x32x8xbf16, #tpu.memory_space<vmem>>, vector<1x32x8xbf16>
    %61 = vector.shape_cast %60 : vector<1x32x8xbf16> to vector<32x8xbf16>
    %cst_47 = arith.constant dense<0.000000e+00> : vector<8x8xf32>
    %62 = tpu.matmul %24, %61, %cst_47 {dimension_numbers = #tpu.dot_dimension_numbers<[1], [0], [0], [1], [0, 0, 1, 1], [], []>} : vector<8x32xbf16>, vector<32x8xbf16>, vector<8x8xf32> -> vector<8x8xf32>
    %c1_48 = arith.constant 1 : index
    %c0_49 = arith.constant 0 : index
    %c0_50 = arith.constant 0 : index
    %63 = vector.load %arg9[%c1_48, %c0_49, %c0_50] : memref<4x1x8xf32, #tpu.memory_space<vmem>>, vector<1x1x8xf32>
    %64 = vector.shape_cast %63 : vector<1x1x8xf32> to vector<1x8xf32>
    %65 = vector.broadcast %64 : vector<1x8xf32> to vector<8x8xf32>
    %66 = arith.addf %62, %65 : vector<8x8xf32>
    %c2 = arith.constant 2 : index
    %c0_51 = arith.constant 0 : index
    %c0_52 = arith.constant 0 : index
    %67 = vector.load %arg4[%c2, %c0_51, %c0_52] : memref<4x32x8xbf16, #tpu.memory_space<vmem>>, vector<1x32x8xbf16>
    %68 = vector.shape_cast %67 : vector<1x32x8xbf16> to vector<32x8xbf16>
    %cst_53 = arith.constant dense<0.000000e+00> : vector<8x8xf32>
    %69 = tpu.matmul %24, %68, %cst_53 {dimension_numbers = #tpu.dot_dimension_numbers<[1], [0], [0], [1], [0, 0, 1, 1], [], []>} : vector<8x32xbf16>, vector<32x8xbf16>, vector<8x8xf32> -> vector<8x8xf32>
    %c2_54 = arith.constant 2 : index
    %c0_55 = arith.constant 0 : index
    %c0_56 = arith.constant 0 : index
    %70 = vector.load %arg7[%c2_54, %c0_55, %c0_56] : memref<4x1x8xf32, #tpu.memory_space<vmem>>, vector<1x1x8xf32>
    %71 = vector.shape_cast %70 : vector<1x1x8xf32> to vector<1x8xf32>
    %72 = vector.broadcast %71 : vector<1x8xf32> to vector<8x8xf32>
    %73 = arith.addf %69, %72 : vector<8x8xf32>
    %c2_57 = arith.constant 2 : index
    %c0_58 = arith.constant 0 : index
    %c0_59 = arith.constant 0 : index
    %74 = vector.load %arg5[%c2_57, %c0_58, %c0_59] : memref<4x32x8xbf16, #tpu.memory_space<vmem>>, vector<1x32x8xbf16>
    %75 = vector.shape_cast %74 : vector<1x32x8xbf16> to vector<32x8xbf16>
    %cst_60 = arith.constant dense<0.000000e+00> : vector<8x8xf32>
    %76 = tpu.matmul %24, %75, %cst_60 {dimension_numbers = #tpu.dot_dimension_numbers<[1], [0], [0], [1], [0, 0, 1, 1], [], []>} : vector<8x32xbf16>, vector<32x8xbf16>, vector<8x8xf32> -> vector<8x8xf32>
    %c2_61 = arith.constant 2 : index
    %c0_62 = arith.constant 0 : index
    %c0_63 = arith.constant 0 : index
    %77 = vector.load %arg8[%c2_61, %c0_62, %c0_63] : memref<4x1x8xf32, #tpu.memory_space<vmem>>, vector<1x1x8xf32>
    %78 = vector.shape_cast %77 : vector<1x1x8xf32> to vector<1x8xf32>
    %79 = vector.broadcast %78 : vector<1x8xf32> to vector<8x8xf32>
    %80 = arith.addf %76, %79 : vector<8x8xf32>
    %c2_64 = arith.constant 2 : index
    %c0_65 = arith.constant 0 : index
    %c0_66 = arith.constant 0 : index
    %81 = vector.load %arg6[%c2_64, %c0_65, %c0_66] : memref<4x32x8xbf16, #tpu.memory_space<vmem>>, vector<1x32x8xbf16>
    %82 = vector.shape_cast %81 : vector<1x32x8xbf16> to vector<32x8xbf16>
    %cst_67 = arith.constant dense<0.000000e+00> : vector<8x8xf32>
    %83 = tpu.matmul %24, %82, %cst_67 {dimension_numbers = #tpu.dot_dimension_numbers<[1], [0], [0], [1], [0, 0, 1, 1], [], []>} : vector<8x32xbf16>, vector<32x8xbf16>, vector<8x8xf32> -> vector<8x8xf32>
    %c2_68 = arith.constant 2 : index
    %c0_69 = arith.constant 0 : index
    %c0_70 = arith.constant 0 : index
    %84 = vector.load %arg9[%c2_68, %c0_69, %c0_70] : memref<4x1x8xf32, #tpu.memory_space<vmem>>, vector<1x1x8xf32>
    %85 = vector.shape_cast %84 : vector<1x1x8xf32> to vector<1x8xf32>
    %86 = vector.broadcast %85 : vector<1x8xf32> to vector<8x8xf32>
    %87 = arith.addf %83, %86 : vector<8x8xf32>
    %c3 = arith.constant 3 : index
    %c0_71 = arith.constant 0 : index
    %c0_72 = arith.constant 0 : index
    %88 = vector.load %arg4[%c3, %c0_71, %c0_72] : memref<4x32x8xbf16, #tpu.memory_space<vmem>>, vector<1x32x8xbf16>
    %89 = vector.shape_cast %88 : vector<1x32x8xbf16> to vector<32x8xbf16>
    %cst_73 = arith.constant dense<0.000000e+00> : vector<8x8xf32>
    %90 = tpu.matmul %24, %89, %cst_73 {dimension_numbers = #tpu.dot_dimension_numbers<[1], [0], [0], [1], [0, 0, 1, 1], [], []>} : vector<8x32xbf16>, vector<32x8xbf16>, vector<8x8xf32> -> vector<8x8xf32>
    %c3_74 = arith.constant 3 : index
    %c0_75 = arith.constant 0 : index
    %c0_76 = arith.constant 0 : index
    %91 = vector.load %arg7[%c3_74, %c0_75, %c0_76] : memref<4x1x8xf32, #tpu.memory_space<vmem>>, vector<1x1x8xf32>
    %92 = vector.shape_cast %91 : vector<1x1x8xf32> to vector<1x8xf32>
    %93 = vector.broadcast %92 : vector<1x8xf32> to vector<8x8xf32>
    %94 = arith.addf %90, %93 : vector<8x8xf32>
    %c3_77 = arith.constant 3 : index
    %c0_78 = arith.constant 0 : index
    %c0_79 = arith.constant 0 : index
    %95 = vector.load %arg5[%c3_77, %c0_78, %c0_79] : memref<4x32x8xbf16, #tpu.memory_space<vmem>>, vector<1x32x8xbf16>
    %96 = vector.shape_cast %95 : vector<1x32x8xbf16> to vector<32x8xbf16>
    %cst_80 = arith.constant dense<0.000000e+00> : vector<8x8xf32>
    %97 = tpu.matmul %24, %96, %cst_80 {dimension_numbers = #tpu.dot_dimension_numbers<[1], [0], [0], [1], [0, 0, 1, 1], [], []>} : vector<8x32xbf16>, vector<32x8xbf16>, vector<8x8xf32> -> vector<8x8xf32>
    %c3_81 = arith.constant 3 : index
    %c0_82 = arith.constant 0 : index
    %c0_83 = arith.constant 0 : index
    %98 = vector.load %arg8[%c3_81, %c0_82, %c0_83] : memref<4x1x8xf32, #tpu.memory_space<vmem>>, vector<1x1x8xf32>
    %99 = vector.shape_cast %98 : vector<1x1x8xf32> to vector<1x8xf32>
    %100 = vector.broadcast %99 : vector<1x8xf32> to vector<8x8xf32>
    %101 = arith.addf %97, %100 : vector<8x8xf32>
    %c3_84 = arith.constant 3 : index
    %c0_85 = arith.constant 0 : index
    %c0_86 = arith.constant 0 : index
    %102 = vector.load %arg6[%c3_84, %c0_85, %c0_86] : memref<4x32x8xbf16, #tpu.memory_space<vmem>>, vector<1x32x8xbf16>
    %103 = vector.shape_cast %102 : vector<1x32x8xbf16> to vector<32x8xbf16>
    %cst_87 = arith.constant dense<0.000000e+00> : vector<8x8xf32>
    %104 = tpu.matmul %24, %103, %cst_87 {dimension_numbers = #tpu.dot_dimension_numbers<[1], [0], [0], [1], [0, 0, 1, 1], [], []>} : vector<8x32xbf16>, vector<32x8xbf16>, vector<8x8xf32> -> vector<8x8xf32>
    %c3_88 = arith.constant 3 : index
    %c0_89 = arith.constant 0 : index
    %c0_90 = arith.constant 0 : index
    %105 = vector.load %arg9[%c3_88, %c0_89, %c0_90] : memref<4x1x8xf32, #tpu.memory_space<vmem>>, vector<1x1x8xf32>
    %106 = vector.shape_cast %105 : vector<1x1x8xf32> to vector<1x8xf32>
    %107 = vector.broadcast %106 : vector<1x8xf32> to vector<8x8xf32>
    %108 = arith.addf %104, %107 : vector<8x8xf32>
    %109 = vector.shape_cast %31 : vector<8x8xf32> to vector<1x8x8xf32>
    %110 = vector.shape_cast %52 : vector<8x8xf32> to vector<1x8x8xf32>
    %111 = vector.shape_cast %73 : vector<8x8xf32> to vector<1x8x8xf32>
    %112 = vector.shape_cast %94 : vector<8x8xf32> to vector<1x8x8xf32>
    %113 = tpu.concatenate %109, %110, %111, %112 in 0 : vector<1x8x8xf32>, vector<1x8x8xf32>, vector<1x8x8xf32>, vector<1x8x8xf32> -> vector<4x8x8xf32>
    %114 = arith.truncf %113 : vector<4x8x8xf32> to vector<4x8x8xbf16>
    %115 = vector.shape_cast %38 : vector<8x8xf32> to vector<1x8x8xf32>
    %116 = vector.shape_cast %59 : vector<8x8xf32> to vector<1x8x8xf32>
    %117 = vector.shape_cast %80 : vector<8x8xf32> to vector<1x8x8xf32>
    %118 = vector.shape_cast %101 : vector<8x8xf32> to vector<1x8x8xf32>
    %119 = tpu.concatenate %115, %116, %117, %118 in 0 : vector<1x8x8xf32>, vector<1x8x8xf32>, vector<1x8x8xf32>, vector<1x8x8xf32> -> vector<4x8x8xf32>
    %120 = arith.truncf %119 : vector<4x8x8xf32> to vector<4x8x8xbf16>
    %121 = vector.shape_cast %45 : vector<8x8xf32> to vector<1x8x8xf32>
    %122 = vector.shape_cast %66 : vector<8x8xf32> to vector<1x8x8xf32>
    %123 = vector.shape_cast %87 : vector<8x8xf32> to vector<1x8x8xf32>
    %124 = vector.shape_cast %108 : vector<8x8xf32> to vector<1x8x8xf32>
    %125 = tpu.concatenate %121, %122, %123, %124 in 0 : vector<1x8x8xf32>, vector<1x8x8xf32>, vector<1x8x8xf32>, vector<1x8x8xf32> -> vector<4x8x8xf32>
    %126 = arith.truncf %125 : vector<4x8x8xf32> to vector<4x8x8xbf16>
    "tpu.trace_start"() <{level = 10 : i32, message = "bqd,bkd->bqk"}> : () -> ()
    %cst_91 = arith.constant dense<0.000000e+00> : vector<4x8x8xf32>
    %127 = tpu.matmul %114, %120, %cst_91 {dimension_numbers = #tpu.dot_dimension_numbers<[2], [2], [1], [1], [0, 0, 0, 1, 1, 1], [0], [0]>} : vector<4x8x8xbf16>, vector<4x8x8xbf16>, vector<4x8x8xf32> -> vector<4x8x8xf32>
    "tpu.trace_stop"() : () -> ()
    %128 = tpu.iota {dimensions = array<i32: 0>} : vector<8x8xi32>
    %129 = tpu.iota {dimensions = array<i32: 1>} : vector<8x8xi32>
    %130 = arith.cmpi sle, %129, %128 : vector<8x8xi32>
    %cst_92 = arith.constant 0.000000e+00 : f32
    %cst_93 = arith.constant -1.000000e+30 : f32
    %131 = vector.broadcast %cst_92 : f32 to vector<8x8xf32>
    %132 = vector.broadcast %cst_93 : f32 to vector<8x8xf32>
    %133 = arith.select %130, %131, %132 : vector<8x8xi1>, vector<8x8xf32>
    %134 = vector.shape_cast %133 : vector<8x8xf32> to vector<1x8x8xf32>
    %135 = vector.broadcast %134 : vector<1x8x8xf32> to vector<4x8x8xf32>
    %136 = arith.addf %127, %135 : vector<4x8x8xf32>
    %cst_94 = arith.constant dense<0xFF800000> : vector<4x8xf32>
    %137 = vector.multi_reduction <maximumf>, %136, %cst_94 [2] : vector<4x8x8xf32> to vector<4x8xf32>
    %138 = vector.shape_cast %137 : vector<4x8xf32> to vector<4x8x1xf32>
    %139 = vector.broadcast %138 : vector<4x8x1xf32> to vector<4x8x8xf32>
    %140 = arith.subf %136, %139 : vector<4x8x8xf32>
    %141 = math.exp %140 : vector<4x8x8xf32>
    %cst_95 = arith.constant dense<0.000000e+00> : vector<4x8xf32>
    %142 = vector.multi_reduction <add>, %141, %cst_95 [2] : vector<4x8x8xf32> to vector<4x8xf32>
    %143 = vector.shape_cast %142 : vector<4x8xf32> to vector<4x8x1xf32>
    %144 = tpu.reciprocal %143 {approx = true} : vector<4x8x1xf32> -> vector<4x8x1xf32>
    %145 = vector.broadcast %144 : vector<4x8x1xf32> to vector<4x8x8xf32>
    %146 = arith.mulf %141, %145 : vector<4x8x8xf32>
    %147 = arith.truncf %146 : vector<4x8x8xf32> to vector<4x8x8xbf16>
    "tpu.trace_start"() <{level = 10 : i32, message = "bqk,bkd->bqd"}> : () -> ()
    %cst_96 = arith.constant dense<0.000000e+00> : vector<4x8x8xf32>
    %148 = tpu.matmul %147, %126, %cst_96 {dimension_numbers = #tpu.dot_dimension_numbers<[2], [1], [1], [2], [0, 0, 0, 1, 1, 2], [0], [0]>} : vector<4x8x8xbf16>, vector<4x8x8xbf16>, vector<4x8x8xf32> -> vector<4x8x8xf32>
    %cst_97 = arith.constant 0.000000e+00 : f32
    "tpu.trace_stop"() : () -> ()
    %149 = vector.broadcast %cst_97 : f32 to vector<8x32xf32>
    %150 = vector.extract_strided_slice %148 {offsets = [0, 0, 0], sizes = [1, 8, 8], strides = [1, 1, 1]} : vector<4x8x8xf32> to vector<1x8x8xf32>
    %151 = vector.shape_cast %150 : vector<1x8x8xf32> to vector<8x8xf32>
    %152 = arith.truncf %151 : vector<8x8xf32> to vector<8x8xbf16>
    %c0_98 = arith.constant 0 : index
    %c0_99 = arith.constant 0 : index
    %c0_100 = arith.constant 0 : index
    %153 = vector.load %arg10[%c0_98, %c0_99, %c0_100] : memref<4x8x32xbf16, #tpu.memory_space<vmem>>, vector<1x8x32xbf16>
    %154 = vector.shape_cast %153 : vector<1x8x32xbf16> to vector<8x32xbf16>
    %cst_101 = arith.constant dense<0.000000e+00> : vector<8x32xf32>
    %155 = tpu.matmul %152, %154, %cst_101 {dimension_numbers = #tpu.dot_dimension_numbers<[1], [0], [0], [1], [0, 0, 1, 1], [], []>} : vector<8x8xbf16>, vector<8x32xbf16>, vector<8x32xf32> -> vector<8x32xf32>
    %156 = arith.addf %149, %155 : vector<8x32xf32>
    %157 = vector.extract_strided_slice %148 {offsets = [1, 0, 0], sizes = [1, 8, 8], strides = [1, 1, 1]} : vector<4x8x8xf32> to vector<1x8x8xf32>
    %158 = vector.shape_cast %157 : vector<1x8x8xf32> to vector<8x8xf32>
    %159 = arith.truncf %158 : vector<8x8xf32> to vector<8x8xbf16>
    %c1_102 = arith.constant 1 : index
    %c0_103 = arith.constant 0 : index
    %c0_104 = arith.constant 0 : index
    %160 = vector.load %arg10[%c1_102, %c0_103, %c0_104] : memref<4x8x32xbf16, #tpu.memory_space<vmem>>, vector<1x8x32xbf16>
    %161 = vector.shape_cast %160 : vector<1x8x32xbf16> to vector<8x32xbf16>
    %cst_105 = arith.constant dense<0.000000e+00> : vector<8x32xf32>
    %162 = tpu.matmul %159, %161, %cst_105 {dimension_numbers = #tpu.dot_dimension_numbers<[1], [0], [0], [1], [0, 0, 1, 1], [], []>} : vector<8x8xbf16>, vector<8x32xbf16>, vector<8x32xf32> -> vector<8x32xf32>
    %163 = arith.addf %156, %162 : vector<8x32xf32>
    %164 = vector.extract_strided_slice %148 {offsets = [2, 0, 0], sizes = [1, 8, 8], strides = [1, 1, 1]} : vector<4x8x8xf32> to vector<1x8x8xf32>
    %165 = vector.shape_cast %164 : vector<1x8x8xf32> to vector<8x8xf32>
    %166 = arith.truncf %165 : vector<8x8xf32> to vector<8x8xbf16>
    %c2_106 = arith.constant 2 : index
    %c0_107 = arith.constant 0 : index
    %c0_108 = arith.constant 0 : index
    %167 = vector.load %arg10[%c2_106, %c0_107, %c0_108] : memref<4x8x32xbf16, #tpu.memory_space<vmem>>, vector<1x8x32xbf16>
    %168 = vector.shape_cast %167 : vector<1x8x32xbf16> to vector<8x32xbf16>
    %cst_109 = arith.constant dense<0.000000e+00> : vector<8x32xf32>
    %169 = tpu.matmul %166, %168, %cst_109 {dimension_numbers = #tpu.dot_dimension_numbers<[1], [0], [0], [1], [0, 0, 1, 1], [], []>} : vector<8x8xbf16>, vector<8x32xbf16>, vector<8x32xf32> -> vector<8x32xf32>
    %170 = arith.addf %163, %169 : vector<8x32xf32>
    %171 = vector.extract_strided_slice %148 {offsets = [3, 0, 0], sizes = [1, 8, 8], strides = [1, 1, 1]} : vector<4x8x8xf32> to vector<1x8x8xf32>
    %172 = vector.shape_cast %171 : vector<1x8x8xf32> to vector<8x8xf32>
    %173 = arith.truncf %172 : vector<8x8xf32> to vector<8x8xbf16>
    %c3_110 = arith.constant 3 : index
    %c0_111 = arith.constant 0 : index
    %c0_112 = arith.constant 0 : index
    %174 = vector.load %arg10[%c3_110, %c0_111, %c0_112] : memref<4x8x32xbf16, #tpu.memory_space<vmem>>, vector<1x8x32xbf16>
    %175 = vector.shape_cast %174 : vector<1x8x32xbf16> to vector<8x32xbf16>
    %cst_113 = arith.constant dense<0.000000e+00> : vector<8x32xf32>
    %176 = tpu.matmul %173, %175, %cst_113 {dimension_numbers = #tpu.dot_dimension_numbers<[1], [0], [0], [1], [0, 0, 1, 1], [], []>} : vector<8x8xbf16>, vector<8x32xbf16>, vector<8x32xf32> -> vector<8x32xf32>
    %177 = arith.addf %170, %176 : vector<8x32xf32>
    %c0_114 = arith.constant 0 : index
    %c0_115 = arith.constant 0 : index
    %178 = vector.load %arg11[%c0_114, %c0_115] : memref<1x32xf32, #tpu.memory_space<vmem>>, vector<1x32xf32>
    %179 = vector.broadcast %178 : vector<1x32xf32> to vector<8x32xf32>
    %180 = arith.addf %177, %179 : vector<8x32xf32>
    %181 = arith.addf %1, %180 : vector<8x32xf32>
    %c0_116 = arith.constant 0 : index
    %c0_117 = arith.constant 0 : index
    %182 = vector.load %arg12[%c0_116, %c0_117] : memref<1x32xf32, #tpu.memory_space<vmem>>, vector<1x32xf32>
    %c0_118 = arith.constant 0 : index
    %c0_119 = arith.constant 0 : index
    %183 = vector.load %arg13[%c0_118, %c0_119] : memref<1x32xf32, #tpu.memory_space<vmem>>, vector<1x32xf32>
    %cst_120 = arith.constant dense<0.000000e+00> : vector<8xf32>
    %184 = vector.multi_reduction <add>, %181, %cst_120 [1] : vector<8x32xf32> to vector<8xf32>
    %185 = vector.shape_cast %184 : vector<8xf32> to vector<8x1xf32>
    %cst_121 = arith.constant 3.200000e+01 : f32
    %186 = vector.broadcast %cst_121 : f32 to vector<8x1xf32>
    %187 = arith.divf %185, %186 : vector<8x1xf32>
    %188 = vector.broadcast %187 : vector<8x1xf32> to vector<8x32xf32>
    %189 = arith.subf %181, %188 : vector<8x32xf32>
    %190 = arith.mulf %189, %189 : vector<8x32xf32>
    %cst_122 = arith.constant dense<0.000000e+00> : vector<8xf32>
    %191 = vector.multi_reduction <add>, %190, %cst_122 [1] : vector<8x32xf32> to vector<8xf32>
    %192 = vector.shape_cast %191 : vector<8xf32> to vector<8x1xf32>
    %cst_123 = arith.constant 3.200000e+01 : f32
    %193 = vector.broadcast %cst_123 : f32 to vector<8x1xf32>
    %194 = arith.divf %192, %193 : vector<8x1xf32>
    %cst_124 = arith.constant 9.99999974E-6 : f32
    %195 = vector.broadcast %cst_124 : f32 to vector<8x1xf32>
    %196 = arith.addf %194, %195 : vector<8x1xf32>
    %197 = math.rsqrt %196 : vector<8x1xf32>
    %198 = vector.broadcast %197 : vector<8x1xf32> to vector<8x32xf32>
    %199 = arith.mulf %189, %198 : vector<8x32xf32>
    %200 = vector.broadcast %182 : vector<1x32xf32> to vector<8x32xf32>
    %201 = arith.mulf %199, %200 : vector<8x32xf32>
    %202 = vector.broadcast %183 : vector<1x32xf32> to vector<8x32xf32>
    %203 = arith.addf %201, %202 : vector<8x32xf32>
    %204 = arith.truncf %203 : vector<8x32xf32> to vector<8x32xbf16>
    %c0_125 = arith.constant 0 : index
    %c0_126 = arith.constant 0 : index
    %205 = vector.load %arg14[%c0_125, %c0_126] : memref<32x128xbf16, #tpu.memory_space<vmem>>, vector<32x128xbf16>
    %cst_127 = arith.constant dense<0.000000e+00> : vector<8x128xf32>
    %206 = tpu.matmul %204, %205, %cst_127 {dimension_numbers = #tpu.dot_dimension_numbers<[1], [0], [0], [1], [0, 0, 1, 1], [], []>} : vector<8x32xbf16>, vector<32x128xbf16>, vector<8x128xf32> -> vector<8x128xf32>
    %c0_128 = arith.constant 0 : index
    %c0_129 = arith.constant 0 : index
    %207 = vector.load %arg15[%c0_128, %c0_129] : memref<1x128xf32, #tpu.memory_space<vmem>>, vector<1x128xf32>
    %208 = vector.broadcast %207 : vector<1x128xf32> to vector<8x128xf32>
    %209 = arith.addf %206, %208 : vector<8x128xf32>
    %cst_130 = arith.constant 5.000000e-01 : f32
    %210 = vector.broadcast %cst_130 : f32 to vector<8x128xf32>
    %211 = arith.mulf %210, %209 : vector<8x128xf32>
    %cst_131 = arith.constant 4.471500e-02 : f32
    %212 = vector.broadcast %cst_131 : f32 to vector<8x128xf32>
    %213 = arith.mulf %212, %209 : vector<8x128xf32>
    %214 = arith.mulf %213, %209 : vector<8x128xf32>
    %215 = arith.mulf %214, %209 : vector<8x128xf32>
    %216 = arith.addf %209, %215 : vector<8x128xf32>
    %cst_132 = arith.constant 0.797884583 : f32
    %217 = vector.broadcast %cst_132 : f32 to vector<8x128xf32>
    %218 = arith.mulf %217, %216 : vector<8x128xf32>
    %219 = math.tanh %218 : vector<8x128xf32>
    %cst_133 = arith.constant 1.000000e+00 : f32
    %220 = vector.broadcast %cst_133 : f32 to vector<8x128xf32>
    %221 = arith.addf %220, %219 : vector<8x128xf32>
    %222 = arith.mulf %211, %221 : vector<8x128xf32>
    %223 = arith.truncf %222 : vector<8x128xf32> to vector<8x128xbf16>
    %c0_134 = arith.constant 0 : index
    %c0_135 = arith.constant 0 : index
    %224 = vector.load %arg16[%c0_134, %c0_135] : memref<128x32xbf16, #tpu.memory_space<vmem>>, vector<128x32xbf16>
    %cst_136 = arith.constant dense<0.000000e+00> : vector<8x32xf32>
    %225 = tpu.matmul %223, %224, %cst_136 {dimension_numbers = #tpu.dot_dimension_numbers<[1], [0], [0], [1], [0, 0, 1, 1], [], []>} : vector<8x128xbf16>, vector<128x32xbf16>, vector<8x32xf32> -> vector<8x32xf32>
    %c0_137 = arith.constant 0 : index
    %c0_138 = arith.constant 0 : index
    %226 = vector.load %arg17[%c0_137, %c0_138] : memref<1x32xf32, #tpu.memory_space<vmem>>, vector<1x32xf32>
    %227 = vector.broadcast %226 : vector<1x32xf32> to vector<8x32xf32>
    %228 = arith.addf %225, %227 : vector<8x32xf32>
    %229 = arith.addf %181, %228 : vector<8x32xf32>
    %230 = vector.shape_cast %229 : vector<8x32xf32> to vector<1x8x32xf32>
    %c0_139 = arith.constant 0 : index
    %c0_140 = arith.constant 0 : index
    %c0_141 = arith.constant 0 : index
    %231 = vector.load %arg18[%c0_139, %c0_140, %c0_141] : memref<1x8x32xf32, #tpu.memory_space<vmem>>, vector<1x8x32xf32>
    tpu.vector_store %arg18[%c0_139, %c0_140, %c0_141], %230 {strides = array<i32>} : memref<1x8x32xf32, #tpu.memory_space<vmem>>, vector<1x8x32xf32>,
    return
  }
  func.func @transform_0(%arg0: i32) -> (i32, i32, i32) {
    %c0_i32 = arith.constant 0 : i32
    %c0_i32_0 = arith.constant 0 : i32
    %c0_i32_1 = arith.constant 0 : i32
    return %arg0, %c0_i32, %c0_i32_0 : i32, i32, i32
  }
  func.func @transform_1(%arg0: i32) -> (i32, i32) {
    %c0_i32 = arith.constant 0 : i32
    %c0_i32_0 = arith.constant 0 : i32
    %c0_i32_1 = arith.constant 0 : i32
    return %c0_i32, %c0_i32_0 : i32, i32
  }
  func.func @transform_2(%arg0: i32) -> (i32, i32) {
    %c0_i32 = arith.constant 0 : i32
    %c0_i32_0 = arith.constant 0 : i32
    %c0_i32_1 = arith.constant 0 : i32
    return %c0_i32, %c0_i32_0 : i32, i32
  }
  func.func @transform_3(%arg0: i32) -> (i32, i32, i32) {
    %c0_i32 = arith.constant 0 : i32
    %c0_i32_0 = arith.constant 0 : i32
    %c0_i32_1 = arith.constant 0 : i32
    %c0_i32_2 = arith.constant 0 : i32
    return %c0_i32, %c0_i32_0, %c0_i32_1 : i32, i32, i32
  }
  func.func @transform_4(%arg0: i32) -> (i32, i32, i32) {
    %c0_i32 = arith.constant 0 : i32
    %c0_i32_0 = arith.constant 0 : i32
    %c0_i32_1 = arith.constant 0 : i32
    %c0_i32_2 = arith.constant 0 : i32
    return %c0_i32, %c0_i32_0, %c0_i32_1 : i32, i32, i32
  }
  func.func @transform_5(%arg0: i32) -> (i32, i32, i32) {
    %c0_i32 = arith.constant 0 : i32
    %c0_i32_0 = arith.constant 0 : i32
    %c0_i32_1 = arith.constant 0 : i32
    %c0_i32_2 = arith.constant 0 : i32
    return %c0_i32, %c0_i32_0, %c0_i32_1 : i32, i32, i32
  }
  func.func @transform_6(%arg0: i32) -> (i32, i32, i32) {
    %c0_i32 = arith.constant 0 : i32
    %c0_i32_0 = arith.constant 0 : i32
    %c0_i32_1 = arith.constant 0 : i32
    %c0_i32_2 = arith.constant 0 : i32
    return %c0_i32, %c0_i32_0, %c0_i32_1 : i32, i32, i32
  }
  func.func @transform_7(%arg0: i32) -> (i32, i32, i32) {
    %c0_i32 = arith.constant 0 : i32
    %c0_i32_0 = arith.constant 0 : i32
    %c0_i32_1 = arith.constant 0 : i32
    %c0_i32_2 = arith.constant 0 : i32
    return %c0_i32, %c0_i32_0, %c0_i32_1 : i32, i32, i32
  }
  func.func @transform_8(%arg0: i32) -> (i32, i32, i32) {
    %c0_i32 = arith.constant 0 : i32
    %c0_i32_0 = arith.constant 0 : i32
    %c0_i32_1 = arith.constant 0 : i32
    %c0_i32_2 = arith.constant 0 : i32
    return %c0_i32, %c0_i32_0, %c0_i32_1 : i32, i32, i32
  }
  func.func @transform_9(%arg0: i32) -> (i32, i32, i32) {
    %c0_i32 = arith.constant 0 : i32
    %c0_i32_0 = arith.constant 0 : i32
    %c0_i32_1 = arith.constant 0 : i32
    %c0_i32_2 = arith.constant 0 : i32
    return %c0_i32, %c0_i32_0, %c0_i32_1 : i32, i32, i32
  }
  func.func @transform_10(%arg0: i32) -> (i32, i32) {
    %c0_i32 = arith.constant 0 : i32
    %c0_i32_0 = arith.constant 0 : i32
    %c0_i32_1 = arith.constant 0 : i32
    return %c0_i32, %c0_i32_0 : i32, i32
  }
  func.func @transform_11(%arg0: i32) -> (i32, i32) {
    %c0_i32 = arith.constant 0 : i32
    %c0_i32_0 = arith.constant 0 : i32
    %c0_i32_1 = arith.constant 0 : i32
    return %c0_i32, %c0_i32_0 : i32, i32
  }
  func.func @transform_12(%arg0: i32) -> (i32, i32) {
    %c0_i32 = arith.constant 0 : i32
    %c0_i32_0 = arith.constant 0 : i32
    %c0_i32_1 = arith.constant 0 : i32
    return %c0_i32, %c0_i32_0 : i32, i32
  }
  func.func @transform_13(%arg0: i32) -> (i32, i32) {
    %c0_i32 = arith.constant 0 : i32
    %c0_i32_0 = arith.constant 0 : i32
    %c0_i32_1 = arith.constant 0 : i32
    return %c0_i32, %c0_i32_0 : i32, i32
  }
  func.func @transform_14(%arg0: i32) -> (i32, i32) {
    %c0_i32 = arith.constant 0 : i32
    %c0_i32_0 = arith.constant 0 : i32
    %c0_i32_1 = arith.constant 0 : i32
    return %c0_i32, %c0_i32_0 : i32, i32
  }
  func.func @transform_15(%arg0: i32) -> (i32, i32) {
    %c0_i32 = arith.constant 0 : i32
    %c0_i32_0 = arith.constant 0 : i32
    %c0_i32_1 = arith.constant 0 : i32
    return %c0_i32, %c0_i32_0 : i32, i32
  }
  func.func @transform_16(%arg0: i32) -> (i32, i32) {
    %c0_i32 = arith.constant 0 : i32
    %c0_i32_0 = arith.constant 0 : i32
    %c0_i32_1 = arith.constant 0 : i32
    return %c0_i32, %c0_i32_0 : i32, i32
  }
  func.func @transform_17(%arg0: i32) -> (i32, i32, i32) {
    %c0_i32 = arith.constant 0 : i32
    %c0_i32_0 = arith.constant 0 : i32
    %c0_i32_1 = arith.constant 0 : i32
    return %arg0, %c0_i32, %c0_i32_0 : i32, i32, i32
  }
}

</mosaic_0001>

<bundles_post_ra>
// kernel: tpu_custom_call.1
= control target key start
LH: loop header
LB: loop body
LE: loop exit
PB: predicated region body
PF: predicated region fallthrough
CT: control target
= control target key end

     0   :  { %s3401_s0 = inlined_call_operand.vmem [shape: f32[2,8,32], index: 0, kind: input, shape index: {}]   ;;  %s3402_s1 = inlined_call_operand.vmem [shape: f32[1,32], index: 1, kind: input, shape index: {}]   ;;  %s3403_s2 = inlined_call_operand.vmem [shape: f32[1,32], index: 2, kind: input, shape index: {}]   ;;  %s3404_s3 = inlined_call_operand.vmem [shape: bf16[4,32,8], index: 3, kind: input, shape index: {}]   ;;  %s3405_s4 = inlined_call_operand.vmem [shape: bf16[4,32,8], index: 4, kind: input, shape index: {}]   ;;  %s3406_s5 = inlined_call_operand.vmem [shape: bf16[4,32,8], index: 5, kind: input, shape index: {}]   ;;  %s3407_s6 = inlined_call_operand.vmem [shape: f32[4,1,8], index: 6, kind: input, shape index: {}]   ;;  %s3408_s7 = inlined_call_operand.vmem [shape: f32[4,1,8], index: 7, kind: input, shape index: {}]   ;;  %s3409_s8 = inlined_call_operand.vmem [shape: f32[4,1,8], index: 8, kind: input, shape index: {}]   ;;  %s3410_s9 = inlined_call_operand.vmem [shape: bf16[4,8,32], index: 9, kind: input, shape index: {}]   ;;  %s3411_s10 = inlined_call_operand.vmem [shape: f32[1,32], index: 10, kind: input, shape index: {}]   ;;  %s3412_s11 = inlined_call_operand.vmem [shape: f32[1,32], index: 11, kind: input, shape index: {}]   ;;  %s3413_s12 = inlined_call_operand.vmem [shape: f32[1,32], index: 12, kind: input, shape index: {}]   ;;  %s3414_s13 = inlined_call_operand.vmem [shape: bf16[32,128], index: 13, kind: input, shape index: {}]   ;;  %s3415_s14 = inlined_call_operand.vmem [shape: f32[1,128], index: 14, kind: input, shape index: {}]   ;;  %s3416_s15 = inlined_call_operand.vmem [shape: bf16[128,32], index: 15, kind: input, shape index: {}]   ;;  %s3417_s16 = inlined_call_operand.vmem [shape: f32[1,32], index: 16, kind: input, shape index: {}]   ;;  %s3418_s17 = inlined_call_operand.hbm [shape: f32[2,8,32], index: 17, kind: output, shape index: {}]  }
   0x1   :  { %3422 = sst [smem:[#allocation8_spill]] %s3401_s0 }
   0x2   :  { %3423 = sst [smem:[#allocation9_spill]] %s3402_s1 }
   0x3   :  { %3424 = sst [smem:[#allocation10_spill]] %s3403_s2 }
   0x4   :  { %3425 = sst [smem:[#allocation11_spill]] %s3404_s3 }
   0x5   :  { %22 = vsyncpa [#allocation3], 0 }
   0x6   :  { %24 = vsyncpa [#allocation3 + $0x1], 0  ;;  %s2949_s24 = smov 0   ;;  %s2951_s25 = smov 0  }
   0x7   :  { %s2953_s26 = smov 0   ;;  %s2955_s27 = smov 0  }
   0x8 LB: > { %3426 = sst [smem:[#allocation5_spill]] %s2849_s26  ;;  %s2970_s28 = sadd.s32 4294967295, %s2853_s27   ;;  %s2853_s27 = sphi %s2955_s27, %s3435_s27   ;;  %s2849_s26 = sphi %s2953_s26, %s3437_s26   ;;  %s2845_s25 = sphi %s2951_s25, %s3439_s25   ;;  %s2841_s24 = sphi %s2949_s24, %s3438_s24  }
   0x9   : > { %s2289_s29 = sadd.s32 4294967294, %s2853_s27   ;;  %s2974_s0 = sadd.s32 1, %s2853_s27  }
   0xa   : > { %3427 = sst [smem:[#allocation6_spill]] %s2974_s0  ;;  %s399_s30 = sadd.s32 1, %s2849_s26 }
   0xb   : > { %s396_s18 = ssub.s32 %s2853_s27, %s2974_s0  ;;  %p409_p0 = scmp.ne.s32.totalorder %s2849_s26, %s2845_s25 }
   0xc   : > { %p397_p1 = scmp.eq.s32.totalorder %s396_s18, 0  ;;  %p410_p2 = scmp.eq.s32.totalorder %s2970_s28, 1 }
   0xd   : > { %p415_p3 = scmp.ne.s32.totalorder %s2845_s25, %s2841_s24  ;;  %p416_p4 = scmp.eq.s32.totalorder %s2289_s29, 1 }
   0xe   : > { %s2985_s19 = scalar_select %p397_p1, %s2849_s26, %s399_s30  }
   0xf   : > { %p2987_p5 = por %p410_p2, %p409_p0  ;;  %p2991_p6 = por %p416_p4, %p415_p3 }
  0x10   : > { %3428 = sst [smem:[#allocation7_spill]] %s2985_s19  ;;  %p2292_p7 = scmp.ge.s32.totalorder %s2853_s27, 1 }
  0x11   : > { %p489_p8 = scmp.lt.s32.totalorder %s2853_s27, 3 }
  0x13   : > { %p490_p9 = pnand %p2292_p7, %p489_p8 }
  0x14   : > { %p540_p10 = scmp.lt.s32.totalorder (!%p490_p9), %s2970_s28, 1  ;;  %vm548_vm0 = vcmask (!%p490_p9), 261120   ;;  %s3431_s30 = sld [smem:[#allocation8_spill]] (!%p490_p9)  ;;  %v2855_v9 = vmov (!%p490_p9), 0.0   ;;  %vm2856_vm1 = vmmov (!%p490_p9), 0   ;;  %v2739_v21 = vld [vmem:[%s3405_s4] sm:$0xff] (!%p490_p9)  }
  0x15   : > { %493 = sbr.rel (%p490_p9) target bundleno = 2368 (0x940), region = 88  ;;  %s3432_s3 = sld [smem:[#allocation11_spill]] (!%p490_p9)  ;;  %2497 = vmatprep.subr.bf16.mxu0 (!%p490_p9), %v2855_v9  ;;  %2521 = vmatprep.subr.bf16.mxu1 (!%p490_p9), %v2855_v9  ;;  %v2740_v22 = vld [vmem:[%s3406_s5 + $0x10] sm:$0xff] (!%p490_p9)   ;;  %v2741_v24 = vld [vmem:[%s3405_s4 + $0x8] sm:$0xff] (!%p490_p9)   ;;  %v2742_v25 = vld [vmem:[%s3406_s5 + $0x18] sm:$0xff] (!%p490_p9)   ;;  %vm1373_vm2 = vcmask (!%p490_p9), 64512  }
  0x16   : > { %2501 = vmatprep.mubr.msk.bf16.mxu0 (!%p490_p9), %vm2856_vm1, %v2855_v9  ;;  %2525 = vmatprep.mubr.msk.bf16.mxu1 (!%p490_p9), %vm2856_vm1, %v2855_v9  ;;  %s3434_s2 = sld [smem:[#allocation10_spill]] (!%p490_p9)  ;;  %v2743_v26 = vld [vmem:[%s3406_s5] sm:$0xff] (!%p490_p9)   ;;  %v2745_v28 = vld [vmem:[%s3406_s5 + $0x8] sm:$0xff] (!%p490_p9)   ;;  %v2747_v30 = vld [vmem:[%s3405_s4 + $0x10] sm:$0xff] (!%p490_p9)   ;;  %vm1609_vm3 = vcmask (!%p490_p9), 1043456   ;;  %s2422_s23 = sshll.u32 (!%p490_p9), %s2970_s28, 7 }
  0x17   : > { %v2744_v27 = vld [vmem:[%s3405_s4 + $0x20] sm:$0xff] (!%p490_p9)   ;;  %v2746_v29 = vld [vmem:[%s3405_s4 + $0x28] sm:$0xff] (!%p490_p9)   ;;  %v2749_v32 = vld [vmem:[%s3405_s4 + $0x18] sm:$0xff] (!%p490_p9)  }
  0x18   : > { %v2752_v35 = vld [vmem:[%s3406_s5 + $0x30] sm:$0xff] (!%p490_p9)   ;;  %v2754_v37 = vld [vmem:[%s3406_s5 + $0x38] sm:$0xff] (!%p490_p9)   ;;  %v2755_v38 = vld [vmem:[%s3406_s5 + $0x20] sm:$0xff] (!%p490_p9)  }
  0x19   : > { %v2756_v39 = vld [vmem:[%s3406_s5 + $0x28] sm:$0xff] (!%p490_p9)   ;;  %v2757_v40 = vld [vmem:[%s3405_s4 + $0x30] sm:$0xff] (!%p490_p9)   ;;  %v2758_v41 = vld [vmem:[%s3405_s4 + $0x38] sm:$0xff] (!%p490_p9)  }
  0x1a   : > { %v2301_v50 = vld [vmem:[%s3408_s7] ss:$0 sm:$0xff] (!%p490_p9)  ;;  %v2350_v63 = vld [vmem:[%s3408_s7 + $0x2] ss:$0 sm:$0xff] (!%p490_p9) }
  0x1b   : > { %v2735_v7 = vld [vmem:[%s3432_s3] sm:$0xff] (!%p490_p9)   ;;  %v2736_v8 = vld [vmem:[%s3432_s3 + $0x10] sm:$0xff] (!%p490_p9)   ;;  %v2737_v10 = vld [vmem:[%s3432_s3 + $0x8] sm:$0xff] (!%p490_p9)  }
  0x1c   : > { %s541_s21 = scalar_select %p540_p10, %s2970_s28, 1  ;;  %2498 = vmatpush3.bf16.msra.mxu0 %v2735_v7  ;;  %2522 = vmatpush3.bf16.msra.mxu1 %v2736_v8  ;;  %v2738_v11 = vld [vmem:[%s3432_s3 + $0x18] sm:$0xff]   ;;  %v2296_v18 = vld [vmem:[%s3434_s2] ss:$0 sm:$0xff]  ;;  %v2748_v31 = vld [vmem:[%s3432_s3 + $0x30] sm:$0xff]  }
  0x1d   : > { %2499 = vmatprep.subr.bf16.mxu0 %v2855_v9  ;;  %2523 = vmatprep.subr.bf16.mxu1 %v2855_v9  ;;  %v2750_v33 = vld [vmem:[%s3432_s3 + $0x38] sm:$0xff]   ;;  %v2751_v34 = vld [vmem:[%s3432_s3 + $0x20] sm:$0xff]   ;;  %v2753_v36 = vld [vmem:[%s3432_s3 + $0x28] sm:$0xff]   ;;  %s3358_s2 = scalar_lea.hbm %s3418_s17, %s2422_s23 }
  0x1e   : > { %s2294_s22 = sshll.u32 %s541_s21, 3  ;;  %v2297_v61 = vld [vmem:[%s3407_s6] ss:$0 sm:$0xff] }
  0x1f   : > { %s543_s18 = scalar_lea.vmem %s3431_s30, %s2294_s22  ;;  %s3433_s22 = sld [smem:[#allocation9_spill]] }
  0x20   : > { %v3002_v0 = vld [vmem:[%s543_s18] sm:$0xff]  ;;  %2500 = vmatpush3.bf16.msra.mxu0 %v2737_v10  ;;  %2524 = vmatpush3.bf16.msra.mxu1 %v2738_v11  ;;  %s537_s30 = sand.u32 1, %s2845_s25   ;;  %s2858_s18 = smov [#allocation2]  }
  0x21   : > { %v549_v1 = vsel %vm548_vm0, %v3002_v0, 0.0  ;;  %2505 = vmatprep.subr.bf16.mxu0 %v2855_v9  ;;  %2537 = vmatprep.subr.bf16.mxu1 %v2855_v9  ;;  %s2293_s19 = sshll.u32 %s537_s30, 3  ;;  %s2217_s28 = scalar_lea.sflag [#allocation3], %s537_s30 }
  0x22   : > { %550 = vadd.xlane.f32.xlu0 %v549_v1  ;;  %s2795_s21 = sshll.u32 %s2858_s18, 4  ;;  %s2796_s21 = int_to_ptr.vmem [resolvable:$false] %s2795_s21 }
  0x23   : > { %s2797_s3 = scalar_lea.vmem %s2796_s21, 256 }
  0x25   : > { %v2295_v16 = vld [vmem:[%s3433_s22] ss:$0 sm:$0xff]  ;;  %s539_s22 = scalar_lea.vmem [#allocation2], %s2293_s19 }
  0x26   : > { %s2230_s29 = sshll.u32 %s539_s22, 4  ;;  %s3360_s29 = int_to_ptr.vmem [resolvable:$true] %s2230_s29 }
  0x27   : > { %s2791_s19 = scalar_lea.vmem %s3360_s29, 128  ;;  %p2798_p0 = scmp.lt.s32.totalorder %s3360_s29, %s2796_s21 }
  0x28   : > { %p2792_p11 = scmp.ne.s32.totalorder %s3360_s29, %s2791_s19  ;;  %p2799_p1 = scmp.lt.s32.totalorder %s2797_s3, %s2791_s19 }
  0x2a   : > { %p2793_p12 = pnand %p2792_p11, %p2987_p5  ;;  %p2800_p2 = por %p2799_p1, %p2798_p0 }
  0x2c   : > { %p2794_p13 = pneg %p2793_p12 }
  0x2e   : > { %p2801_p3 = pnand %p2800_p2, %p2794_p13 }
  0xaf   : > { %v551_v2 = vpop.xlane.xlu0 %550 }
  0xb0   : > { %v553_v3 = vmul.f32 0.03125, %v551_v2 }
  0xb2   : > { %v554_v4 = vsub.f32 %v3002_v0, %v553_v3 }
  0xb4   : > { %v555_v5 = vmul.f32 %v554_v4, %v554_v4 }
  0xb6   : > { %v556_v6 = vsel %vm548_vm0, %v555_v5, 0.0 }
  0xb7   : > { %557 = vadd.xlane.f32.xlu0 %v556_v6 }
 0x144   : > { %v558_v12 = vpop.xlane.xlu0 %557 }
 0x145   : > { %v559_v13 = vmul.f32 0.03125, %v558_v12 }
 0x147   : > { %v560_v14 = vadd.f32 1e-05, %v559_v13 }
 0x149   : > { %2769 = vrsqrt.f32 %v560_v14 }
 0x153   : > { %v2770_v15 = vpop.eup %2769 }
 0x154   : > { %v562_v17 = vmul.f32 %v2770_v15, %v554_v4  ;;  %v2323_v15 = vld [vmem:[%s3408_s7 + $0x1] ss:$0 sm:$0xff] }
 0x156   : > { %v569_v19 = vmul.f32 %v2295_v16, %v562_v17 }
 0x158   : > { %v576_v20 = vadd.f32 %v2296_v18, %v569_v19 }
 0x15a   : > { %v3042_v23 = vpack.c.bf16 %v576_v20, %v576_v20 }
 0x15c   : > { %2502 = vmatmul.mubr.msk.bf16.vlgmr.msra.gmra.mrb[0].mxu0 %vm548_vm0, %v3042_v23  ;;  %2526 = vmatmul.mubr.msk.bf16.vlgmr.msra.gmra.mrb[0].mxu1 %vm548_vm0, %v3042_v23 }
 0x15d   : > { %2506 = vmatpush3.bf16.msra.mxu0 %v2739_v21  ;;  %2538 = vmatpush3.bf16.msra.mxu1 %v2740_v22  ;;  %v2305_v21 = vld [vmem:[%s3409_s8] ss:$0 sm:$0xff] }
 0x15e   : > { %2507 = vmatprep.subr.bf16.mxu0 %v2855_v9  ;;  %2539 = vmatprep.subr.bf16.mxu1 %v2855_v9 }
 0x15f   : > { %2509 = vmatprep.mubr.msk.bf16.mxu0 %vm2856_vm1, %v2855_v9  ;;  %2541 = vmatprep.mubr.msk.bf16.mxu1 %vm2856_vm1, %v2855_v9 }
 0x161   : > { %2508 = vmatpush3.bf16.msra.mxu0 %v2741_v24  ;;  %2540 = vmatpush3.bf16.msra.mxu1 %v2742_v25 }
 0x162   : > { %2513 = vmatprep.subr.bf16.mxu0 %v2855_v9  ;;  %2553 = vmatprep.subr.bf16.mxu1 %v2855_v9 }
 0x164   : > { %2510 = vmatmul.mubr.msk.bf16.vlgmr.msra.gmra.mrb[4].mxu0 %vm548_vm0, %v3042_v23  ;;  %2542 = vmatmul.mubr.msk.bf16.vlgmr.msra.gmra.mrb[4].mxu1 %vm548_vm0, %v3042_v23 }
 0x165   : > { %2514 = vmatpush3.bf16.msra.mxu0 %v2743_v26  ;;  %2554 = vmatpush3.bf16.msra.mxu1 %v2744_v27  ;;  %v2314_v27 = vld [vmem:[%s3407_s6 + $0x1] ss:$0 sm:$0xff] }
 0x166   : > { %2515 = vmatprep.subr.bf16.mxu0 %v2855_v9  ;;  %2555 = vmatprep.subr.bf16.mxu1 %v2855_v9 }
 0x167   : > { %2517 = vmatprep.mubr.msk.bf16.mxu0 %vm2856_vm1, %v2855_v9  ;;  %2557 = vmatprep.mubr.msk.bf16.mxu1 %vm2856_vm1, %v2855_v9 }
 0x169   : > { %2516 = vmatpush3.bf16.msra.mxu0 %v2745_v28  ;;  %2556 = vmatpush3.bf16.msra.mxu1 %v2746_v29 }
 0x16a   : > { %2529 = vmatprep.subr.bf16.mxu0 %v2855_v9  ;;  %2569 = vmatprep.subr.bf16.mxu1 %v2855_v9 }
 0x16c   : > { %2518 = vmatmul.mubr.msk.bf16.vlgmr.msra.gmra.mrb[8].mxu0 %vm548_vm0, %v3042_v23  ;;  %2558 = vmatmul.mubr.msk.bf16.vlgmr.msra.gmra.mrb[8].mxu1 %vm548_vm0, %v3042_v23 }
 0x16d   : > { %2530 = vmatpush3.bf16.msra.mxu0 %v2747_v30  ;;  %2570 = vmatpush3.bf16.msra.mxu1 %v2748_v31  ;;  %v2341_v30 = vld [vmem:[%s3407_s6 + $0x2] ss:$0 sm:$0xff] }
 0x16e   : > { %2531 = vmatprep.subr.bf16.mxu0 %v2855_v9  ;;  %2571 = vmatprep.subr.bf16.mxu1 %v2855_v9 }
 0x16f   : > { %2533 = vmatprep.mubr.msk.bf16.mxu0 %vm2856_vm1, %v2855_v9  ;;  %2573 = vmatprep.mubr.msk.bf16.mxu1 %vm2856_vm1, %v2855_v9 }
 0x171   : > { %2532 = vmatpush3.bf16.msra.mxu0 %v2749_v32  ;;  %2572 = vmatpush3.bf16.msra.mxu1 %v2750_v33 }
 0x172   : > { %2545 = vmatprep.subr.bf16.mxu0 %v2855_v9  ;;  %2585 = vmatprep.subr.bf16.mxu1 %v2855_v9 }
 0x174   : > { %2534 = vmatmul.mubr.msk.bf16.vlgmr.msra.gmra.mrb[12].mxu0 %vm548_vm0, %v3042_v23  ;;  %2574 = vmatmul.mubr.msk.bf16.vlgmr.msra.gmra.mrb[12].mxu1 %vm548_vm0, %v3042_v23 }
 0x175   : > { %2546 = vmatpush3.bf16.msra.mxu0 %v2751_v34  ;;  %2586 = vmatpush3.bf16.msra.mxu1 %v2752_v35 }
 0x176   : > { %2547 = vmatprep.subr.bf16.mxu0 %v2855_v9  ;;  %2587 = vmatprep.subr.bf16.mxu1 %v2855_v9 }
 0x177   : > { %2549 = vmatprep.mubr.msk.bf16.mxu0 %vm2856_vm1, %v2855_v9  ;;  %2589 = vmatprep.mubr.msk.bf16.mxu1 %vm2856_vm1, %v2855_v9 }
 0x179   : > { %2548 = vmatpush3.bf16.msra.mxu0 %v2753_v36  ;;  %2588 = vmatpush3.bf16.msra.mxu1 %v2754_v37 }
 0x17a   : > { %2561 = vmatprep.subr.bf16.mxu0 %v2855_v9  ;;  %2599 = vmatprep.subr.bf16.mxu1 %v2855_v9 }
 0x17c   : > { %2550 = vmatmul.mubr.msk.bf16.vlgmr.msra.gmra.mrb[16].mxu0 %vm548_vm0, %v3042_v23  ;;  %2590 = vmatmul.mubr.msk.bf16.vlgmr.msra.gmra.mrb[16].mxu1 %vm548_vm0, %v3042_v23 }
 0x17d   : > { %2562 = vmatpush3.bf16.msra.mxu0 %v2755_v38  ;;  %2565 = vmatprep.mubr.msk.bf16.mxu0 %vm2856_vm1, %v2855_v9 }
 0x17e   : > { %2563 = vmatprep.subr.bf16.mxu0 %v2855_v9  ;;  %2601 = vmatprep.mubr.msk.bf16.mxu1 %vm2856_vm1, %v2855_v9 }
 0x181   : > { %2564 = vmatpush3.bf16.msra.mxu0 %v2756_v39 }
 0x182   : > { %2577 = vmatprep.subr.bf16.mxu0 %v2855_v9 }
 0x184   : > { %2566 = vmatmul.mubr.msk.bf16.vlgmr.msra.gmra.mrb[20].mxu0 %vm548_vm0, %v3042_v23 }
 0x185   : > { %2578 = vmatpush3.bf16.msra.mxu0 %v2757_v40  ;;  %2581 = vmatprep.mubr.msk.bf16.mxu0 %vm2856_vm1, %v2855_v9 }
 0x186   : > { %2579 = vmatprep.subr.bf16.mxu0 %v2855_v9 }
 0x189   : > { %2580 = vmatpush3.bf16.msra.mxu0 %v2758_v41 }
 0x18a   : > { %2593 = vmatprep.subr.bf16.mxu0 %v2855_v9 }
 0x18c   : > { %2582 = vmatmul.mubr.msk.bf16.vlgmr.msra.gmra.mrb[24].mxu0 %vm548_vm0, %v3042_v23 }
 0x18d   : > { %2595 = vmatprep.mubr.msk.bf16.mxu0 %vm2856_vm1, %v2855_v9 }
 0x22f   : > { %v638_v42 = vpop.f32.mrb[0].mxu0  ;;  %v829_v43 = vpop.f32.mrb[0].mxu1 }
 0x230   : > { %v2503_v44 = vpop.f32.mrb[1].mxu0  ;;  %v2527_v45 = vpop.f32.mrb[1].mxu1  ;;  %v639_v1 = vadd.f32 %v2297_v61, %v638_v42  ;;  %v830_v31 = vadd.f32 %v2314_v27, %v829_v43 }
 0x231   : > { %v641_v46 = vpop.f32.mrb[2].mxu0  ;;  %v832_v47 = vpop.f32.mrb[2].mxu1 }
 0x232   : > { %v2504_v48 = vpop.f32.mrb[3].mxu0  ;;  %v2528_v49 = vpop.f32.mrb[3].mxu1  ;;  %v1355_v10 = vpack.c.bf16 %v639_v1, %v639_v1  ;;  %v1356_v40 = vpack.c.bf16 %v830_v31, %v830_v31 }
 0x233   : > { %v2377_v49 = vld [vmem:[%s3408_s7 + $0x3] ss:$0 sm:$0xff] }
 0x237   : > { %v701_v51 = vpop.f32.mrb[4].mxu0  ;;  %v3169_v52 = vpop.f32.mrb[4].mxu1 }
 0x238   : > { %v702_v53 = vadd.f32 %v2301_v50, %v701_v51  ;;  %v2511_v54 = vpop.f32.mrb[5].mxu0  ;;  %v2543_v55 = vpop.f32.mrb[5].mxu1 }
 0x239   : > { %v704_v56 = vpop.f32.mrb[6].mxu0  ;;  %v962_v57 = vpop.f32.mrb[6].mxu1  ;;  %v2332_v54 = vld [vmem:[%s3409_s8 + $0x1] ss:$0 sm:$0xff] }
 0x23a   : > { %v1359_v58 = vpack.c.bf16 %v702_v53, %v702_v53  ;;  %v2512_v59 = vpop.f32.mrb[7].mxu0  ;;  %v2544_v60 = vpop.f32.mrb[7].mxu1 }
 0x23b   : > { %v960_v59 = vadd.f32 %v2332_v54, %v3169_v52 }
 0x23c   : > { %v1378_v62 = vsel %vm1373_vm2, %v1359_v58, 0  ;;  %v2368_v58 = vld [vmem:[%s3407_s6 + $0x3] ss:$0 sm:$0xff] }
 0x23d   : > { %2594 = vmatpush3.bf16.xpose.msra.mxu0 %v1378_v62  ;;  %v1364_v62 = vpack.c.bf16 %v960_v59, %v960_v59 }
 0x23e   : > { %2605 = vmatprep.subr.bf16.mxu0 %v2855_v9 }
 0x23f   : > { %v764_v2 = vpop.f32.mrb[8].mxu0  ;;  %v1089_v3 = vpop.f32.mrb[8].mxu1  ;;  %v1657_v1 = vsel %vm1609_vm3, %v1364_v62, 0 }
 0x240   : > { %v1090_v4 = vadd.f32 %v2350_v63, %v1089_v3  ;;  %v2519_v5 = vpop.f32.mrb[9].mxu0  ;;  %v2559_v6 = vpop.f32.mrb[9].mxu1  ;;  %v765_v28 = vadd.f32 %v2305_v21, %v764_v2  ;;  %v1367_v2 = vlaneseq }
 0x241   : > { %v767_v7 = vpop.f32.mrb[10].mxu0  ;;  %v1092_v8 = vpop.f32.mrb[10].mxu1 }
 0x242   : > { %v1361_v11 = vpack.c.bf16 %v1090_v4, %v1090_v4  ;;  %v2520_v12 = vpop.f32.mrb[11].mxu0  ;;  %v2560_v13 = vpop.f32.mrb[11].mxu1  ;;  %v1363_v34 = vpack.c.bf16 %v765_v28, %v765_v28  ;;  %v1368_v52 = vshrl.u32 %v1367_v2, 7  ;;  %v1370_v3 = vand.u32 127, %v1367_v2 }
 0x243   : > { %v2857_v4 = vmov -1e+30  }
 0x244   : > { %v1470_v14 = vsel %vm1373_vm2, %v1361_v11, 0  ;;  %2596 = vmatmul.mubr.msk.bf16.vlgmr.msra.gmra.mrb[28].mxu0 %vm1373_vm2, %v1355_v10  ;;  %v1611_v45 = vsel %vm1609_vm3, %v1363_v34, 0  ;;  %vm1371_vm4 = vcmp.le.s32.totalorder %v1370_v3, %v1368_v52 }
 0x245   : > { %2606 = vmatpush3.bf16.xpose.msra.mxu0 %v1470_v14  ;;  %2607 = vmatprep.mubr.msk.bf16.mxu0 %vm2856_vm1, %v2855_v9  ;;  %v1372_v5 = vsel %vm1371_vm4, 0.0, %v2857_v4 }
 0x246   : > { %2617 = vmatprep.subr.bf16.mxu0 %v2855_v9 }
 0x247   : > { %v894_v16 = vpop.f32.mrb[12].mxu0  ;;  %v1219_v17 = vpop.f32.mrb[12].mxu1 }
 0x248   : > { %v895_v18 = vadd.f32 %v2323_v15, %v894_v16  ;;  %v2535_v19 = vpop.f32.mrb[13].mxu0  ;;  %v2575_v20 = vpop.f32.mrb[13].mxu1  ;;  %v1220_v61 = vadd.f32 %v2368_v58, %v1219_v17 }
 0x249   : > { %v897_v22 = vpop.f32.mrb[14].mxu0  ;;  %v1222_v23 = vpop.f32.mrb[14].mxu1 }
 0x24a   : > { %v1360_v24 = vpack.c.bf16 %v895_v18, %v895_v18  ;;  %v2536_v25 = vpop.f32.mrb[15].mxu0  ;;  %v2576_v26 = vpop.f32.mrb[15].mxu1  ;;  %v1358_v63 = vpack.c.bf16 %v1220_v61, %v1220_v61 }
 0x24c   : > { %v1424_v29 = vsel %vm1373_vm2, %v1360_v24, 0 }
 0x24d   : > { %2600 = vmatpush3.bf16.xpose.msra.mxu1 %v1424_v29 }
 0x24e   : > { %2611 = vmatprep.subr.bf16.mxu1 %v2855_v9 }
 0x24f   : > { %v1024_v32 = vpop.f32.mrb[16].mxu0  ;;  %v3198_v33 = vpop.f32.mrb[16].mxu1 }
 0x250   : > { %v1025_v35 = vadd.f32 %v2341_v30, %v1024_v32  ;;  %v2551_v36 = vpop.f32.mrb[17].mxu0  ;;  %v2591_v37 = vpop.f32.mrb[17].mxu1 }
 0x251   : > { %v1027_v38 = vpop.f32.mrb[18].mxu0  ;;  %v1352_v39 = vpop.f32.mrb[18].mxu1 }
 0x252   : > { %v1357_v41 = vpack.c.bf16 %v1025_v35, %v1025_v35  ;;  %v2552_v42 = vpop.f32.mrb[19].mxu0  ;;  %v2592_v44 = vpop.f32.mrb[19].mxu1 }
 0x254   : > { %2602 = vmatmul.mubr.msk.bf16.vlgmr.msra.gmra.mrb[20].mxu1 %vm1373_vm2, %v1356_v40  ;;  %2608 = vmatmul.mubr.msk.bf16.vlgmr.msra.gmra.mrb[32].mxu0 %vm1373_vm2, %v1357_v41 }
 0x255   : > { %2618 = vmatpush3.bf16.msra.mxu0 %v1611_v45  ;;  %2613 = vmatprep.mubr.msk.bf16.mxu1 %vm2856_vm1, %v2855_v9 }
 0x256   : > { %2619 = vmatprep.mubr.msk.bf16.mxu0 %vm2856_vm1, %v2855_v9  ;;  %2629 = vmatprep.subr.bf16.mxu0 %v2855_v9 }
 0x257   : > { %v3208_v43 = vpop.f32.mrb[20].mxu0 }
 0x258   : > { %v2567_v46 = vpop.f32.mrb[21].mxu0 }
 0x259   : > { %v1157_v47 = vpop.f32.mrb[22].mxu0 }
 0x25a   : > { %v2568_v48 = vpop.f32.mrb[23].mxu0 }
 0x25f   : > { %v1284_v50 = vpop.f32.mrb[24].mxu0 }
 0x260   : > { %v1285_v51 = vadd.f32 %v2377_v49, %v1284_v50  ;;  %v2583_v53 = vpop.f32.mrb[25].mxu0 }
 0x261   : > { %v1287_v55 = vpop.f32.mrb[26].mxu0 }
 0x262   : > { %v1362_v56 = vpack.c.bf16 %v1285_v51, %v1285_v51  ;;  %v2584_v57 = vpop.f32.mrb[27].mxu0  ;;  %v2359_v55 = vld [vmem:[%s3409_s8 + $0x2] ss:$0 sm:$0xff] }
 0x264   : > { %v1516_v60 = vsel %vm1373_vm2, %v1362_v56, 0  ;;  %v1155_v56 = vadd.f32 %v2359_v55, %v3208_v43  ;;  %v2386_v43 = vld [vmem:[%s3409_s8 + $0x3] ss:$0 sm:$0xff] }
 0x265   : > { %2612 = vmatpush3.bf16.xpose.msra.mxu1 %v1516_v60 }
 0x266   : > { %2623 = vmatprep.subr.bf16.mxu1 %v2855_v9  ;;  %v1365_v58 = vpack.c.bf16 %v1155_v56, %v1155_v56 }
 0x268   : > { %v1703_v61 = vsel %vm1609_vm3, %v1365_v58, 0 }
 0x26c   : > { %2614 = vmatmul.mubr.msk.bf16.vlgmr.msra.gmra.mrb[24].mxu1 %vm1373_vm2, %v1358_v63 }
 0x26d   : > { %2624 = vmatpush3.bf16.msra.mxu1 %v1657_v1  ;;  %2625 = vmatprep.mubr.msk.bf16.mxu1 %vm2856_vm1, %v2855_v9  ;;  %v1350_v1 = vadd.f32 %v2386_v43, %v3198_v33 }
 0x26e   : > { %2635 = vmatprep.subr.bf16.mxu1 %v2855_v9 }
 0x26f   : > { %v1366_v3 = vpack.c.bf16 %v1350_v1, %v1350_v1 }
 0x317   : > { %v1414_v6 = vpop.f32.mrb[28].mxu0 }
 0x318   : > { %v1415_v7 = vadd.f32 %v1414_v6, %v1372_v5  ;;  %v2597_v8 = vpop.f32.mrb[29].mxu0 }
 0x319   : > { %v1417_v10 = vpop.f32.mrb[30].mxu0  ;;  %v1749_v8 = vsel %vm1609_vm3, %v1366_v3, 0 }
 0x31a   : > { %v2598_v11 = vpop.f32.mrb[31].mxu0  ;;  %v1558_v12 = vsel %vm1373_vm2, %v1415_v7, -inf }
 0x31b   : > { %1559 = vmax.xlane.f32.xlu1 %v1558_v12 }
 0x327   : > { %v1460_v13 = vpop.f32.mrb[20].mxu1  ;;  %v1506_v14 = vpop.f32.mrb[32].mxu0 }
 0x328   : > { %v1461_v15 = vadd.f32 %v1460_v13, %v1372_v5  ;;  %v1507_v16 = vadd.f32 %v1506_v14, %v1372_v5  ;;  %v2603_v17 = vpop.f32.mrb[21].mxu1  ;;  %v2609_v18 = vpop.f32.mrb[33].mxu0  ;;  %v1792_v13 = vld [vmem:[%s3410_s9] sm:$0xf] }
 0x329   : > { %v1463_v19 = vpop.f32.mrb[22].mxu1  ;;  %v1509_v20 = vpop.f32.mrb[34].mxu0  ;;  %v1846_v14 = vsel %vm1609_vm3, %v1792_v13, 0  ;;  %v2403_v17 = vld [vmem:[%s3410_s9 + $0xc] sm:$0xf] }
 0x32a   : > { %v2604_v21 = vpop.f32.mrb[23].mxu1  ;;  %v2610_v22 = vpop.f32.mrb[35].mxu0  ;;  %v1561_v23 = vsel %vm1373_vm2, %v1461_v15, -inf  ;;  %v1564_v24 = vsel %vm1373_vm2, %v1507_v16, -inf  ;;  %v2406_v13 = vld [vmem:[%s3412_s11] ss:$0 sm:$0xff] }
 0x32b   : > { %1562 = vmax.xlane.f32.xlu1 %v1561_v23  ;;  %1565 = vmax.xlane.f32.xlu0 %v1564_v24  ;;  %v1945_v21 = vsel %vm1609_vm3, %v2403_v17, 0  ;;  %v2401_v24 = vld [vmem:[%s3410_s9 + $0x8] sm:$0xf] }
 0x33f   : > { %v1552_v25 = vpop.f32.mrb[24].mxu1 }
 0x340   : > { %v1553_v26 = vadd.f32 %v1552_v25, %v1372_v5  ;;  %v2615_v27 = vpop.f32.mrb[25].mxu1 }
 0x341   : > { %v1555_v28 = vpop.f32.mrb[26].mxu1 }
 0x342   : > { %v2616_v29 = vpop.f32.mrb[27].mxu1  ;;  %v1567_v30 = vsel %vm1373_vm2, %v1553_v26, -inf }
 0x343   : > { %1568 = vmax.xlane.f32.xlu1 %v1567_v30  ;;  %v1895_v29 = vsel %vm1609_vm3, %v2401_v24, 0  ;;  %v2767_v24 = vld [vmem:[%s3416_s15 + $0x30] sm:$0xff]  }
 0x3a8   : > { %v1560_v31 = vpop.xlane.xlu1 %1559 }
 0x3a9   : > { %v1570_v32 = vsub.f32 %v1415_v7, %v1560_v31 }
 0x3ab   : > { %v1574_v34 = vmul.f32 1.442695, %v1570_v32 }
 0x3ad   : > { %2771 = vpow2.f32 %v1574_v34 }
 0x3b7   : > { %v2772_v35 = vpop.eup %2771 }
 0x3b8   : > { %v1563_v36 = vpop.xlane.xlu1 %1562  ;;  %v1566_v37 = vpop.xlane.xlu0 %1565  ;;  %v1582_v38 = vsel %vm1373_vm2, %v2772_v35, 0.0 }
 0x3b9   : > { %v1571_v39 = vsub.f32 %v1461_v15, %v1563_v36  ;;  %v1572_v40 = vsub.f32 %v1507_v16, %v1566_v37  ;;  %1583 = vadd.xlane.f32.xlu0 %v1582_v38  ;;  %v2398_v15 = vld [vmem:[%s3410_s9 + $0x4] sm:$0xf] }
 0x3ba   : > { %v1800_v16 = vsel %vm1609_vm3, %v2398_v15, 0  ;;  %v2407_v15 = vld [vmem:[%s3413_s12] ss:$0 sm:$0xff] }
 0x3bb   : > { %v1576_v41 = vmul.f32 1.442695, %v1571_v39  ;;  %v1578_v42 = vmul.f32 1.442695, %v1572_v40 }
 0x3bd   : > { %2773 = vpow2.f32 %v1576_v41 }
 0x3be   : > { %2775 = vpow2.f32 %v1578_v42 }
 0x3c7   : > { %v2774_v44 = vpop.eup %2773 }
 0x3c8   : > { %v2776_v45 = vpop.eup %2775  ;;  %v1585_v46 = vsel %vm1373_vm2, %v2774_v44, 0.0 }
 0x3c9   : > { %1586 = vadd.xlane.f32.xlu1 %v1585_v46  ;;  %v1588_v47 = vsel %vm1373_vm2, %v2776_v45, 0.0 }
 0x3ca   : > { %1589 = vadd.xlane.f32.xlu0 %v1588_v47 }
 0x3d0   : > { %v1569_v48 = vpop.xlane.xlu1 %1568 }
 0x3d1   : > { %v1573_v49 = vsub.f32 %v1553_v26, %v1569_v48 }
 0x3d3   : > { %v1580_v50 = vmul.f32 1.442695, %v1573_v49 }
 0x3d5   : > { %2777 = vpow2.f32 %v1580_v50 }
 0x3df   : > { %v2778_v51 = vpop.eup %2777 }
 0x3e0   : > { %v1591_v53 = vsel %vm1373_vm2, %v2778_v51, 0.0 }
 0x3e1   : > { %1592 = vadd.xlane.f32.xlu1 %v1591_v53 }
 0x446   : > { %v1584_v54 = vpop.xlane.xlu0 %1583 }
 0x447   : > { %2779 = vrcp.f32 %v1584_v54 }
 0x451   : > { %v2780_v57 = vpop.eup %2779 }
 0x452   : > { %v1598_v59 = vmul.f32 %v2780_v57, %v2772_v35 }
 0x454   : > { %v1602_v60 = vpack.c.bf16 %v1598_v59, %v1598_v59  ;;  %v2405_v59 = vld [vmem:[%s3411_s10] ss:$0 sm:$0xff] }
 0x456   : > { %v1587_v62 = vpop.xlane.xlu1 %1586  ;;  %2620 = vmatmul.mubr.msk.bf16.vlgmr.msra.gmra.mrb[36].mxu0 %vm1373_vm2, %v1602_v60 }
 0x457   : > { %2781 = vrcp.f32 %v1587_v62  ;;  %2630 = vmatpush3.bf16.msra.mxu0 %v1703_v61  ;;  %v1590_v63 = vpop.xlane.xlu0 %1589  ;;  %2631 = vmatprep.mubr.msk.bf16.mxu0 %vm2856_vm1, %v2855_v9 }
 0x458   : > { %2783 = vrcp.f32 %v1590_v63  ;;  %2641 = vmatprep.subr.bf16.mxu0 %v2855_v9 }
 0x461   : > { %v2782_v2 = vpop.eup %2781 }
 0x462   : > { %v2784_v52 = vpop.eup %2783  ;;  %v1599_v4 = vmul.f32 %v2782_v2, %v2774_v44 }
 0x463   : > { %v1600_v5 = vmul.f32 %v2784_v52, %v2776_v45 }
 0x464   : > { %v1603_v6 = vpack.c.bf16 %v1599_v4, %v1599_v4 }
 0x465   : > { %v1604_v7 = vpack.c.bf16 %v1600_v5, %v1600_v5 }
 0x466   : > { %2626 = vmatmul.mubr.msk.bf16.vlgmr.msra.gmra.mrb[28].mxu1 %vm1373_vm2, %v1603_v6 }
 0x467   : > { %2632 = vmatmul.mubr.msk.bf16.vlgmr.msra.gmra.mrb[40].mxu0 %vm1373_vm2, %v1604_v7  ;;  %2636 = vmatpush3.bf16.msra.mxu1 %v1749_v8  ;;  %v2759_v7 = vld [vmem:[%s3414_s13] sm:$0xff]  }
 0x468   : > { %2637 = vmatprep.mubr.msk.bf16.mxu1 %vm2856_vm1, %v2855_v9  ;;  %2647 = vmatprep.subr.bf16.mxu1 %v2855_v9  ;;  %v2761_v8 = vld [vmem:[%s3416_s15] sm:$0xff]  }
 0x469   : > { %2643 = vmatprep.mubr.msk.bf16.mxu0 %vm2856_vm1, %v2855_v9  ;;  %2642 = vmatpush3.bf16.msra.mxu0 %v1800_v16 }
 0x46a   : > { %2653 = vmatprep.subr.bf16.mxu0 %v2855_v9 }
 0x46e   : > { %v1593_v33 = vpop.xlane.xlu1 %1592 }
 0x46f   : > { %2785 = vrcp.f32 %v1593_v33 }
 0x479   : > { %v2786_v10 = vpop.eup %2785 }
 0x47a   : > { %v1601_v11 = vmul.f32 %v2786_v10, %v2778_v51 }
 0x47c   : > { %v1605_v12 = vpack.c.bf16 %v1601_v11, %v1601_v11 }
 0x47e   : > { %2638 = vmatmul.mubr.msk.bf16.vlgmr.msra.gmra.mrb[32].mxu1 %vm1373_vm2, %v1605_v12 }
 0x47f   : > { %2649 = vmatprep.mubr.msk.bf16.mxu1 %vm2856_vm1, %v2855_v9  ;;  %2648 = vmatpush3.bf16.msra.mxu1 %v1846_v14 }
 0x480   : > { %2659 = vmatprep.subr.bf16.mxu1 %v2855_v9 }
 0x529   : > { %v1647_v18 = vpop.f32.mrb[36].mxu0 }
 0x52a   : > { %v1791_v19 = vpack.c.bf16 %v1647_v18, %v1647_v18  ;;  %v2621_v20 = vpop.f32.mrb[37].mxu0 }
 0x52b   : > { %v1650_v22 = vpop.f32.mrb[38].mxu0  ;;  %v2763_v20 = vld [vmem:[%s3416_s15 + $0x10] sm:$0xff]  }
 0x52c   : > { %v2622_v23 = vpop.f32.mrb[39].mxu0  ;;  %2650 = vmatmul.mubr.msk.bf16.vlgmr.msra.gmra.mrb[36].mxu1 %vm1373_vm2, %v1791_v19  ;;  %v2762_v19 = vld [vmem:[%s3416_s15 + $0x8] sm:$0xff]   ;;  %v2765_v22 = vld [vmem:[%s3416_s15 + $0x20] sm:$0xff]  }
 0x52d   : > { %2660 = vmatpush3.bf16.msra.mxu1 %v1945_v21  ;;  %2661 = vmatprep.mubr.msk.bf16.mxu1 %vm2856_vm1, %v2855_v9  ;;  %v2764_v21 = vld [vmem:[%s3416_s15 + $0x18] sm:$0xff]   ;;  %v2766_v23 = vld [vmem:[%s3416_s15 + $0x28] sm:$0xff]  }
 0x52e   : > { %2673 = vmatprep.subr.bf16.mxu1 %v2855_v9 }
 0x539   : > { %v1693_v25 = vpop.f32.mrb[28].mxu1 }
 0x53a   : > { %v1793_v26 = vpack.c.bf16 %v1693_v25, %v1693_v25  ;;  %v1739_v27 = vpop.f32.mrb[40].mxu0  ;;  %v2627_v28 = vpop.f32.mrb[29].mxu1  ;;  %v2768_v25 = vld [vmem:[%s3416_s15 + $0x38] sm:$0xff]  }
 0x53b   : > { %v2633_v30 = vpop.f32.mrb[41].mxu0  ;;  %v1696_v31 = vpop.f32.mrb[30].mxu1  ;;  %v1888_v36 = vpack.c.bf16 %v1739_v27, %v1739_v27 }
 0x53c   : > { %v1742_v32 = vpop.f32.mrb[42].mxu0  ;;  %v2628_v34 = vpop.f32.mrb[31].mxu1  ;;  %2644 = vmatmul.mubr.msk.bf16.vlgmr.msra.gmra.mrb[44].mxu0 %vm1373_vm2, %v1793_v26  ;;  %v2408_v26 = vld [vmem:[%s3415_s14] ss:$0 sm:$0xff] }
 0x53d   : > { %v2634_v35 = vpop.f32.mrb[43].mxu0  ;;  %2654 = vmatpush3.bf16.msra.mxu0 %v1895_v29  ;;  %2655 = vmatprep.mubr.msk.bf16.mxu0 %vm2856_vm1, %v2855_v9 }
 0x53e   : > { %2665 = vmatprep.subr.bf16.mxu0 %v2855_v9 }
 0x544   : > { %2656 = vmatmul.mubr.msk.bf16.vlgmr.msra.gmra.mrb[48].mxu0 %vm1373_vm2, %v1888_v36 }
 0x545   : > { %2669 = vmatprep.mubr.msk.bf16.mxu0 %vm2856_vm1, %v2855_v9  ;;  %2666 = vmatpush3.bf16.msra.mxu0 %v2759_v7 }
 0x546   : > { %2667 = vmatprep.subr.bf16.mxu0 %v2855_v9 }
 0x551   : > { %v1785_v37 = vpop.f32.mrb[32].mxu1 }
 0x552   : > { %v1938_v38 = vpack.c.bf16 %v1785_v37, %v1785_v37  ;;  %v2639_v39 = vpop.f32.mrb[33].mxu1 }
 0x553   : > { %v1788_v40 = vpop.f32.mrb[34].mxu1 }
 0x554   : > { %v2640_v41 = vpop.f32.mrb[35].mxu1  ;;  %2662 = vmatmul.mubr.msk.bf16.vlgmr.msra.gmra.mrb[40].mxu1 %vm1373_vm2, %v1938_v38 }
 0x555   : > { %2689 = vmatprep.mubr.msk.bf16.mxu1 %vm2856_vm1, %v2855_v9  ;;  %2674 = vmatpush3.bf16.msra.mxu1 %v2761_v8 }
 0x556   : > { %2675 = vmatprep.subr.bf16.mxu1 %v2855_v9 }
 0x559   : > { %2676 = vmatpush3.bf16.msra.mxu1 %v2762_v19 }
 0x55a   : > { %2677 = vmatprep.subr.bf16.mxu1 %v2855_v9 }
 0x55d   : > { %2678 = vmatpush3.bf16.msra.mxu1 %v2763_v20 }
 0x55e   : > { %2679 = vmatprep.subr.bf16.mxu1 %v2855_v9 }
 0x561   : > { %2680 = vmatpush3.bf16.msra.mxu1 %v2764_v21 }
 0x562   : > { %2681 = vmatprep.subr.bf16.mxu1 %v2855_v9 }
 0x565   : > { %2682 = vmatpush3.bf16.msra.mxu1 %v2765_v22 }
 0x566   : > { %2683 = vmatprep.subr.bf16.mxu1 %v2855_v9 }
 0x569   : > { %2684 = vmatpush3.bf16.msra.mxu1 %v2766_v23 }
 0x56a   : > { %2685 = vmatprep.subr.bf16.mxu1 %v2855_v9 }
 0x56d   : > { %2686 = vmatpush3.bf16.msra.mxu1 %v2767_v24 }
 0x56e   : > { %2687 = vmatprep.subr.bf16.mxu1 %v2855_v9 }
 0x571   : > { %2688 = vmatpush3.bf16.msra.mxu1 %v2768_v25 }
 0x5ff   : > { %v1882_v42 = vpop.f32.mrb[36].mxu1 }
 0x600   : > { %v2651_v44 = vpop.f32.mrb[37].mxu1 }
 0x601   : > { %v1885_v45 = vpop.f32.mrb[38].mxu1 }
 0x602   : > { %v2652_v46 = vpop.f32.mrb[39].mxu1 }
 0x60f   : > { %v1836_v47 = vpop.f32.mrb[44].mxu0 }
 0x610   : > { %v1883_v48 = vadd.f32 %v1882_v42, %v1836_v47  ;;  %v2645_v49 = vpop.f32.mrb[45].mxu0  ;;  %v2412_v42 = vld [vmem:[%s3417_s16] ss:$0 sm:$0xff] }
 0x611   : > { %v1839_v50 = vpop.f32.mrb[46].mxu0 }
 0x612   : > { %v2646_v51 = vpop.f32.mrb[47].mxu0 }
 0x617   : > { %v1931_v53 = vpop.f32.mrb[48].mxu0 }
 0x618   : > { %v1937_v54 = vadd.f32 %v1931_v53, %v1883_v48  ;;  %v2657_v55 = vpop.f32.mrb[49].mxu0 }
 0x619   : > { %v1934_v56 = vpop.f32.mrb[50].mxu0 }
 0x61a   : > { %v2658_v57 = vpop.f32.mrb[51].mxu0 }
 0x627   : > { %v1981_v58 = vpop.f32.mrb[40].mxu1 }
 0x628   : > { %v1987_v60 = vadd.f32 %v1981_v58, %v1937_v54  ;;  %v2663_v61 = vpop.f32.mrb[41].mxu1 }
 0x629   : > { %v1984_v62 = vpop.f32.mrb[42].mxu1 }
 0x62a   : > { %v1995_v63 = vadd.f32 %v2405_v59, %v1987_v60  ;;  %v2664_v43 = vpop.f32.mrb[43].mxu1 }
 0x62c   : > { %v3295_v1 = vadd.f32 %v1995_v63, %v3002_v0  ;;  %v2760_v0 = vld [vmem:[%s3414_s13 + $0x8] sm:$0xff]  }
 0x62d   : > { %2668 = vmatpush3.bf16.msra.mxu0 %v2760_v0 }
 0x62e   : > { %v1999_v2 = vsel %vm548_vm0, %v3295_v1, 0.0 }
 0x62f   : > { %2000 = vadd.xlane.f32.xlu0 %v1999_v2 }
 0x6bc   : > { %v2001_v52 = vpop.xlane.xlu0 %2000 }
 0x6bd   : > { %v2002_v3 = vmul.f32 0.03125, %v2001_v52 }
 0x6bf   : > { %v2003_v4 = vsub.f32 %v3295_v1, %v2002_v3 }
 0x6c1   : > { %v2004_v5 = vmul.f32 %v2003_v4, %v2003_v4 }
 0x6c3   : > { %v2005_v6 = vsel %vm548_vm0, %v2004_v5, 0.0 }
 0x6c4   : > { %2006 = vadd.xlane.f32.xlu1 %v2005_v6 }
 0x751   : > { %v2007_v33 = vpop.xlane.xlu1 %2006 }
 0x752   : > { %v2008_v10 = vmul.f32 0.03125, %v2007_v33 }
 0x754   : > { %v2009_v11 = vadd.f32 1e-05, %v2008_v10 }
 0x756   : > { %2787 = vrsqrt.f32 %v2009_v11 }
 0x760   : > { %v2788_v12 = vpop.eup %2787 }
 0x761   : > { %v2011_v14 = vmul.f32 %v2788_v12, %v2003_v4 }
 0x763   : > { %v2018_v16 = vmul.f32 %v2406_v13, %v2011_v14 }
 0x765   : > { %v2025_v17 = vadd.f32 %v2407_v15, %v2018_v16 }
 0x767   : > { %v2026_v18 = vpack.c.bf16 %v2025_v17, %v2025_v17 }
 0x769   : > { %2670 = vmatmul.mubr.msk.bf16.vlgmr.msra.gmra.mrb[52].mxu0 %vm548_vm0, %v2026_v18 }
 0x83c   : > { %v2087_v27 = vpop.f32.mrb[52].mxu0 }
 0x83d   : > { %v2088_v28 = vadd.f32 %v2408_v26, %v2087_v27  ;;  %v2671_v29 = vpop.f32.mrb[53].mxu0 }
 0x83e   : > { %v2090_v30 = vpop.f32.mrb[54].mxu0 }
 0x83f   : > { %v2094_v31 = vmul.f32 0.044715, %v2088_v28  ;;  %v2672_v32 = vpop.f32.mrb[55].mxu0  ;;  %v2093_v9 = vmul.f32 0.5, %v2088_v28 }
 0x841   : > { %v2095_v34 = vmul.f32 %v2094_v31, %v2088_v28 }
 0x843   : > { %v2096_v35 = vmul.f32 %v2095_v34, %v2088_v28 }
 0x845   : > { %v2097_v36 = vadd.f32 %v2096_v35, %v2088_v28 }
 0x847   : > { %v2098_v37 = vmul.f32 0.7978846, %v2097_v36 }
 0x849   : > { %2789 = vtanh.f32 %v2098_v37 }
 0x853   : > { %v2790_v38 = vpop.eup %2789 }
 0x854   : > { %v2100_v39 = vadd.f32 1.0, %v2790_v38 }
 0x856   : > { %v2101_v40 = vmul.f32 %v2100_v39, %v2093_v9 }
 0x858   : > { %v2102_v41 = vpack.c.bf16 %v2101_v40, %v2101_v40 }
 0x85a   : > { %2690 = vmatmul.mubr.bf16.vlgmr.msra.gmra.mrb[44].mxu1 %v2102_v41 }
 0x92d   : > { %v2208_v44 = vpop.f32.mrb[44].mxu1 }
 0x92e   : > { %v2209_v45 = vadd.f32 %v2412_v42, %v2208_v44  ;;  %v2691_v46 = vpop.f32.mrb[45].mxu1 }
 0x92f   : > { %v2211_v47 = vpop.f32.mrb[46].mxu1 }
 0x930   : > { %v2214_v48 = vadd.f32 %v2209_v45, %v3295_v1  ;;  %v2692_v49 = vpop.f32.mrb[47].mxu1 }
 0x932   : > { %2215 = vst.msk [vmem:[%s539_s22] sm:$0xff] %vm548_vm0, %v2214_v48 }
 0x933   : > { %2804 = shalt.err (!%p2801_p3)
}
 0x934   : > { %s2805_s30 = scalar_lea.hbm %s3358_s2, 128  ;;  %s2809_s26 = scalar_lea.hbm %s3418_s17, 256 }
 0x935   : > { %p2806_p4 = scmp.ne.s32.totalorder %s3358_s2, %s2805_s30  ;;  %p2810_p9 = scmp.lt.u32.totalorder %s3358_s2, %s3418_s17 }
 0x936   : > { %p2811_p10 = scmp.lt.u32.totalorder %s2809_s26, %s2805_s30  ;;  %p2813_p12 = scmp.lt.u32.totalorder %s2805_s30, %s3358_s2 }
 0x937   : > { %p2807_p7 = pnand %p2806_p4, %p2987_p5 }
 0x938   : > { %p2812_p11 = por %p2811_p10, %p2810_p9 }
 0x939   : > { %p2808_p8 = pneg %p2807_p7 }
 0x93a   : > { %p2814_p13 = por %p2813_p12, %p2812_p11 }
 0x93c   : > { %p2815_p0 = pnand %p2814_p13, %p2808_p8 }
 0x93e   : > { %2818 = shalt.err (!%p2815_p0)
}
 0x93f   : > { %2693 = dma.vmem_to_hbm [thread:$0]  (%p2987_p5), %s3360_s29, 128, %s3358_s2, %s2217_s28  }
 0x940 PF: > { %p2699_p1 = scmp.ge.s32.totalorder %s2853_s27, 2  ;;  %s2242_s3 = sand.u32 1, %s2841_s24  }
 0x941   : > { %s2243_s19 = scalar_lea.sflag [#allocation3], %s2242_s3 }
 0x942   : > { %p2696_p2 = pnand %p2699_p1, %p2991_p6 }
 0x944   : > { %2836 = dma.done.wait (!%p2696_p2), %s2243_s19, 128  }
 0x945   : > { %2838 = vsyncadd (!%p2696_p2), %s2243_s19, 4294967168  ;;  %s3435_s27 = sld [smem:[#allocation6_spill]]  ;;  %s3436_s21 = sld [smem:[#allocation5_spill]] }
 0x946   : > { %s3437_s26 = sld [smem:[#allocation7_spill]]  ;;  %s3438_s24 = smov %s2845_s25 }
 0x94b   : > { %p27_p3 = scmp.ge.s32.totalorder %s3435_s27, 4   ;;  %s3439_s25 = smov %s3436_s21 }
 0x94d   :  { %29 = sbr.rel (!%p27_p3) target bundleno = 8 (0x8), region = 144 }
 0x954   :  { %2248 = vsyncpa [#allocation3], 1 }
 0x955   :  { %2250 = vsyncpa [#allocation3 + $0x1], 1 }

// kernel: tpu_custom_call.1
= control target key start
LH: loop header
LB: loop body
LE: loop exit
PB: predicated region body
PF: predicated region fallthrough
CT: control target
= control target key end

     0   :  { %s3401_s0 = inlined_call_operand.vmem [shape: f32[2,8,32], index: 0, kind: input, shape index: {}]   ;;  %s3402_s1 = inlined_call_operand.vmem [shape: f32[1,32], index: 1, kind: input, shape index: {}]   ;;  %s3403_s2 = inlined_call_operand.vmem [shape: f32[1,32], index: 2, kind: input, shape index: {}]   ;;  %s3404_s3 = inlined_call_operand.vmem [shape: bf16[4,32,8], index: 3, kind: input, shape index: {}]   ;;  %s3405_s4 = inlined_call_operand.vmem [shape: bf16[4,32,8], index: 4, kind: input, shape index: {}]   ;;  %s3406_s5 = inlined_call_operand.vmem [shape: bf16[4,32,8], index: 5, kind: input, shape index: {}]   ;;  %s3407_s6 = inlined_call_operand.vmem [shape: f32[4,1,8], index: 6, kind: input, shape index: {}]   ;;  %s3408_s7 = inlined_call_operand.vmem [shape: f32[4,1,8], index: 7, kind: input, shape index: {}]   ;;  %s3409_s8 = inlined_call_operand.vmem [shape: f32[4,1,8], index: 8, kind: input, shape index: {}]   ;;  %s3410_s9 = inlined_call_operand.vmem [shape: bf16[4,8,32], index: 9, kind: input, shape index: {}]   ;;  %s3411_s10 = inlined_call_operand.vmem [shape: f32[1,32], index: 10, kind: input, shape index: {}]   ;;  %s3412_s11 = inlined_call_operand.vmem [shape: f32[1,32], index: 11, kind: input, shape index: {}]   ;;  %s3413_s12 = inlined_call_operand.vmem [shape: f32[1,32], index: 12, kind: input, shape index: {}]   ;;  %s3414_s13 = inlined_call_operand.vmem [shape: bf16[32,128], index: 13, kind: input, shape index: {}]   ;;  %s3415_s14 = inlined_call_operand.vmem [shape: f32[1,128], index: 14, kind: input, shape index: {}]   ;;  %s3416_s15 = inlined_call_operand.vmem [shape: bf16[128,32], index: 15, kind: input, shape index: {}]   ;;  %s3417_s16 = inlined_call_operand.vmem [shape: f32[1,32], index: 16, kind: input, shape index: {}]   ;;  %s3418_s17 = inlined_call_operand.hbm [shape: f32[2,8,32], index: 17, kind: output, shape index: {}]  }
   0x1   :  { %3422 = sst [smem:[#allocation8_spill]] %s3401_s0 }
   0x2   :  { %3423 = sst [smem:[#allocation9_spill]] %s3402_s1 }
   0x3   :  { %3424 = sst [smem:[#allocation10_spill]] %s3403_s2 }
   0x4   :  { %3425 = sst [smem:[#allocation11_spill]] %s3404_s3 }
   0x5   :  { %22 = vsyncpa [#allocation3], 0 }
   0x6   :  { %24 = vsyncpa [#allocation3 + $0x1], 0  ;;  %s2949_s24 = smov 0   ;;  %s2951_s25 = smov 0  }
   0x7   :  { %s2953_s26 = smov 0   ;;  %s2955_s27 = smov 0  }
   0x8 LB: > { %3426 = sst [smem:[#allocation5_spill]] %s2849_s26  ;;  %s2970_s28 = sadd.s32 4294967295, %s2853_s27   ;;  %s2853_s27 = sphi %s2955_s27, %s3435_s27   ;;  %s2849_s26 = sphi %s2953_s26, %s3437_s26   ;;  %s2845_s25 = sphi %s2951_s25, %s3439_s25   ;;  %s2841_s24 = sphi %s2949_s24, %s3438_s24  }
   0x9   : > { %s2289_s29 = sadd.s32 4294967294, %s2853_s27   ;;  %s2974_s0 = sadd.s32 1, %s2853_s27  }
   0xa   : > { %3427 = sst [smem:[#allocation6_spill]] %s2974_s0  ;;  %s399_s30 = sadd.s32 1, %s2849_s26 }
   0xb   : > { %s396_s18 = ssub.s32 %s2853_s27, %s2974_s0  ;;  %p409_p0 = scmp.ne.s32.totalorder %s2849_s26, %s2845_s25 }
   0xc   : > { %p397_p1 = scmp.eq.s32.totalorder %s396_s18, 0  ;;  %p410_p2 = scmp.eq.s32.totalorder %s2970_s28, 1 }
   0xd   : > { %p415_p3 = scmp.ne.s32.totalorder %s2845_s25, %s2841_s24  ;;  %p416_p4 = scmp.eq.s32.totalorder %s2289_s29, 1 }
   0xe   : > { %s2985_s19 = scalar_select %p397_p1, %s2849_s26, %s399_s30  }
   0xf   : > { %p2987_p5 = por %p410_p2, %p409_p0  ;;  %p2991_p6 = por %p416_p4, %p415_p3 }
  0x10   : > { %3428 = sst [smem:[#allocation7_spill]] %s2985_s19  ;;  %p2292_p7 = scmp.ge.s32.totalorder %s2853_s27, 1 }
  0x11   : > { %p489_p8 = scmp.lt.s32.totalorder %s2853_s27, 3 }
  0x13   : > { %p490_p9 = pnand %p2292_p7, %p489_p8 }
  0x14   : > { %p540_p10 = scmp.lt.s32.totalorder (!%p490_p9), %s2970_s28, 1  ;;  %vm548_vm0 = vcmask (!%p490_p9), 261120   ;;  %s3431_s30 = sld [smem:[#allocation8_spill]] (!%p490_p9)  ;;  %v2855_v9 = vmov (!%p490_p9), 0.0   ;;  %vm2856_vm1 = vmmov (!%p490_p9), 0   ;;  %v2739_v21 = vld [vmem:[%s3405_s4] sm:$0xff] (!%p490_p9)  }
  0x15   : > { %493 = sbr.rel (%p490_p9) target bundleno = 2368 (0x940), region = 88  ;;  %s3432_s3 = sld [smem:[#allocation11_spill]] (!%p490_p9)  ;;  %2497 = vmatprep.subr.bf16.mxu0 (!%p490_p9), %v2855_v9  ;;  %2521 = vmatprep.subr.bf16.mxu1 (!%p490_p9), %v2855_v9  ;;  %v2740_v22 = vld [vmem:[%s3406_s5 + $0x10] sm:$0xff] (!%p490_p9)   ;;  %v2741_v24 = vld [vmem:[%s3405_s4 + $0x8] sm:$0xff] (!%p490_p9)   ;;  %v2742_v25 = vld [vmem:[%s3406_s5 + $0x18] sm:$0xff] (!%p490_p9)   ;;  %vm1373_vm2 = vcmask (!%p490_p9), 64512  }
  0x16   : > { %2501 = vmatprep.mubr.msk.bf16.mxu0 (!%p490_p9), %vm2856_vm1, %v2855_v9  ;;  %2525 = vmatprep.mubr.msk.bf16.mxu1 (!%p490_p9), %vm2856_vm1, %v2855_v9  ;;  %s3434_s2 = sld [smem:[#allocation10_spill]] (!%p490_p9)  ;;  %v2743_v26 = vld [vmem:[%s3406_s5] sm:$0xff] (!%p490_p9)   ;;  %v2745_v28 = vld [vmem:[%s3406_s5 + $0x8] sm:$0xff] (!%p490_p9)   ;;  %v2747_v30 = vld [vmem:[%s3405_s4 + $0x10] sm:$0xff] (!%p490_p9)   ;;  %vm1609_vm3 = vcmask (!%p490_p9), 1043456   ;;  %s2422_s23 = sshll.u32 (!%p490_p9), %s2970_s28, 7 }
  0x17   : > { %v2744_v27 = vld [vmem:[%s3405_s4 + $0x20] sm:$0xff] (!%p490_p9)   ;;  %v2746_v29 = vld [vmem:[%s3405_s4 + $0x28] sm:$0xff] (!%p490_p9)   ;;  %v2749_v32 = vld [vmem:[%s3405_s4 + $0x18] sm:$0xff] (!%p490_p9)  }
  0x18   : > { %v2752_v35 = vld [vmem:[%s3406_s5 + $0x30] sm:$0xff] (!%p490_p9)   ;;  %v2754_v37 = vld [vmem:[%s3406_s5 + $0x38] sm:$0xff] (!%p490_p9)   ;;  %v2755_v38 = vld [vmem:[%s3406_s5 + $0x20] sm:$0xff] (!%p490_p9)  }
  0x19   : > { %v2756_v39 = vld [vmem:[%s3406_s5 + $0x28] sm:$0xff] (!%p490_p9)   ;;  %v2757_v40 = vld [vmem:[%s3405_s4 + $0x30] sm:$0xff] (!%p490_p9)   ;;  %v2758_v41 = vld [vmem:[%s3405_s4 + $0x38] sm:$0xff] (!%p490_p9)  }
  0x1a   : > { %v2301_v50 = vld [vmem:[%s3408_s7] ss:$0 sm:$0xff] (!%p490_p9)  ;;  %v2350_v63 = vld [vmem:[%s3408_s7 + $0x2] ss:$0 sm:$0xff] (!%p490_p9) }
  0x1b   : > { %v2735_v7 = vld [vmem:[%s3432_s3] sm:$0xff] (!%p490_p9)   ;;  %v2736_v8 = vld [vmem:[%s3432_s3 + $0x10] sm:$0xff] (!%p490_p9)   ;;  %v2737_v10 = vld [vmem:[%s3432_s3 + $0x8] sm:$0xff] (!%p490_p9)  }
  0x1c   : > { %s541_s21 = scalar_select %p540_p10, %s2970_s28, 1  ;;  %2498 = vmatpush3.bf16.msra.mxu0 %v2735_v7  ;;  %2522 = vmatpush3.bf16.msra.mxu1 %v2736_v8  ;;  %v2738_v11 = vld [vmem:[%s3432_s3 + $0x18] sm:$0xff]   ;;  %v2296_v18 = vld [vmem:[%s3434_s2] ss:$0 sm:$0xff]  ;;  %v2748_v31 = vld [vmem:[%s3432_s3 + $0x30] sm:$0xff]  }
  0x1d   : > { %2499 = vmatprep.subr.bf16.mxu0 %v2855_v9  ;;  %2523 = vmatprep.subr.bf16.mxu1 %v2855_v9  ;;  %v2750_v33 = vld [vmem:[%s3432_s3 + $0x38] sm:$0xff]   ;;  %v2751_v34 = vld [vmem:[%s3432_s3 + $0x20] sm:$0xff]   ;;  %v2753_v36 = vld [vmem:[%s3432_s3 + $0x28] sm:$0xff]   ;;  %s3358_s2 = scalar_lea.hbm %s3418_s17, %s2422_s23 }
  0x1e   : > { %s2294_s22 = sshll.u32 %s541_s21, 3  ;;  %v2297_v61 = vld [vmem:[%s3407_s6] ss:$0 sm:$0xff] }
  0x1f   : > { %s543_s18 = scalar_lea.vmem %s3431_s30, %s2294_s22  ;;  %s3433_s22 = sld [smem:[#allocation9_spill]] }
  0x20   : > { %v3002_v0 = vld [vmem:[%s543_s18] sm:$0xff]  ;;  %2500 = vmatpush3.bf16.msra.mxu0 %v2737_v10  ;;  %2524 = vmatpush3.bf16.msra.mxu1 %v2738_v11  ;;  %s537_s30 = sand.u32 1, %s2845_s25   ;;  %s2858_s18 = smov [#allocation2]  }
  0x21   : > { %v549_v1 = vsel %vm548_vm0, %v3002_v0, 0.0  ;;  %2505 = vmatprep.subr.bf16.mxu0 %v2855_v9  ;;  %2537 = vmatprep.subr.bf16.mxu1 %v2855_v9  ;;  %s2293_s19 = sshll.u32 %s537_s30, 3  ;;  %s2217_s28 = scalar_lea.sflag [#allocation3], %s537_s30 }
  0x22   : > { %550 = vadd.xlane.f32.xlu0 %v549_v1  ;;  %s2795_s21 = sshll.u32 %s2858_s18, 4  ;;  %s2796_s21 = int_to_ptr.vmem [resolvable:$false] %s2795_s21 }
  0x23   : > { %s2797_s3 = scalar_lea.vmem %s2796_s21, 256 }
  0x25   : > { %v2295_v16 = vld [vmem:[%s3433_s22] ss:$0 sm:$0xff]  ;;  %s539_s22 = scalar_lea.vmem [#allocation2], %s2293_s19 }
  0x26   : > { %s2230_s29 = sshll.u32 %s539_s22, 4  ;;  %s3360_s29 = int_to_ptr.vmem [resolvable:$true] %s2230_s29 }
  0x27   : > { %s2791_s19 = scalar_lea.vmem %s3360_s29, 128  ;;  %p2798_p0 = scmp.lt.s32.totalorder %s3360_s29, %s2796_s21 }
  0x28   : > { %p2792_p11 = scmp.ne.s32.totalorder %s3360_s29, %s2791_s19  ;;  %p2799_p1 = scmp.lt.s32.totalorder %s2797_s3, %s2791_s19 }
  0x2a   : > { %p2793_p12 = pnand %p2792_p11, %p2987_p5  ;;  %p2800_p2 = por %p2799_p1, %p2798_p0 }
  0x2c   : > { %p2794_p13 = pneg %p2793_p12 }
  0x2e   : > { %p2801_p3 = pnand %p2800_p2, %p2794_p13 }
  0xaf   : > { %v551_v2 = vpop.xlane.xlu0 %550 }
  0xb0   : > { %v553_v3 = vmul.f32 0.03125, %v551_v2 }
  0xb2   : > { %v554_v4 = vsub.f32 %v3002_v0, %v553_v3 }
  0xb4   : > { %v555_v5 = vmul.f32 %v554_v4, %v554_v4 }
  0xb6   : > { %v556_v6 = vsel %vm548_vm0, %v555_v5, 0.0 }
  0xb7   : > { %557 = vadd.xlane.f32.xlu0 %v556_v6 }
 0x144   : > { %v558_v12 = vpop.xlane.xlu0 %557 }
 0x145   : > { %v559_v13 = vmul.f32 0.03125, %v558_v12 }
 0x147   : > { %v560_v14 = vadd.f32 1e-05, %v559_v13 }
 0x149   : > { %2769 = vrsqrt.f32 %v560_v14 }
 0x153   : > { %v2770_v15 = vpop.eup %2769 }
 0x154   : > { %v562_v17 = vmul.f32 %v2770_v15, %v554_v4  ;;  %v2323_v15 = vld [vmem:[%s3408_s7 + $0x1] ss:$0 sm:$0xff] }
 0x156   : > { %v569_v19 = vmul.f32 %v2295_v16, %v562_v17 }
 0x158   : > { %v576_v20 = vadd.f32 %v2296_v18, %v569_v19 }
 0x15a   : > { %v3042_v23 = vpack.c.bf16 %v576_v20, %v576_v20 }
 0x15c   : > { %2502 = vmatmul.mubr.msk.bf16.vlgmr.msra.gmra.mrb[0].mxu0 %vm548_vm0, %v3042_v23  ;;  %2526 = vmatmul.mubr.msk.bf16.vlgmr.msra.gmra.mrb[0].mxu1 %vm548_vm0, %v3042_v23 }
 0x15d   : > { %2506 = vmatpush3.bf16.msra.mxu0 %v2739_v21  ;;  %2538 = vmatpush3.bf16.msra.mxu1 %v2740_v22  ;;  %v2305_v21 = vld [vmem:[%s3409_s8] ss:$0 sm:$0xff] }
 0x15e   : > { %2507 = vmatprep.subr.bf16.mxu0 %v2855_v9  ;;  %2539 = vmatprep.subr.bf16.mxu1 %v2855_v9 }
 0x15f   : > { %2509 = vmatprep.mubr.msk.bf16.mxu0 %vm2856_vm1, %v2855_v9  ;;  %2541 = vmatprep.mubr.msk.bf16.mxu1 %vm2856_vm1, %v2855_v9 }
 0x161   : > { %2508 = vmatpush3.bf16.msra.mxu0 %v2741_v24  ;;  %2540 = vmatpush3.bf16.msra.mxu1 %v2742_v25 }
 0x162   : > { %2513 = vmatprep.subr.bf16.mxu0 %v2855_v9  ;;  %2553 = vmatprep.subr.bf16.mxu1 %v2855_v9 }
 0x164   : > { %2510 = vmatmul.mubr.msk.bf16.vlgmr.msra.gmra.mrb[4].mxu0 %vm548_vm0, %v3042_v23  ;;  %2542 = vmatmul.mubr.msk.bf16.vlgmr.msra.gmra.mrb[4].mxu1 %vm548_vm0, %v3042_v23 }
 0x165   : > { %2514 = vmatpush3.bf16.msra.mxu0 %v2743_v26  ;;  %2554 = vmatpush3.bf16.msra.mxu1 %v2744_v27  ;;  %v2314_v27 = vld [vmem:[%s3407_s6 + $0x1] ss:$0 sm:$0xff] }
 0x166   : > { %2515 = vmatprep.subr.bf16.mxu0 %v2855_v9  ;;  %2555 = vmatprep.subr.bf16.mxu1 %v2855_v9 }
 0x167   : > { %2517 = vmatprep.mubr.msk.bf16.mxu0 %vm2856_vm1, %v2855_v9  ;;  %2557 = vmatprep.mubr.msk.bf16.mxu1 %vm2856_vm1, %v2855_v9 }
 0x169   : > { %2516 = vmatpush3.bf16.msra.mxu0 %v2745_v28  ;;  %2556 = vmatpush3.bf16.msra.mxu1 %v2746_v29 }
 0x16a   : > { %2529 = vmatprep.subr.bf16.mxu0 %v2855_v9  ;;  %2569 = vmatprep.subr.bf16.mxu1 %v2855_v9 }
 0x16c   : > { %2518 = vmatmul.mubr.msk.bf16.vlgmr.msra.gmra.mrb[8].mxu0 %vm548_vm0, %v3042_v23  ;;  %2558 = vmatmul.mubr.msk.bf16.vlgmr.msra.gmra.mrb[8].mxu1 %vm548_vm0, %v3042_v23 }
 0x16d   : > { %2530 = vmatpush3.bf16.msra.mxu0 %v2747_v30  ;;  %2570 = vmatpush3.bf16.msra.mxu1 %v2748_v31  ;;  %v2341_v30 = vld [vmem:[%s3407_s6 + $0x2] ss:$0 sm:$0xff] }
 0x16e   : > { %2531 = vmatprep.subr.bf16.mxu0 %v2855_v9  ;;  %2571 = vmatprep.subr.bf16.mxu1 %v2855_v9 }
 0x16f   : > { %2533 = vmatprep.mubr.msk.bf16.mxu0 %vm2856_vm1, %v2855_v9  ;;  %2573 = vmatprep.mubr.msk.bf16.mxu1 %vm2856_vm1, %v2855_v9 }
 0x171   : > { %2532 = vmatpush3.bf16.msra.mxu0 %v2749_v32  ;;  %2572 = vmatpush3.bf16.msra.mxu1 %v2750_v33 }
 0x172   : > { %2545 = vmatprep.subr.bf16.mxu0 %v2855_v9  ;;  %2585 = vmatprep.subr.bf16.mxu1 %v2855_v9 }
 0x174   : > { %2534 = vmatmul.mubr.msk.bf16.vlgmr.msra.gmra.mrb[12].mxu0 %vm548_vm0, %v3042_v23  ;;  %2574 = vmatmul.mubr.msk.bf16.vlgmr.msra.gmra.mrb[12].mxu1 %vm548_vm0, %v3042_v23 }
 0x175   : > { %2546 = vmatpush3.bf16.msra.mxu0 %v2751_v34  ;;  %2586 = vmatpush3.bf16.msra.mxu1 %v2752_v35 }
 0x176   : > { %2547 = vmatprep.subr.bf16.mxu0 %v2855_v9  ;;  %2587 = vmatprep.subr.bf16.mxu1 %v2855_v9 }
 0x177   : > { %2549 = vmatprep.mubr.msk.bf16.mxu0 %vm2856_vm1, %v2855_v9  ;;  %2589 = vmatprep.mubr.msk.bf16.mxu1 %vm2856_vm1, %v2855_v9 }
 0x179   : > { %2548 = vmatpush3.bf16.msra.mxu0 %v2753_v36  ;;  %2588 = vmatpush3.bf16.msra.mxu1 %v2754_v37 }
 0x17a   : > { %2561 = vmatprep.subr.bf16.mxu0 %v2855_v9  ;;  %2599 = vmatprep.subr.bf16.mxu1 %v2855_v9 }
 0x17c   : > { %2550 = vmatmul.mubr.msk.bf16.vlgmr.msra.gmra.mrb[16].mxu0 %vm548_vm0, %v3042_v23  ;;  %2590 = vmatmul.mubr.msk.bf16.vlgmr.msra.gmra.mrb[16].mxu1 %vm548_vm0, %v3042_v23 }
 0x17d   : > { %2562 = vmatpush3.bf16.msra.mxu0 %v2755_v38  ;;  %2565 = vmatprep.mubr.msk.bf16.mxu0 %vm2856_vm1, %v2855_v9 }
 0x17e   : > { %2563 = vmatprep.subr.bf16.mxu0 %v2855_v9  ;;  %2601 = vmatprep.mubr.msk.bf16.mxu1 %vm2856_vm1, %v2855_v9 }
 0x181   : > { %2564 = vmatpush3.bf16.msra.mxu0 %v2756_v39 }
 0x182   : > { %2577 = vmatprep.subr.bf16.mxu0 %v2855_v9 }
 0x184   : > { %2566 = vmatmul.mubr.msk.bf16.vlgmr.msra.gmra.mrb[20].mxu0 %vm548_vm0, %v3042_v23 }
 0x185   : > { %2578 = vmatpush3.bf16.msra.mxu0 %v2757_v40  ;;  %2581 = vmatprep.mubr.msk.bf16.mxu0 %vm2856_vm1, %v2855_v9 }
 0x186   : > { %2579 = vmatprep.subr.bf16.mxu0 %v2855_v9 }
 0x189   : > { %2580 = vmatpush3.bf16.msra.mxu0 %v2758_v41 }
 0x18a   : > { %2593 = vmatprep.subr.bf16.mxu0 %v2855_v9 }
 0x18c   : > { %2582 = vmatmul.mubr.msk.bf16.vlgmr.msra.gmra.mrb[24].mxu0 %vm548_vm0, %v3042_v23 }
 0x18d   : > { %2595 = vmatprep.mubr.msk.bf16.mxu0 %vm2856_vm1, %v2855_v9 }
 0x22f   : > { %v638_v42 = vpop.f32.mrb[0].mxu0  ;;  %v829_v43 = vpop.f32.mrb[0].mxu1 }
 0x230   : > { %v2503_v44 = vpop.f32.mrb[1].mxu0  ;;  %v2527_v45 = vpop.f32.mrb[1].mxu1  ;;  %v639_v1 = vadd.f32 %v2297_v61, %v638_v42  ;;  %v830_v31 = vadd.f32 %v2314_v27, %v829_v43 }
 0x231   : > { %v641_v46 = vpop.f32.mrb[2].mxu0  ;;  %v832_v47 = vpop.f32.mrb[2].mxu1 }
 0x232   : > { %v2504_v48 = vpop.f32.mrb[3].mxu0  ;;  %v2528_v49 = vpop.f32.mrb[3].mxu1  ;;  %v1355_v10 = vpack.c.bf16 %v639_v1, %v639_v1  ;;  %v1356_v40 = vpack.c.bf16 %v830_v31, %v830_v31 }
 0x233   : > { %v2377_v49 = vld [vmem:[%s3408_s7 + $0x3] ss:$0 sm:$0xff] }
 0x237   : > { %v701_v51 = vpop.f32.mrb[4].mxu0  ;;  %v3169_v52 = vpop.f32.mrb[4].mxu1 }
 0x238   : > { %v702_v53 = vadd.f32 %v2301_v50, %v701_v51  ;;  %v2511_v54 = vpop.f32.mrb[5].mxu0  ;;  %v2543_v55 = vpop.f32.mrb[5].mxu1 }
 0x239   : > { %v704_v56 = vpop.f32.mrb[6].mxu0  ;;  %v962_v57 = vpop.f32.mrb[6].mxu1  ;;  %v2332_v54 = vld [vmem:[%s3409_s8 + $0x1] ss:$0 sm:$0xff] }
 0x23a   : > { %v1359_v58 = vpack.c.bf16 %v702_v53, %v702_v53  ;;  %v2512_v59 = vpop.f32.mrb[7].mxu0  ;;  %v2544_v60 = vpop.f32.mrb[7].mxu1 }
 0x23b   : > { %v960_v59 = vadd.f32 %v2332_v54, %v3169_v52 }
 0x23c   : > { %v1378_v62 = vsel %vm1373_vm2, %v1359_v58, 0  ;;  %v2368_v58 = vld [vmem:[%s3407_s6 + $0x3] ss:$0 sm:$0xff] }
 0x23d   : > { %2594 = vmatpush3.bf16.xpose.msra.mxu0 %v1378_v62  ;;  %v1364_v62 = vpack.c.bf16 %v960_v59, %v960_v59 }
 0x23e   : > { %2605 = vmatprep.subr.bf16.mxu0 %v2855_v9 }
 0x23f   : > { %v764_v2 = vpop.f32.mrb[8].mxu0  ;;  %v1089_v3 = vpop.f32.mrb[8].mxu1  ;;  %v1657_v1 = vsel %vm1609_vm3, %v1364_v62, 0 }
 0x240   : > { %v1090_v4 = vadd.f32 %v2350_v63, %v1089_v3  ;;  %v2519_v5 = vpop.f32.mrb[9].mxu0  ;;  %v2559_v6 = vpop.f32.mrb[9].mxu1  ;;  %v765_v28 = vadd.f32 %v2305_v21, %v764_v2  ;;  %v1367_v2 = vlaneseq }
 0x241   : > { %v767_v7 = vpop.f32.mrb[10].mxu0  ;;  %v1092_v8 = vpop.f32.mrb[10].mxu1 }
 0x242   : > { %v1361_v11 = vpack.c.bf16 %v1090_v4, %v1090_v4  ;;  %v2520_v12 = vpop.f32.mrb[11].mxu0  ;;  %v2560_v13 = vpop.f32.mrb[11].mxu1  ;;  %v1363_v34 = vpack.c.bf16 %v765_v28, %v765_v28  ;;  %v1368_v52 = vshrl.u32 %v1367_v2, 7  ;;  %v1370_v3 = vand.u32 127, %v1367_v2 }
 0x243   : > { %v2857_v4 = vmov -1e+30  }
 0x244   : > { %v1470_v14 = vsel %vm1373_vm2, %v1361_v11, 0  ;;  %2596 = vmatmul.mubr.msk.bf16.vlgmr.msra.gmra.mrb[28].mxu0 %vm1373_vm2, %v1355_v10  ;;  %v1611_v45 = vsel %vm1609_vm3, %v1363_v34, 0  ;;  %vm1371_vm4 = vcmp.le.s32.totalorder %v1370_v3, %v1368_v52 }
 0x245   : > { %2606 = vmatpush3.bf16.xpose.msra.mxu0 %v1470_v14  ;;  %2607 = vmatprep.mubr.msk.bf16.mxu0 %vm2856_vm1, %v2855_v9  ;;  %v1372_v5 = vsel %vm1371_vm4, 0.0, %v2857_v4 }
 0x246   : > { %2617 = vmatprep.subr.bf16.mxu0 %v2855_v9 }
 0x247   : > { %v894_v16 = vpop.f32.mrb[12].mxu0  ;;  %v1219_v17 = vpop.f32.mrb[12].mxu1 }
 0x248   : > { %v895_v18 = vadd.f32 %v2323_v15, %v894_v16  ;;  %v2535_v19 = vpop.f32.mrb[13].mxu0  ;;  %v2575_v20 = vpop.f32.mrb[13].mxu1  ;;  %v1220_v61 = vadd.f32 %v2368_v58, %v1219_v17 }
 0x249   : > { %v897_v22 = vpop.f32.mrb[14].mxu0  ;;  %v1222_v23 = vpop.f32.mrb[14].mxu1 }
 0x24a   : > { %v1360_v24 = vpack.c.bf16 %v895_v18, %v895_v18  ;;  %v2536_v25 = vpop.f32.mrb[15].mxu0  ;;  %v2576_v26 = vpop.f32.mrb[15].mxu1  ;;  %v1358_v63 = vpack.c.bf16 %v1220_v61, %v1220_v61 }
 0x24c   : > { %v1424_v29 = vsel %vm1373_vm2, %v1360_v24, 0 }
 0x24d   : > { %2600 = vmatpush3.bf16.xpose.msra.mxu1 %v1424_v29 }
 0x24e   : > { %2611 = vmatprep.subr.bf16.mxu1 %v2855_v9 }
 0x24f   : > { %v1024_v32 = vpop.f32.mrb[16].mxu0  ;;  %v3198_v33 = vpop.f32.mrb[16].mxu1 }
 0x250   : > { %v1025_v35 = vadd.f32 %v2341_v30, %v1024_v32  ;;  %v2551_v36 = vpop.f32.mrb[17].mxu0  ;;  %v2591_v37 = vpop.f32.mrb[17].mxu1 }
 0x251   : > { %v1027_v38 = vpop.f32.mrb[18].mxu0  ;;  %v1352_v39 = vpop.f32.mrb[18].mxu1 }
 0x252   : > { %v1357_v41 = vpack.c.bf16 %v1025_v35, %v1025_v35  ;;  %v2552_v42 = vpop.f32.mrb[19].mxu0  ;;  %v2592_v44 = vpop.f32.mrb[19].mxu1 }
 0x254   : > { %2602 = vmatmul.mubr.msk.bf16.vlgmr.msra.gmra.mrb[20].mxu1 %vm1373_vm2, %v1356_v40  ;;  %2608 = vmatmul.mubr.msk.bf16.vlgmr.msra.gmra.mrb[32].mxu0 %vm1373_vm2, %v1357_v41 }
 0x255   : > { %2618 = vmatpush3.bf16.msra.mxu0 %v1611_v45  ;;  %2613 = vmatprep.mubr.msk.bf16.mxu1 %vm2856_vm1, %v2855_v9 }
 0x256   : > { %2619 = vmatprep.mubr.msk.bf16.mxu0 %vm2856_vm1, %v2855_v9  ;;  %2629 = vmatprep.subr.bf16.mxu0 %v2855_v9 }
 0x257   : > { %v3208_v43 = vpop.f32.mrb[20].mxu0 }
 0x258   : > { %v2567_v46 = vpop.f32.mrb[21].mxu0 }
 0x259   : > { %v1157_v47 = vpop.f32.mrb[22].mxu0 }
 0x25a   : > { %v2568_v48 = vpop.f32.mrb[23].mxu0 }
 0x25f   : > { %v1284_v50 = vpop.f32.mrb[24].mxu0 }
 0x260   : > { %v1285_v51 = vadd.f32 %v2377_v49, %v1284_v50  ;;  %v2583_v53 = vpop.f32.mrb[25].mxu0 }
 0x261   : > { %v1287_v55 = vpop.f32.mrb[26].mxu0 }
 0x262   : > { %v1362_v56 = vpack.c.bf16 %v1285_v51, %v1285_v51  ;;  %v2584_v57 = vpop.f32.mrb[27].mxu0  ;;  %v2359_v55 = vld [vmem:[%s3409_s8 + $0x2] ss:$0 sm:$0xff] }
 0x264   : > { %v1516_v60 = vsel %vm1373_vm2, %v1362_v56, 0  ;;  %v1155_v56 = vadd.f32 %v2359_v55, %v3208_v43  ;;  %v2386_v43 = vld [vmem:[%s3409_s8 + $0x3] ss:$0 sm:$0xff] }
 0x265   : > { %2612 = vmatpush3.bf16.xpose.msra.mxu1 %v1516_v60 }
 0x266   : > { %2623 = vmatprep.subr.bf16.mxu1 %v2855_v9  ;;  %v1365_v58 = vpack.c.bf16 %v1155_v56, %v1155_v56 }
 0x268   : > { %v1703_v61 = vsel %vm1609_vm3, %v1365_v58, 0 }
 0x26c   : > { %2614 = vmatmul.mubr.msk.bf16.vlgmr.msra.gmra.mrb[24].mxu1 %vm1373_vm2, %v1358_v63 }
 0x26d   : > { %2624 = vmatpush3.bf16.msra.mxu1 %v1657_v1  ;;  %2625 = vmatprep.mubr.msk.bf16.mxu1 %vm2856_vm1, %v2855_v9  ;;  %v1350_v1 = vadd.f32 %v2386_v43, %v3198_v33 }
 0x26e   : > { %2635 = vmatprep.subr.bf16.mxu1 %v2855_v9 }
 0x26f   : > { %v1366_v3 = vpack.c.bf16 %v1350_v1, %v1350_v1 }
 0x317   : > { %v1414_v6 = vpop.f32.mrb[28].mxu0 }
 0x318   : > { %v1415_v7 = vadd.f32 %v1414_v6, %v1372_v5  ;;  %v2597_v8 = vpop.f32.mrb[29].mxu0 }
 0x319   : > { %v1417_v10 = vpop.f32.mrb[30].mxu0  ;;  %v1749_v8 = vsel %vm1609_vm3, %v1366_v3, 0 }
 0x31a   : > { %v2598_v11 = vpop.f32.mrb[31].mxu0  ;;  %v1558_v12 = vsel %vm1373_vm2, %v1415_v7, -inf }
 0x31b   : > { %1559 = vmax.xlane.f32.xlu1 %v1558_v12 }
 0x327   : > { %v1460_v13 = vpop.f32.mrb[20].mxu1  ;;  %v1506_v14 = vpop.f32.mrb[32].mxu0 }
 0x328   : > { %v1461_v15 = vadd.f32 %v1460_v13, %v1372_v5  ;;  %v1507_v16 = vadd.f32 %v1506_v14, %v1372_v5  ;;  %v2603_v17 = vpop.f32.mrb[21].mxu1  ;;  %v2609_v18 = vpop.f32.mrb[33].mxu0  ;;  %v1792_v13 = vld [vmem:[%s3410_s9] sm:$0xf] }
 0x329   : > { %v1463_v19 = vpop.f32.mrb[22].mxu1  ;;  %v1509_v20 = vpop.f32.mrb[34].mxu0  ;;  %v1846_v14 = vsel %vm1609_vm3, %v1792_v13, 0  ;;  %v2403_v17 = vld [vmem:[%s3410_s9 + $0xc] sm:$0xf] }
 0x32a   : > { %v2604_v21 = vpop.f32.mrb[23].mxu1  ;;  %v2610_v22 = vpop.f32.mrb[35].mxu0  ;;  %v1561_v23 = vsel %vm1373_vm2, %v1461_v15, -inf  ;;  %v1564_v24 = vsel %vm1373_vm2, %v1507_v16, -inf  ;;  %v2406_v13 = vld [vmem:[%s3412_s11] ss:$0 sm:$0xff] }
 0x32b   : > { %1562 = vmax.xlane.f32.xlu1 %v1561_v23  ;;  %1565 = vmax.xlane.f32.xlu0 %v1564_v24  ;;  %v1945_v21 = vsel %vm1609_vm3, %v2403_v17, 0  ;;  %v2401_v24 = vld [vmem:[%s3410_s9 + $0x8] sm:$0xf] }
 0x33f   : > { %v1552_v25 = vpop.f32.mrb[24].mxu1 }
 0x340   : > { %v1553_v26 = vadd.f32 %v1552_v25, %v1372_v5  ;;  %v2615_v27 = vpop.f32.mrb[25].mxu1 }
 0x341   : > { %v1555_v28 = vpop.f32.mrb[26].mxu1 }
 0x342   : > { %v2616_v29 = vpop.f32.mrb[27].mxu1  ;;  %v1567_v30 = vsel %vm1373_vm2, %v1553_v26, -inf }
 0x343   : > { %1568 = vmax.xlane.f32.xlu1 %v1567_v30  ;;  %v1895_v29 = vsel %vm1609_vm3, %v2401_v24, 0  ;;  %v2767_v24 = vld [vmem:[%s3416_s15 + $0x30] sm:$0xff]  }
 0x3a8   : > { %v1560_v31 = vpop.xlane.xlu1 %1559 }
 0x3a9   : > { %v1570_v32 = vsub.f32 %v1415_v7, %v1560_v31 }
 0x3ab   : > { %v1574_v34 = vmul.f32 1.442695, %v1570_v32 }
 0x3ad   : > { %2771 = vpow2.f32 %v1574_v34 }
 0x3b7   : > { %v2772_v35 = vpop.eup %2771 }
 0x3b8   : > { %v1563_v36 = vpop.xlane.xlu1 %1562  ;;  %v1566_v37 = vpop.xlane.xlu0 %1565  ;;  %v1582_v38 = vsel %vm1373_vm2, %v2772_v35, 0.0 }
 0x3b9   : > { %v1571_v39 = vsub.f32 %v1461_v15, %v1563_v36  ;;  %v1572_v40 = vsub.f32 %v1507_v16, %v1566_v37  ;;  %1583 = vadd.xlane.f32.xlu0 %v1582_v38  ;;  %v2398_v15 = vld [vmem:[%s3410_s9 + $0x4] sm:$0xf] }
 0x3ba   : > { %v1800_v16 = vsel %vm1609_vm3, %v2398_v15, 0  ;;  %v2407_v15 = vld [vmem:[%s3413_s12] ss:$0 sm:$0xff] }
 0x3bb   : > { %v1576_v41 = vmul.f32 1.442695, %v1571_v39  ;;  %v1578_v42 = vmul.f32 1.442695, %v1572_v40 }
 0x3bd   : > { %2773 = vpow2.f32 %v1576_v41 }
 0x3be   : > { %2775 = vpow2.f32 %v1578_v42 }
 0x3c7   : > { %v2774_v44 = vpop.eup %2773 }
 0x3c8   : > { %v2776_v45 = vpop.eup %2775  ;;  %v1585_v46 = vsel %vm1373_vm2, %v2774_v44, 0.0 }
 0x3c9   : > { %1586 = vadd.xlane.f32.xlu1 %v1585_v46  ;;  %v1588_v47 = vsel %vm1373_vm2, %v2776_v45, 0.0 }
 0x3ca   : > { %1589 = vadd.xlane.f32.xlu0 %v1588_v47 }
 0x3d0   : > { %v1569_v48 = vpop.xlane.xlu1 %1568 }
 0x3d1   : > { %v1573_v49 = vsub.f32 %v1553_v26, %v1569_v48 }
 0x3d3   : > { %v1580_v50 = vmul.f32 1.442695, %v1573_v49 }
 0x3d5   : > { %2777 = vpow2.f32 %v1580_v50 }
 0x3df   : > { %v2778_v51 = vpop.eup %2777 }
 0x3e0   : > { %v1591_v53 = vsel %vm1373_vm2, %v2778_v51, 0.0 }
 0x3e1   : > { %1592 = vadd.xlane.f32.xlu1 %v1591_v53 }
 0x446   : > { %v1584_v54 = vpop.xlane.xlu0 %1583 }
 0x447   : > { %2779 = vrcp.f32 %v1584_v54 }
 0x451   : > { %v2780_v57 = vpop.eup %2779 }
 0x452   : > { %v1598_v59 = vmul.f32 %v2780_v57, %v2772_v35 }
 0x454   : > { %v1602_v60 = vpack.c.bf16 %v1598_v59, %v1598_v59  ;;  %v2405_v59 = vld [vmem:[%s3411_s10] ss:$0 sm:$0xff] }
 0x456   : > { %v1587_v62 = vpop.xlane.xlu1 %1586  ;;  %2620 = vmatmul.mubr.msk.bf16.vlgmr.msra.gmra.mrb[36].mxu0 %vm1373_vm2, %v1602_v60 }
 0x457   : > { %2781 = vrcp.f32 %v1587_v62  ;;  %2630 = vmatpush3.bf16.msra.mxu0 %v1703_v61  ;;  %v1590_v63 = vpop.xlane.xlu0 %1589  ;;  %2631 = vmatprep.mubr.msk.bf16.mxu0 %vm2856_vm1, %v2855_v9 }
 0x458   : > { %2783 = vrcp.f32 %v1590_v63  ;;  %2641 = vmatprep.subr.bf16.mxu0 %v2855_v9 }
 0x461   : > { %v2782_v2 = vpop.eup %2781 }
 0x462   : > { %v2784_v52 = vpop.eup %2783  ;;  %v1599_v4 = vmul.f32 %v2782_v2, %v2774_v44 }
 0x463   : > { %v1600_v5 = vmul.f32 %v2784_v52, %v2776_v45 }
 0x464   : > { %v1603_v6 = vpack.c.bf16 %v1599_v4, %v1599_v4 }
 0x465   : > { %v1604_v7 = vpack.c.bf16 %v1600_v5, %v1600_v5 }
 0x466   : > { %2626 = vmatmul.mubr.msk.bf16.vlgmr.msra.gmra.mrb[28].mxu1 %vm1373_vm2, %v1603_v6 }
 0x467   : > { %2632 = vmatmul.mubr.msk.bf16.vlgmr.msra.gmra.mrb[40].mxu0 %vm1373_vm2, %v1604_v7  ;;  %2636 = vmatpush3.bf16.msra.mxu1 %v1749_v8  ;;  %v2759_v7 = vld [vmem:[%s3414_s13] sm:$0xff]  }
 0x468   : > { %2637 = vmatprep.mubr.msk.bf16.mxu1 %vm2856_vm1, %v2855_v9  ;;  %2647 = vmatprep.subr.bf16.mxu1 %v2855_v9  ;;  %v2761_v8 = vld [vmem:[%s3416_s15] sm:$0xff]  }
 0x469   : > { %2643 = vmatprep.mubr.msk.bf16.mxu0 %vm2856_vm1, %v2855_v9  ;;  %2642 = vmatpush3.bf16.msra.mxu0 %v1800_v16 }
 0x46a   : > { %2653 = vmatprep.subr.bf16.mxu0 %v2855_v9 }
 0x46e   : > { %v1593_v33 = vpop.xlane.xlu1 %1592 }
 0x46f   : > { %2785 = vrcp.f32 %v1593_v33 }
 0x479   : > { %v2786_v10 = vpop.eup %2785 }
 0x47a   : > { %v1601_v11 = vmul.f32 %v2786_v10, %v2778_v51 }
 0x47c   : > { %v1605_v12 = vpack.c.bf16 %v1601_v11, %v1601_v11 }
 0x47e   : > { %2638 = vmatmul.mubr.msk.bf16.vlgmr.msra.gmra.mrb[32].mxu1 %vm1373_vm2, %v1605_v12 }
 0x47f   : > { %2649 = vmatprep.mubr.msk.bf16.mxu1 %vm2856_vm1, %v2855_v9  ;;  %2648 = vmatpush3.bf16.msra.mxu1 %v1846_v14 }
 0x480   : > { %2659 = vmatprep.subr.bf16.mxu1 %v2855_v9 }
 0x529   : > { %v1647_v18 = vpop.f32.mrb[36].mxu0 }
 0x52a   : > { %v1791_v19 = vpack.c.bf16 %v1647_v18, %v1647_v18  ;;  %v2621_v20 = vpop.f32.mrb[37].mxu0 }
 0x52b   : > { %v1650_v22 = vpop.f32.mrb[38].mxu0  ;;  %v2763_v20 = vld [vmem:[%s3416_s15 + $0x10] sm:$0xff]  }
 0x52c   : > { %v2622_v23 = vpop.f32.mrb[39].mxu0  ;;  %2650 = vmatmul.mubr.msk.bf16.vlgmr.msra.gmra.mrb[36].mxu1 %vm1373_vm2, %v1791_v19  ;;  %v2762_v19 = vld [vmem:[%s3416_s15 + $0x8] sm:$0xff]   ;;  %v2765_v22 = vld [vmem:[%s3416_s15 + $0x20] sm:$0xff]  }
 0x52d   : > { %2660 = vmatpush3.bf16.msra.mxu1 %v1945_v21  ;;  %2661 = vmatprep.mubr.msk.bf16.mxu1 %vm2856_vm1, %v2855_v9  ;;  %v2764_v21 = vld [vmem:[%s3416_s15 + $0x18] sm:$0xff]   ;;  %v2766_v23 = vld [vmem:[%s3416_s15 + $0x28] sm:$0xff]  }
 0x52e   : > { %2673 = vmatprep.subr.bf16.mxu1 %v2855_v9 }
 0x539   : > { %v1693_v25 = vpop.f32.mrb[28].mxu1 }
 0x53a   : > { %v1793_v26 = vpack.c.bf16 %v1693_v25, %v1693_v25  ;;  %v1739_v27 = vpop.f32.mrb[40].mxu0  ;;  %v2627_v28 = vpop.f32.mrb[29].mxu1  ;;  %v2768_v25 = vld [vmem:[%s3416_s15 + $0x38] sm:$0xff]  }
 0x53b   : > { %v2633_v30 = vpop.f32.mrb[41].mxu0  ;;  %v1696_v31 = vpop.f32.mrb[30].mxu1  ;;  %v1888_v36 = vpack.c.bf16 %v1739_v27, %v1739_v27 }
 0x53c   : > { %v1742_v32 = vpop.f32.mrb[42].mxu0  ;;  %v2628_v34 = vpop.f32.mrb[31].mxu1  ;;  %2644 = vmatmul.mubr.msk.bf16.vlgmr.msra.gmra.mrb[44].mxu0 %vm1373_vm2, %v1793_v26  ;;  %v2408_v26 = vld [vmem:[%s3415_s14] ss:$0 sm:$0xff] }
 0x53d   : > { %v2634_v35 = vpop.f32.mrb[43].mxu0  ;;  %2654 = vmatpush3.bf16.msra.mxu0 %v1895_v29  ;;  %2655 = vmatprep.mubr.msk.bf16.mxu0 %vm2856_vm1, %v2855_v9 }
 0x53e   : > { %2665 = vmatprep.subr.bf16.mxu0 %v2855_v9 }
 0x544   : > { %2656 = vmatmul.mubr.msk.bf16.vlgmr.msra.gmra.mrb[48].mxu0 %vm1373_vm2, %v1888_v36 }
 0x545   : > { %2669 = vmatprep.mubr.msk.bf16.mxu0 %vm2856_vm1, %v2855_v9  ;;  %2666 = vmatpush3.bf16.msra.mxu0 %v2759_v7 }
 0x546   : > { %2667 = vmatprep.subr.bf16.mxu0 %v2855_v9 }
 0x551   : > { %v1785_v37 = vpop.f32.mrb[32].mxu1 }
 0x552   : > { %v1938_v38 = vpack.c.bf16 %v1785_v37, %v1785_v37  ;;  %v2639_v39 = vpop.f32.mrb[33].mxu1 }
 0x553   : > { %v1788_v40 = vpop.f32.mrb[34].mxu1 }
 0x554   : > { %v2640_v41 = vpop.f32.mrb[35].mxu1  ;;  %2662 = vmatmul.mubr.msk.bf16.vlgmr.msra.gmra.mrb[40].mxu1 %vm1373_vm2, %v1938_v38 }
 0x555   : > { %2689 = vmatprep.mubr.msk.bf16.mxu1 %vm2856_vm1, %v2855_v9  ;;  %2674 = vmatpush3.bf16.msra.mxu1 %v2761_v8 }
 0x556   : > { %2675 = vmatprep.subr.bf16.mxu1 %v2855_v9 }
 0x559   : > { %2676 = vmatpush3.bf16.msra.mxu1 %v2762_v19 }
 0x55a   : > { %2677 = vmatprep.subr.bf16.mxu1 %v2855_v9 }
 0x55d   : > { %2678 = vmatpush3.bf16.msra.mxu1 %v2763_v20 }
 0x55e   : > { %2679 = vmatprep.subr.bf16.mxu1 %v2855_v9 }
 0x561   : > { %2680 = vmatpush3.bf16.msra.mxu1 %v2764_v21 }
 0x562   : > { %2681 = vmatprep.subr.bf16.mxu1 %v2855_v9 }
 0x565   : > { %2682 = vmatpush3.bf16.msra.mxu1 %v2765_v22 }
 0x566   : > { %2683 = vmatprep.subr.bf16.mxu1 %v2855_v9 }
 0x569   : > { %2684 = vmatpush3.bf16.msra.mxu1 %v2766_v23 }
 0x56a   : > { %2685 = vmatprep.subr.bf16.mxu1 %v2855_v9 }
 0x56d   : > { %2686 = vmatpush3.bf16.msra.mxu1 %v2767_v24 }
 0x56e   : > { %2687 = vmatprep.subr.bf16.mxu1 %v2855_v9 }
 0x571   : > { %2688 = vmatpush3.bf16.msra.mxu1 %v2768_v25 }
 0x5ff   : > { %v1882_v42 = vpop.f32.mrb[36].mxu1 }
 0x600   : > { %v2651_v44 = vpop.f32.mrb[37].mxu1 }
 0x601   : > { %v1885_v45 = vpop.f32.mrb[38].mxu1 }
 0x602   : > { %v2652_v46 = vpop.f32.mrb[39].mxu1 }
 0x60f   : > { %v1836_v47 = vpop.f32.mrb[44].mxu0 }
 0x610   : > { %v1883_v48 = vadd.f32 %v1882_v42, %v1836_v47  ;;  %v2645_v49 = vpop.f32.mrb[45].mxu0  ;;  %v2412_v42 = vld [vmem:[%s3417_s16] ss:$0 sm:$0xff] }
 0x611   : > { %v1839_v50 = vpop.f32.mrb[46].mxu0 }
 0x612   : > { %v2646_v51 = vpop.f32.mrb[47].mxu0 }
 0x617   : > { %v1931_v53 = vpop.f32.mrb[48].mxu0 }
 0x618   : > { %v1937_v54 = vadd.f32 %v1931_v53, %v1883_v48  ;;  %v2657_v55 = vpop.f32.mrb[49].mxu0 }
 0x619   : > { %v1934_v56 = vpop.f32.mrb[50].mxu0 }
 0x61a   : > { %v2658_v57 = vpop.f32.mrb[51].mxu0 }
 0x627   : > { %v1981_v58 = vpop.f32.mrb[40].mxu1 }
 0x628   : > { %v1987_v60 = vadd.f32 %v1981_v58, %v1937_v54  ;;  %v2663_v61 = vpop.f32.mrb[41].mxu1 }
 0x629   : > { %v1984_v62 = vpop.f32.mrb[42].mxu1 }
 0x62a   : > { %v1995_v63 = vadd.f32 %v2405_v59, %v1987_v60  ;;  %v2664_v43 = vpop.f32.mrb[43].mxu1 }
 0x62c   : > { %v3295_v1 = vadd.f32 %v1995_v63, %v3002_v0  ;;  %v2760_v0 = vld [vmem:[%s3414_s13 + $0x8] sm:$0xff]  }
 0x62d   : > { %2668 = vmatpush3.bf16.msra.mxu0 %v2760_v0 }
 0x62e   : > { %v1999_v2 = vsel %vm548_vm0, %v3295_v1, 0.0 }
 0x62f   : > { %2000 = vadd.xlane.f32.xlu0 %v1999_v2 }
 0x6bc   : > { %v2001_v52 = vpop.xlane.xlu0 %2000 }
 0x6bd   : > { %v2002_v3 = vmul.f32 0.03125, %v2001_v52 }
 0x6bf   : > { %v2003_v4 = vsub.f32 %v3295_v1, %v2002_v3 }
 0x6c1   : > { %v2004_v5 = vmul.f32 %v2003_v4, %v2003_v4 }
 0x6c3   : > { %v2005_v6 = vsel %vm548_vm0, %v2004_v5, 0.0 }
 0x6c4   : > { %2006 = vadd.xlane.f32.xlu1 %v2005_v6 }
 0x751   : > { %v2007_v33 = vpop.xlane.xlu1 %2006 }
 0x752   : > { %v2008_v10 = vmul.f32 0.03125, %v2007_v33 }
 0x754   : > { %v2009_v11 = vadd.f32 1e-05, %v2008_v10 }
 0x756   : > { %2787 = vrsqrt.f32 %v2009_v11 }
 0x760   : > { %v2788_v12 = vpop.eup %2787 }
 0x761   : > { %v2011_v14 = vmul.f32 %v2788_v12, %v2003_v4 }
 0x763   : > { %v2018_v16 = vmul.f32 %v2406_v13, %v2011_v14 }
 0x765   : > { %v2025_v17 = vadd.f32 %v2407_v15, %v2018_v16 }
 0x767   : > { %v2026_v18 = vpack.c.bf16 %v2025_v17, %v2025_v17 }
 0x769   : > { %2670 = vmatmul.mubr.msk.bf16.vlgmr.msra.gmra.mrb[52].mxu0 %vm548_vm0, %v2026_v18 }
 0x83c   : > { %v2087_v27 = vpop.f32.mrb[52].mxu0 }
 0x83d   : > { %v2088_v28 = vadd.f32 %v2408_v26, %v2087_v27  ;;  %v2671_v29 = vpop.f32.mrb[53].mxu0 }
 0x83e   : > { %v2090_v30 = vpop.f32.mrb[54].mxu0 }
 0x83f   : > { %v2094_v31 = vmul.f32 0.044715, %v2088_v28  ;;  %v2672_v32 = vpop.f32.mrb[55].mxu0  ;;  %v2093_v9 = vmul.f32 0.5, %v2088_v28 }
 0x841   : > { %v2095_v34 = vmul.f32 %v2094_v31, %v2088_v28 }
 0x843   : > { %v2096_v35 = vmul.f32 %v2095_v34, %v2088_v28 }
 0x845   : > { %v2097_v36 = vadd.f32 %v2096_v35, %v2088_v28 }
 0x847   : > { %v2098_v37 = vmul.f32 0.7978846, %v2097_v36 }
 0x849   : > { %2789 = vtanh.f32 %v2098_v37 }
 0x853   : > { %v2790_v38 = vpop.eup %2789 }
 0x854   : > { %v2100_v39 = vadd.f32 1.0, %v2790_v38 }
 0x856   : > { %v2101_v40 = vmul.f32 %v2100_v39, %v2093_v9 }
 0x858   : > { %v2102_v41 = vpack.c.bf16 %v2101_v40, %v2101_v40 }
 0x85a   : > { %2690 = vmatmul.mubr.bf16.vlgmr.msra.gmra.mrb[44].mxu1 %v2102_v41 }
 0x92d   : > { %v2208_v44 = vpop.f32.mrb[44].mxu1 }
 0x92e   : > { %v2209_v45 = vadd.f32 %v2412_v42, %v2208_v44  ;;  %v2691_v46 = vpop.f32.mrb[45].mxu1 }
 0x92f   : > { %v2211_v47 = vpop.f32.mrb[46].mxu1 }
 0x930   : > { %v2214_v48 = vadd.f32 %v2209_v45, %v3295_v1  ;;  %v2692_v49 = vpop.f32.mrb[47].mxu1 }
 0x932   : > { %2215 = vst.msk [vmem:[%s539_s22] sm:$0xff] %vm548_vm0, %v2214_v48 }
 0x933   : > { %2804 = shalt.err (!%p2801_p3)
}
 0x934   : > { %s2805_s30 = scalar_lea.hbm %s3358_s2, 128  ;;  %s2809_s26 = scalar_lea.hbm %s3418_s17, 256 }
 0x935   : > { %p2806_p4 = scmp.ne.s32.totalorder %s3358_s2, %s2805_s30  ;;  %p2810_p9 = scmp.lt.u32.totalorder %s3358_s2, %s3418_s17 }
 0x936   : > { %p2811_p10 = scmp.lt.u32.totalorder %s2809_s26, %s2805_s30  ;;  %p2813_p12 = scmp.lt.u32.totalorder %s2805_s30, %s3358_s2 }
 0x937   : > { %p2807_p7 = pnand %p2806_p4, %p2987_p5 }
 0x938   : > { %p2812_p11 = por %p2811_p10, %p2810_p9 }
 0x939   : > { %p2808_p8 = pneg %p2807_p7 }
 0x93a   : > { %p2814_p13 = por %p2813_p12, %p2812_p11 }
 0x93c   : > { %p2815_p0 = pnand %p2814_p13, %p2808_p8 }
 0x93e   : > { %2818 = shalt.err (!%p2815_p0)
}
 0x93f   : > { %2693 = dma.vmem_to_hbm [thread:$0]  (%p2987_p5), %s3360_s29, 128, %s3358_s2, %s2217_s28  }
 0x940 PF: > { %p2699_p1 = scmp.ge.s32.totalorder %s2853_s27, 2  ;;  %s2242_s3 = sand.u32 1, %s2841_s24  }
 0x941   : > { %s2243_s19 = scalar_lea.sflag [#allocation3], %s2242_s3 }
 0x942   : > { %p2696_p2 = pnand %p2699_p1, %p2991_p6 }
 0x944   : > { %2836 = dma.done.wait (!%p2696_p2), %s2243_s19, 128  }
 0x945   : > { %2838 = vsyncadd (!%p2696_p2), %s2243_s19, 4294967168  ;;  %s3435_s27 = sld [smem:[#allocation6_spill]]  ;;  %s3436_s21 = sld [smem:[#allocation5_spill]] }
 0x946   : > { %s3437_s26 = sld [smem:[#allocation7_spill]]  ;;  %s3438_s24 = smov %s2845_s25 }
 0x94b   : > { %p27_p3 = scmp.ge.s32.totalorder %s3435_s27, 4   ;;  %s3439_s25 = smov %s3436_s21 }
 0x94d   :  { %29 = sbr.rel (!%p27_p3) target bundleno = 8 (0x8), region = 144 }
 0x954   :  { %2248 = vsyncpa [#allocation3], 1 }
 0x955   :  { %2250 = vsyncpa [#allocation3 + $0x1], 1 }

</bundles_post_ra>
